<compile_context>
chip_gen: v6e
topology: v6e:2x2x1
jax: 0.10.0
libtpu: 0.0.40
codegen_flags: <defaults>
</compile_context>

<pallas_src>
import jax
import jax.numpy as jnp
from jax.experimental import pallas as pl
from jax.experimental.pallas import tpu as pltpu


# ------------------------------ small helpers -------------------------------

def _round_up(x, m):
    return ((x + m - 1) // m) * m


def _choose_tile(m, tile_max=512):
    """Row-tile size: whole (8-aligned) M if small, else tile_max-row blocks."""
    m8 = _round_up(m, 8)
    if m8 <= tile_max:
        return m8, m8
    return _round_up(m, tile_max), tile_max


def _pad_rows(a, m_pad):
    m = a.shape[0]
    if m_pad == m:
        return a
    return jnp.pad(a, ((0, m_pad - m), (0, 0)))


# ----------------------------- Pallas kernels -------------------------------

def _gemm_leaky_kernel(a_ref, w_ref, o_ref):
    # o = leaky_relu(A @ W, 0.2); bf16 operands, f32 MXU accumulation, bf16 out.
    y = jnp.dot(a_ref[...], w_ref[...], preferred_element_type=jnp.float32)
    o_ref[...] = jnp.where(y >= 0.0, y, 0.2 * y).astype(o_ref.dtype)


def _gemm_stats_kernel(a_ref, w_ref, y_ref, sum_ref, sq_ref):
    # Conv2 pass A: y = A @ W (pre-BN, stored bf16) plus per-channel
    # sum / sum-of-squares accumulated across the M-tile grid. Stats are taken
    # from the bf16-rounded values so pass B normalizes exactly what was stored.
    y = jnp.dot(a_ref[...], w_ref[...], preferred_element_type=jnp.float32)
    yb = y.astype(y_ref.dtype)
    y_ref[...] = yb
    yf = yb.astype(jnp.float32)

    @pl.when(pl.program_id(0) == 0)
    def _():
        sum_ref[...] = jnp.zeros_like(sum_ref)
        sq_ref[...] = jnp.zeros_like(sq_ref)

    sum_ref[...] += jnp.sum(yf, axis=0, keepdims=True)
    sq_ref[...] += jnp.sum(yf * yf, axis=0, keepdims=True)


def _bn_leaky_kernel(y_ref, scale_ref, shift_ref, o_ref):
    # Conv2 pass B: y * scale + shift  (scale = rstd, shift = -mean*rstd since
    # gamma=1, beta=0) followed by LeakyReLU(0.2).
    yn = y_ref[...].astype(jnp.float32) * scale_ref[...] + shift_ref[...]
    o_ref[...] = jnp.where(yn >= 0.0, yn, 0.2 * yn).astype(o_ref.dtype)


def _dot_sigmoid_kernel(a_ref, w_ref, o_ref):
    # Conv3: Cout == 1 -> per-row dot product (VPU multiply + lane reduce) + sigmoid.
    a = a_ref[...].astype(jnp.float32)
    w = w_ref[...].astype(jnp.float32)
    y = jnp.sum(a * w, axis=-1, keepdims=True)
    o_ref[...] = jax.nn.sigmoid(y)


# ------------------------------ Pallas wrappers ------------------------------

def _conv_gemm_leaky(patches, w_mat, tile_max=512):
    m, k = patches.shape
    _, n = w_mat.shape
    m_pad, tm = _choose_tile(m, tile_max)
    a = _pad_rows(patches, m_pad).astype(jnp.bfloat16)
    w = w_mat.astype(jnp.bfloat16)
    out = pl.pallas_call(
        _gemm_leaky_kernel,
        out_shape=jax.ShapeDtypeStruct((m_pad, n), jnp.bfloat16),
        grid=(m_pad // tm,),
        in_specs=[pl.BlockSpec((tm, k), lambda i: (i, 0)),
                  pl.BlockSpec((k, n), lambda i: (0, 0))],
        out_specs=pl.BlockSpec((tm, n), lambda i: (i, 0)),
        compiler_params=pltpu.CompilerParams(dimension_semantics=("parallel",)),
    )(a, w)
    return out[:m]


def _conv_gemm_bn_leaky(patches, w_mat, eps=1e-5, tile_max=512):
    """Conv GEMM + BatchNorm2d (training-mode batch stats) + LeakyReLU(0.2).

    Two Pallas passes so the row (M) dimension can be tiled without corrupting
    the batch statistics: zero-padded rows add 0 to sum/sumsq and we divide by
    the true row count, so mean/var match full-batch BN exactly.
    """
    m, k = patches.shape
    _, n = w_mat.shape
    m_pad, tm = _choose_tile(m, tile_max)
    a = _pad_rows(patches, m_pad).astype(jnp.bfloat16)
    w = w_mat.astype(jnp.bfloat16)
    grid = (m_pad // tm,)

    y, s, sq = pl.pallas_call(
        _gemm_stats_kernel,
        out_shape=(jax.ShapeDtypeStruct((m_pad, n), jnp.bfloat16),
                   jax.ShapeDtypeStruct((1, n), jnp.float32),
                   jax.ShapeDtypeStruct((1, n), jnp.float32)),
        grid=grid,
        in_specs=[pl.BlockSpec((tm, k), lambda i: (i, 0)),
                  pl.BlockSpec((k, n), lambda i: (0, 0))],
        out_specs=(pl.BlockSpec((tm, n), lambda i: (i, 0)),
                   pl.BlockSpec((1, n), lambda i: (0, 0)),
                   pl.BlockSpec((1, n), lambda i: (0, 0))),
        compiler_params=pltpu.CompilerParams(dimension_semantics=("arbitrary",)),
    )(a, w)

    # Tiny per-channel finalize (divide / rsqrt) done in XLA between the passes.
    count = jnp.float32(m)                              # true row count (no padding)
    mean = s / count
    var = jnp.maximum(sq / count - mean * mean, 0.0)    # biased variance (training BN)
    scale = jax.lax.rsqrt(var + eps)                    # gamma = 1
    shift = -mean * scale                               # beta  = 0

    out = pl.pallas_call(
        _bn_leaky_kernel,
        out_shape=jax.ShapeDtypeStruct((m_pad, n), jnp.bfloat16),
        grid=grid,
        in_specs=[pl.BlockSpec((tm, n), lambda i: (i, 0)),
                  pl.BlockSpec((1, n), lambda i: (0, 0)),
                  pl.BlockSpec((1, n), lambda i: (0, 0))],
        out_specs=pl.BlockSpec((tm, n), lambda i: (i, 0)),
        compiler_params=pltpu.CompilerParams(dimension_semantics=("parallel",)),
    )(y, scale, shift)
    return out[:m]


def _dot_sigmoid(a, w_row, tile_max=128):
    m, k = a.shape
    m_pad, tm = _choose_tile(m, tile_max)
    a_p = _pad_rows(a, m_pad).astype(jnp.bfloat16)
    out = pl.pallas_call(
        _dot_sigmoid_kernel,
        out_shape=jax.ShapeDtypeStruct((m_pad, 1), jnp.float32),
        grid=(m_pad // tm,),
        in_specs=[pl.BlockSpec((tm, k), lambda i: (i, 0)),
                  pl.BlockSpec((1, k), lambda i: (0, 0))],
        out_specs=pl.BlockSpec((tm, 1), lambda i: (i, 0)),
        compiler_params=pltpu.CompilerParams(dimension_semantics=("parallel",)),
    )(a_p, w_row.astype(jnp.bfloat16))
    return out[:m]


# -------------------------------- JAX glue -----------------------------------

def _im2col_nhwc(x, kh, kw, stride, pad):
    """x: (N, H, W, C) -> patches (N*OH*OW, kh*kw*C); K ordering is (kh, kw, C)."""
    n, h, w, c = x.shape
    if pad:
        x = jnp.pad(x, ((0, 0), (pad, pad), (pad, pad), (0, 0)))
    oh = (h + 2 * pad - kh) // stride + 1
    ow = (w + 2 * pad - kw) // stride + 1
    cols = []
    for i in range(kh):
        for j in range(kw):
            cols.append(x[:, i:i + stride * oh:stride, j:j + stride * ow:stride, :])
    p = jnp.concatenate(cols, axis=-1)                   # (N, OH, OW, kh*kw*C)
    return p.reshape(n * oh * ow, kh * kw * c), oh, ow


def _weight_to_gemm(weight):
    """(Cout, Cin, kh, kw) -> (kh*kw*Cin, Cout), matching the im2col K ordering."""
    cout, cin, kh, kw = weight.shape
    return weight.transpose(2, 3, 1, 0).reshape(kh * kw * cin, cout)


# ------------------------------ Discriminator --------------------------------

def init_params(key):
    k1, k2, k3 = jax.random.split(key, 3)
    # Same shapes as the PyTorch module; small deterministic init.
    w1 = jax.random.normal(k1, (128, 1, 4, 4), jnp.float32) * 0.05
    w2 = jax.random.normal(k2, (256, 128, 4, 4), jnp.float32) * 0.02
    w3 = jax.random.normal(k3, (1, 256, 7, 7), jnp.float32) * 0.02
    return {"w1": w1, "w2": w2, "w3": w3}


@jax.jit
def discriminator_forward(params, x):
    # x: (N, 1, 28, 28) NCHW float32 (PyTorch layout); converted to NHWC once.
    n = x.shape[0]
    x = jnp.transpose(x, (0, 2, 3, 1))                   # (N, 28, 28, 1)

    # Layer 1: Conv(1->128, 4, s2, p1) + LeakyReLU(0.2)
    p1, oh1, ow1 = _im2col_nhwc(x, 4, 4, 2, 1)           # (N*196, 16)
    h1 = _conv_gemm_leaky(p1, _weight_to_gemm(params["w1"]))
    h1 = h1.reshape(n, oh1, ow1, 128)                    # (N, 14, 14, 128) bf16 NHWC

    # Layer 2: Conv(128->256, 4, s2, p1) + BatchNorm2d(batch stats) + LeakyReLU(0.2)
    p2, oh2, ow2 = _im2col_nhwc(h1, 4, 4, 2, 1)          # (N*49, 2048)
    h2 = _conv_gemm_bn_leaky(p2, _weight_to_gemm(params["w2"]))
    h2 = h2.reshape(n, oh2, ow2, 256)                    # (N, 7, 7, 256) bf16 NHWC

    # Layer 3: Conv(256->1, 7, s1, p0) on a 7x7 map == per-sample dot + Sigmoid
    a3 = h2.reshape(n, oh2 * ow2 * 256)                  # (N, 12544), (h, w, c) order
    w3_row = params["w3"].transpose(2, 3, 1, 0).reshape(1, oh2 * ow2 * 256)
    out = _dot_sigmoid(a3, w3_row)                       # (N, 1) float32
    return out.reshape(n, 1, 1, 1)


if __name__ == "__main__":
    key = jax.random.PRNGKey(0)
    kx, kp = jax.random.split(key)
    # 28x28 single-channel input implied by the architecture (two /2 convs, then 7x7 valid).
    x = jax.random.normal(kx, (2, 1, 28, 28), jnp.float32)
    params = init_params(kp)

    y = discriminator_forward(params, x)
    y = jax.block_until_ready(y)

    assert y.shape == (2, 1, 1, 1), y.shape
    assert bool(jnp.all(jnp.isfinite(y))), "non-finite output"
    assert bool(jnp.all((y >= 0.0) & (y <= 1.0))), "sigmoid output out of range"
    print("KERNEL_OK")
</pallas_src>

<mosaic_0001>
module attributes {stable_mosaic.version = 11 : i64} {
  func.func @_gemm_leaky_kernel(%arg0: i32, %arg1: memref<392x16xbf16, #tpu.memory_space<vmem>>, %arg2: memref<16x128xbf16, #tpu.memory_space<vmem>>, %arg3: memref<392x128xbf16, #tpu.memory_space<vmem>>) attributes {dimension_semantics = [#tpu.dimension_semantics<parallel>], iteration_bounds = array<i64: 1>, scalar_prefetch = 0 : i64, scratch_operands = 0 : i64, tpu.core_type = #tpu.core_type<tc>, window_params = [{transform_indices = @transform_0, window_bounds = array<i64: 392, 16>}, {pipeline_mode = #tpu.pipeline_mode<synchronous>, transform_indices = @transform_1, window_bounds = array<i64: 16, 128>}, {transform_indices = @transform_2, window_bounds = array<i64: 392, 128>}]} {
    %c0 = arith.constant 0 : index
    %c0_0 = arith.constant 0 : index
    %0 = vector.load %arg1[%c0, %c0_0] : memref<392x16xbf16, #tpu.memory_space<vmem>>, vector<392x16xbf16>
    %c0_1 = arith.constant 0 : index
    %c0_2 = arith.constant 0 : index
    %1 = vector.load %arg2[%c0_1, %c0_2] : memref<16x128xbf16, #tpu.memory_space<vmem>>, vector<16x128xbf16>
    %cst = arith.constant dense<0.000000e+00> : vector<392x128xf32>
    %2 = tpu.matmul %0, %1, %cst {dimension_numbers = #tpu.dot_dimension_numbers<[1], [0], [0], [1], [0, 0, 1, 1], [], []>} : vector<392x16xbf16>, vector<16x128xbf16>, vector<392x128xf32> -> vector<392x128xf32>
    %cst_3 = arith.constant 0.000000e+00 : f32
    %3 = vector.broadcast %cst_3 : f32 to vector<392x128xf32>
    %4 = arith.cmpf oge, %2, %3 : vector<392x128xf32>
    %cst_4 = arith.constant 2.000000e-01 : f32
    %5 = vector.broadcast %cst_4 : f32 to vector<392x128xf32>
    %6 = arith.mulf %5, %2 : vector<392x128xf32>
    %7 = arith.select %4, %2, %6 : vector<392x128xi1>, vector<392x128xf32>
    %8 = arith.truncf %7 : vector<392x128xf32> to vector<392x128xbf16>
    %c0_5 = arith.constant 0 : index
    %c0_6 = arith.constant 0 : index
    %9 = vector.load %arg3[%c0_5, %c0_6] : memref<392x128xbf16, #tpu.memory_space<vmem>>, vector<392x128xbf16>
    tpu.vector_store %arg3[%c0_5, %c0_6], %8 {strides = array<i32>} : memref<392x128xbf16, #tpu.memory_space<vmem>>, vector<392x128xbf16>,
    return
  }
  func.func @transform_0(%arg0: i32) -> (i32, i32) {
    %c0_i32 = arith.constant 0 : i32
    %c0_i32_0 = arith.constant 0 : i32
    return %arg0, %c0_i32 : i32, i32
  }
  func.func @transform_1(%arg0: i32) -> (i32, i32) {
    %c0_i32 = arith.constant 0 : i32
    %c0_i32_0 = arith.constant 0 : i32
    %c0_i32_1 = arith.constant 0 : i32
    return %c0_i32, %c0_i32_0 : i32, i32
  }
  func.func @transform_2(%arg0: i32) -> (i32, i32) {
    %c0_i32 = arith.constant 0 : i32
    %c0_i32_0 = arith.constant 0 : i32
    return %arg0, %c0_i32 : i32, i32
  }
}

module attributes {stable_mosaic.version = 11 : i64} {
  func.func @_gemm_stats_kernel(%arg0: i32, %arg1: memref<104x2048xbf16, #tpu.memory_space<vmem>>, %arg2: memref<2048x256xbf16, #tpu.memory_space<vmem>>, %arg3: memref<104x256xbf16, #tpu.memory_space<vmem>>, %arg4: memref<1x256xf32, #tpu.memory_space<vmem>>, %arg5: memref<1x256xf32, #tpu.memory_space<vmem>>) attributes {dimension_semantics = [#tpu.dimension_semantics<arbitrary>], iteration_bounds = array<i64: 1>, scalar_prefetch = 0 : i64, scratch_operands = 0 : i64, tpu.core_type = #tpu.core_type<tc>, window_params = [{transform_indices = @transform_0, window_bounds = array<i64: 104, 2048>}, {pipeline_mode = #tpu.pipeline_mode<synchronous>, transform_indices = @transform_1, window_bounds = array<i64: 2048, 256>}, {transform_indices = @transform_2, window_bounds = array<i64: 104, 256>}, {pipeline_mode = #tpu.pipeline_mode<synchronous>, transform_indices = @transform_3, window_bounds = array<i64: 1, 256>}, {pipeline_mode = #tpu.pipeline_mode<synchronous>, transform_indices = @transform_4, window_bounds = array<i64: 1, 256>}]} {
    %c0 = arith.constant 0 : index
    %c0_0 = arith.constant 0 : index
    %0 = vector.load %arg1[%c0, %c0_0] : memref<104x2048xbf16, #tpu.memory_space<vmem>>, vector<104x2048xbf16>
    %c0_1 = arith.constant 0 : index
    %c0_2 = arith.constant 0 : index
    %1 = vector.load %arg2[%c0_1, %c0_2] : memref<2048x256xbf16, #tpu.memory_space<vmem>>, vector<2048x256xbf16>
    %cst = arith.constant dense<0.000000e+00> : vector<104x256xf32>
    %2 = tpu.matmul %0, %1, %cst {dimension_numbers = #tpu.dot_dimension_numbers<[1], [0], [0], [1], [0, 0, 1, 1], [], []>} : vector<104x2048xbf16>, vector<2048x256xbf16>, vector<104x256xf32> -> vector<104x256xf32>
    %3 = arith.truncf %2 : vector<104x256xf32> to vector<104x256xbf16>
    %c0_3 = arith.constant 0 : index
    %c0_4 = arith.constant 0 : index
    %4 = vector.load %arg3[%c0_3, %c0_4] : memref<104x256xbf16, #tpu.memory_space<vmem>>, vector<104x256xbf16>
    tpu.vector_store %arg3[%c0_3, %c0_4], %3 {strides = array<i32>} : memref<104x256xbf16, #tpu.memory_space<vmem>>, vector<104x256xbf16>,
    %5 = arith.extf %3 : vector<104x256xbf16> to vector<104x256xf32>
    %c0_i32 = arith.constant 0 : i32
    %6 = arith.cmpi eq, %arg0, %c0_i32 : i32
    %7 = arith.extui %6 : i1 to i32
    %c0_i32_5 = arith.constant 0 : i32
    %8 = arith.cmpi ne, %7, %c0_i32_5 : i32
    scf.if %8 {
      %cst_16 = arith.constant 0.000000e+00 : f32
      %20 = vector.broadcast %cst_16 : f32 to vector<1x256xf32>
      %c0_17 = arith.constant 0 : index
      %c0_18 = arith.constant 0 : index
      %21 = vector.load %arg4[%c0_17, %c0_18] : memref<1x256xf32, #tpu.memory_space<vmem>>, vector<1x256xf32>
      tpu.vector_store %arg4[%c0_17, %c0_18], %20 {strides = array<i32>} : memref<1x256xf32, #tpu.memory_space<vmem>>, vector<1x256xf32>,
      %cst_19 = arith.constant 0.000000e+00 : f32
      %22 = vector.broadcast %cst_19 : f32 to vector<1x256xf32>
      %c0_20 = arith.constant 0 : index
      %c0_21 = arith.constant 0 : index
      %23 = vector.load %arg5[%c0_20, %c0_21] : memref<1x256xf32, #tpu.memory_space<vmem>>, vector<1x256xf32>
      tpu.vector_store %arg5[%c0_20, %c0_21], %22 {strides = array<i32>} : memref<1x256xf32, #tpu.memory_space<vmem>>, vector<1x256xf32>,
    } else {
    }
    %c0_6 = arith.constant 0 : index
    %c0_7 = arith.constant 0 : index
    %9 = vector.load %arg4[%c0_6, %c0_7] : memref<1x256xf32, #tpu.memory_space<vmem>>, vector<1x256xf32>
    %cst_8 = arith.constant dense<0.000000e+00> : vector<256xf32>
    %10 = vector.multi_reduction <add>, %5, %cst_8 [0] : vector<104x256xf32> to vector<256xf32>
    %11 = vector.shape_cast %10 : vector<256xf32> to vector<1x256xf32>
    %12 = arith.addf %9, %11 : vector<1x256xf32>
    %c0_9 = arith.constant 0 : index
    %c0_10 = arith.constant 0 : index
    %13 = vector.load %arg4[%c0_9, %c0_10] : memref<1x256xf32, #tpu.memory_space<vmem>>, vector<1x256xf32>
    tpu.vector_store %arg4[%c0_9, %c0_10], %12 {strides = array<i32>} : memref<1x256xf32, #tpu.memory_space<vmem>>, vector<1x256xf32>,
    %c0_11 = arith.constant 0 : index
    %c0_12 = arith.constant 0 : index
    %14 = vector.load %arg5[%c0_11, %c0_12] : memref<1x256xf32, #tpu.memory_space<vmem>>, vector<1x256xf32>
    %15 = arith.mulf %5, %5 : vector<104x256xf32>
    %cst_13 = arith.constant dense<0.000000e+00> : vector<256xf32>
    %16 = vector.multi_reduction <add>, %15, %cst_13 [0] : vector<104x256xf32> to vector<256xf32>
    %17 = vector.shape_cast %16 : vector<256xf32> to vector<1x256xf32>
    %18 = arith.addf %14, %17 : vector<1x256xf32>
    %c0_14 = arith.constant 0 : index
    %c0_15 = arith.constant 0 : index
    %19 = vector.load %arg5[%c0_14, %c0_15] : memref<1x256xf32, #tpu.memory_space<vmem>>, vector<1x256xf32>
    tpu.vector_store %arg5[%c0_14, %c0_15], %18 {strides = array<i32>} : memref<1x256xf32, #tpu.memory_space<vmem>>, vector<1x256xf32>,
    return
  }
  func.func @transform_0(%arg0: i32) -> (i32, i32) {
    %c0_i32 = arith.constant 0 : i32
    %c0_i32_0 = arith.constant 0 : i32
    return %arg0, %c0_i32 : i32, i32
  }
  func.func @transform_1(%arg0: i32) -> (i32, i32) {
    %c0_i32 = arith.constant 0 : i32
    %c0_i32_0 = arith.constant 0 : i32
    %c0_i32_1 = arith.constant 0 : i32
    return %c0_i32, %c0_i32_0 : i32, i32
  }
  func.func @transform_2(%arg0: i32) -> (i32, i32) {
    %c0_i32 = arith.constant 0 : i32
    %c0_i32_0 = arith.constant 0 : i32
    return %arg0, %c0_i32 : i32, i32
  }
  func.func @transform_3(%arg0: i32) -> (i32, i32) {
    %c0_i32 = arith.constant 0 : i32
    %c0_i32_0 = arith.constant 0 : i32
    %c0_i32_1 = arith.constant 0 : i32
    return %c0_i32, %c0_i32_0 : i32, i32
  }
  func.func @transform_4(%arg0: i32) -> (i32, i32) {
    %c0_i32 = arith.constant 0 : i32
    %c0_i32_0 = arith.constant 0 : i32
    %c0_i32_1 = arith.constant 0 : i32
    return %c0_i32, %c0_i32_0 : i32, i32
  }
}

module attributes {stable_mosaic.version = 11 : i64} {
  func.func @_bn_leaky_kernel(%arg0: i32, %arg1: memref<104x256xbf16, #tpu.memory_space<vmem>>, %arg2: memref<1x256xf32, #tpu.memory_space<vmem>>, %arg3: memref<1x256xf32, #tpu.memory_space<vmem>>, %arg4: memref<104x256xbf16, #tpu.memory_space<vmem>>) attributes {dimension_semantics = [#tpu.dimension_semantics<parallel>], iteration_bounds = array<i64: 1>, scalar_prefetch = 0 : i64, scratch_operands = 0 : i64, tpu.core_type = #tpu.core_type<tc>, window_params = [{transform_indices = @transform_0, window_bounds = array<i64: 104, 256>}, {pipeline_mode = #tpu.pipeline_mode<synchronous>, transform_indices = @transform_1, window_bounds = array<i64: 1, 256>}, {pipeline_mode = #tpu.pipeline_mode<synchronous>, transform_indices = @transform_2, window_bounds = array<i64: 1, 256>}, {transform_indices = @transform_3, window_bounds = array<i64: 104, 256>}]} {
    %c0 = arith.constant 0 : index
    %c0_0 = arith.constant 0 : index
    %0 = vector.load %arg1[%c0, %c0_0] : memref<104x256xbf16, #tpu.memory_space<vmem>>, vector<104x256xbf16>
    %1 = arith.extf %0 : vector<104x256xbf16> to vector<104x256xf32>
    %c0_1 = arith.constant 0 : index
    %c0_2 = arith.constant 0 : index
    %2 = vector.load %arg2[%c0_1, %c0_2] : memref<1x256xf32, #tpu.memory_space<vmem>>, vector<1x256xf32>
    %3 = vector.broadcast %2 : vector<1x256xf32> to vector<104x256xf32>
    %4 = arith.mulf %1, %3 : vector<104x256xf32>
    %c0_3 = arith.constant 0 : index
    %c0_4 = arith.constant 0 : index
    %5 = vector.load %arg3[%c0_3, %c0_4] : memref<1x256xf32, #tpu.memory_space<vmem>>, vector<1x256xf32>
    %6 = vector.broadcast %5 : vector<1x256xf32> to vector<104x256xf32>
    %7 = arith.addf %4, %6 : vector<104x256xf32>
    %cst = arith.constant 0.000000e+00 : f32
    %8 = vector.broadcast %cst : f32 to vector<104x256xf32>
    %9 = arith.cmpf oge, %7, %8 : vector<104x256xf32>
    %cst_5 = arith.constant 2.000000e-01 : f32
    %10 = vector.broadcast %cst_5 : f32 to vector<104x256xf32>
    %11 = arith.mulf %10, %7 : vector<104x256xf32>
    %12 = arith.select %9, %7, %11 : vector<104x256xi1>, vector<104x256xf32>
    %13 = arith.truncf %12 : vector<104x256xf32> to vector<104x256xbf16>
    %c0_6 = arith.constant 0 : index
    %c0_7 = arith.constant 0 : index
    %14 = vector.load %arg4[%c0_6, %c0_7] : memref<104x256xbf16, #tpu.memory_space<vmem>>, vector<104x256xbf16>
    tpu.vector_store %arg4[%c0_6, %c0_7], %13 {strides = array<i32>} : memref<104x256xbf16, #tpu.memory_space<vmem>>, vector<104x256xbf16>,
    return
  }
  func.func @transform_0(%arg0: i32) -> (i32, i32) {
    %c0_i32 = arith.constant 0 : i32
    %c0_i32_0 = arith.constant 0 : i32
    return %arg0, %c0_i32 : i32, i32
  }
  func.func @transform_1(%arg0: i32) -> (i32, i32) {
    %c0_i32 = arith.constant 0 : i32
    %c0_i32_0 = arith.constant 0 : i32
    %c0_i32_1 = arith.constant 0 : i32
    return %c0_i32, %c0_i32_0 : i32, i32
  }
  func.func @transform_2(%arg0: i32) -> (i32, i32) {
    %c0_i32 = arith.constant 0 : i32
    %c0_i32_0 = arith.constant 0 : i32
    %c0_i32_1 = arith.constant 0 : i32
    return %c0_i32, %c0_i32_0 : i32, i32
  }
  func.func @transform_3(%arg0: i32) -> (i32, i32) {
    %c0_i32 = arith.constant 0 : i32
    %c0_i32_0 = arith.constant 0 : i32
    return %arg0, %c0_i32 : i32, i32
  }
}

module attributes {stable_mosaic.version = 11 : i64} {
  func.func @_dot_sigmoid_kernel(%arg0: i32, %arg1: memref<8x12544xbf16, #tpu.memory_space<vmem>>, %arg2: memref<1x12544xbf16, #tpu.memory_space<vmem>>, %arg3: memref<8x1xf32, #tpu.memory_space<vmem>>) attributes {dimension_semantics = [#tpu.dimension_semantics<parallel>], iteration_bounds = array<i64: 1>, scalar_prefetch = 0 : i64, scratch_operands = 0 : i64, tpu.core_type = #tpu.core_type<tc>, window_params = [{transform_indices = @transform_0, window_bounds = array<i64: 8, 12544>}, {pipeline_mode = #tpu.pipeline_mode<synchronous>, transform_indices = @transform_1, window_bounds = array<i64: 1, 12544>}, {transform_indices = @transform_2, window_bounds = array<i64: 8, 1>}]} {
    %c0 = arith.constant 0 : index
    %c0_0 = arith.constant 0 : index
    %0 = vector.load %arg1[%c0, %c0_0] : memref<8x12544xbf16, #tpu.memory_space<vmem>>, vector<8x12544xbf16>
    %1 = arith.extf %0 : vector<8x12544xbf16> to vector<8x12544xf32>
    %c0_1 = arith.constant 0 : index
    %c0_2 = arith.constant 0 : index
    %2 = vector.load %arg2[%c0_1, %c0_2] : memref<1x12544xbf16, #tpu.memory_space<vmem>>, vector<1x12544xbf16>
    %3 = arith.extf %2 : vector<1x12544xbf16> to vector<1x12544xf32>
    %4 = vector.broadcast %3 : vector<1x12544xf32> to vector<8x12544xf32>
    %5 = arith.mulf %1, %4 : vector<8x12544xf32>
    %cst = arith.constant dense<0.000000e+00> : vector<8xf32>
    %6 = vector.multi_reduction <add>, %5, %cst [1] : vector<8x12544xf32> to vector<8xf32>
    %7 = vector.shape_cast %6 : vector<8xf32> to vector<8x1xf32>
    %8 = arith.negf %7 : vector<8x1xf32>
    %9 = math.exp %8 : vector<8x1xf32>
    %cst_3 = arith.constant 1.000000e+00 : f32
    %10 = vector.broadcast %cst_3 : f32 to vector<8x1xf32>
    %11 = arith.addf %10, %9 : vector<8x1xf32>
    %12 = arith.divf %10, %11 : vector<8x1xf32>
    %c0_4 = arith.constant 0 : index
    %c0_5 = arith.constant 0 : index
    %13 = vector.load %arg3[%c0_4, %c0_5] : memref<8x1xf32, #tpu.memory_space<vmem>>, vector<8x1xf32>
    tpu.vector_store %arg3[%c0_4, %c0_5], %12 {strides = array<i32>} : memref<8x1xf32, #tpu.memory_space<vmem>>, vector<8x1xf32>,
    return
  }
  func.func @transform_0(%arg0: i32) -> (i32, i32) {
    %c0_i32 = arith.constant 0 : i32
    %c0_i32_0 = arith.constant 0 : i32
    return %arg0, %c0_i32 : i32, i32
  }
  func.func @transform_1(%arg0: i32) -> (i32, i32) {
    %c0_i32 = arith.constant 0 : i32
    %c0_i32_0 = arith.constant 0 : i32
    %c0_i32_1 = arith.constant 0 : i32
    return %c0_i32, %c0_i32_0 : i32, i32
  }
  func.func @transform_2(%arg0: i32) -> (i32, i32) {
    %c0_i32 = arith.constant 0 : i32
    %c0_i32_0 = arith.constant 0 : i32
    return %arg0, %c0_i32 : i32, i32
  }
}

</mosaic_0001>

<bundles_post_ra>
// kernel: discriminator_forward.4
= control target key start
LH: loop header
LB: loop body
LE: loop exit
PB: predicated region body
PF: predicated region fallthrough
CT: control target
= control target key end

     0   :  { %v1347_v0 = vmov 0.0   ;;  %vm1348_vm0 = vmmov 0   ;;  %vm192_vm1 = vcmask 130048   ;;  %s1594_s1 = inlined_call_operand.vmem [shape: bf16[16,128], index: 1, kind: input, shape index: {}]   ;;  %s1595_s0 = inlined_call_operand.vmem [shape: bf16[392,16], index: 0, kind: input, shape index: {}]   ;;  %s1596_s2 = inlined_call_operand.vmem [shape: bf16[392,128], index: 2, kind: output, shape index: {}]  }
   0x1   :  { %1215 = vmatprep.subr.bf16.mxu0 %v1347_v0  ;;  %v1321_v1 = vld [vmem:[%s1594_s1] sm:$0xff]   ;;  %1217 = vmatprep.mubr.msk.bf16.mxu0 %vm1348_vm0, %v1347_v0  ;;  %v1323_v3 = vld [vmem:[%s1595_s0 + $0x68] sm:$0xff]   ;;  %v1325_v5 = vld [vmem:[%s1595_s0 + $0x70] sm:$0xff]  }
   0x2   :  { %v1322_v2 = vld [vmem:[%s1595_s0] sm:$0xff]   ;;  %1317 = vmatprep.subr.bf16.mxu1 %v1347_v0  ;;  %1269 = vmatprep.mubr.msk.bf16.mxu1 %vm1348_vm0, %v1347_v0  ;;  %v1324_v4 = vld [vmem:[%s1595_s0 + $0x8] sm:$0xff]   ;;  %v1326_v6 = vld [vmem:[%s1595_s0 + $0x10] sm:$0xff]  }
   0x3   :  { %1216 = vmatpush3.bf16.msra.mxu0 %v1321_v1  ;;  %1318 = vmatpush3.bf16.msra.mxu1 %v1321_v1  ;;  %v1327_v7 = vld [vmem:[%s1595_s0 + $0x78] sm:$0xff]   ;;  %v1329_v9 = vld [vmem:[%s1595_s0 + $0x80] sm:$0xff]   ;;  %v1331_v11 = vld [vmem:[%s1595_s0 + $0x88] sm:$0xff]  }
   0x4   :  { %v1328_v8 = vld [vmem:[%s1595_s0 + $0x18] sm:$0xff]   ;;  %v1330_v10 = vld [vmem:[%s1595_s0 + $0x20] sm:$0xff]   ;;  %v1332_v12 = vld [vmem:[%s1595_s0 + $0x28] sm:$0xff]  }
   0x5   :  { %v1333_v13 = vld [vmem:[%s1595_s0 + $0x90] sm:$0xff]   ;;  %v1335_v15 = vld [vmem:[%s1595_s0 + $0x98] sm:$0xff]   ;;  %v1337_v17 = vld [vmem:[%s1595_s0 + $0xa0] sm:$0xff]  }
   0x6   :  { %1218 = vmatmul.mubr.msk.bf16.vlgmr.msra.gmra.mxu0 %vm192_vm1, %v1322_v2  ;;  %1270 = vmatmul.mubr.msk.bf16.vlgmr.msra.gmra.mxu1 %vm192_vm1, %v1323_v3  ;;  %v1334_v14 = vld [vmem:[%s1595_s0 + $0x30] sm:$0xff]   ;;  %v1336_v16 = vld [vmem:[%s1595_s0 + $0x38] sm:$0xff]   ;;  %v1338_v18 = vld [vmem:[%s1595_s0 + $0x40] sm:$0xff]  }
   0x7   :  { %1221 = vmatprep.mubr.msk.bf16.mxu0 %vm1348_vm0, %v1347_v0  ;;  %1273 = vmatprep.mubr.msk.bf16.mxu1 %vm1348_vm0, %v1347_v0  ;;  %v1339_v19 = vld [vmem:[%s1595_s0 + $0xa8] sm:$0xff]   ;;  %v1341_v21 = vld [vmem:[%s1595_s0 + $0xb0] sm:$0xff]   ;;  %v1343_v23 = vld [vmem:[%s1595_s0 + $0xb8] sm:$0xff]  }
   0x8   :  { %v1340_v20 = vld [vmem:[%s1595_s0 + $0x48] sm:$0xff]   ;;  %v1342_v22 = vld [vmem:[%s1595_s0 + $0x50] sm:$0xff]   ;;  %v1344_v24 = vld [vmem:[%s1595_s0 + $0x58] sm:$0xff]  }
   0x9   :  { %v1345_v25 = vld [vmem:[%s1595_s0 + $0xc0] ss:$0 sps:$4 sm:$0xff]  }
   0xa   :  { %v1346_v26 = vld [vmem:[%s1595_s0 + $0x60] sm:$0xff]  }
   0xe   :  { %1222 = vmatmul.mubr.msk.bf16.gmra.mxu0 %vm192_vm1, %v1324_v4  ;;  %1274 = vmatmul.mubr.msk.bf16.gmra.mxu1 %vm192_vm1, %v1325_v5 }
   0xf   :  { %1225 = vmatprep.mubr.msk.bf16.mxu0 %vm1348_vm0, %v1347_v0  ;;  %1277 = vmatprep.mubr.msk.bf16.mxu1 %vm1348_vm0, %v1347_v0 }
  0x16   :  { %1226 = vmatmul.mubr.msk.bf16.gmra.mxu0 %vm192_vm1, %v1326_v6  ;;  %1278 = vmatmul.mubr.msk.bf16.gmra.mxu1 %vm192_vm1, %v1327_v7 }
  0x17   :  { %1229 = vmatprep.mubr.msk.bf16.mxu0 %vm1348_vm0, %v1347_v0  ;;  %1281 = vmatprep.mubr.msk.bf16.mxu1 %vm1348_vm0, %v1347_v0 }
  0x1e   :  { %1230 = vmatmul.mubr.msk.bf16.gmra.mxu0 %vm192_vm1, %v1328_v8  ;;  %1282 = vmatmul.mubr.msk.bf16.gmra.mxu1 %vm192_vm1, %v1329_v9 }
  0x1f   :  { %1233 = vmatprep.mubr.msk.bf16.mxu0 %vm1348_vm0, %v1347_v0  ;;  %1285 = vmatprep.mubr.msk.bf16.mxu1 %vm1348_vm0, %v1347_v0 }
  0x26   :  { %1234 = vmatmul.mubr.msk.bf16.gmra.mxu0 %vm192_vm1, %v1330_v10  ;;  %1286 = vmatmul.mubr.msk.bf16.gmra.mxu1 %vm192_vm1, %v1331_v11 }
  0x27   :  { %1237 = vmatprep.mubr.msk.bf16.mxu0 %vm1348_vm0, %v1347_v0  ;;  %1289 = vmatprep.mubr.msk.bf16.mxu1 %vm1348_vm0, %v1347_v0 }
  0x2e   :  { %1238 = vmatmul.mubr.msk.bf16.gmra.mxu0 %vm192_vm1, %v1332_v12  ;;  %1290 = vmatmul.mubr.msk.bf16.gmra.mxu1 %vm192_vm1, %v1333_v13 }
  0x2f   :  { %1241 = vmatprep.mubr.msk.bf16.mxu0 %vm1348_vm0, %v1347_v0  ;;  %1293 = vmatprep.mubr.msk.bf16.mxu1 %vm1348_vm0, %v1347_v0 }
  0x36   :  { %1242 = vmatmul.mubr.msk.bf16.gmra.mxu0 %vm192_vm1, %v1334_v14  ;;  %1294 = vmatmul.mubr.msk.bf16.gmra.mxu1 %vm192_vm1, %v1335_v15 }
  0x37   :  { %1245 = vmatprep.mubr.msk.bf16.mxu0 %vm1348_vm0, %v1347_v0  ;;  %1297 = vmatprep.mubr.msk.bf16.mxu1 %vm1348_vm0, %v1347_v0 }
  0x3e   :  { %1246 = vmatmul.mubr.msk.bf16.gmra.mxu0 %vm192_vm1, %v1336_v16  ;;  %1298 = vmatmul.mubr.msk.bf16.gmra.mxu1 %vm192_vm1, %v1337_v17 }
  0x3f   :  { %1249 = vmatprep.mubr.msk.bf16.mxu0 %vm1348_vm0, %v1347_v0  ;;  %1301 = vmatprep.mubr.msk.bf16.mxu1 %vm1348_vm0, %v1347_v0 }
  0x46   :  { %1250 = vmatmul.mubr.msk.bf16.gmra.mxu0 %vm192_vm1, %v1338_v18  ;;  %1302 = vmatmul.mubr.msk.bf16.gmra.mxu1 %vm192_vm1, %v1339_v19 }
  0x47   :  { %1253 = vmatprep.mubr.msk.bf16.mxu0 %vm1348_vm0, %v1347_v0  ;;  %1305 = vmatprep.mubr.msk.bf16.mxu1 %vm1348_vm0, %v1347_v0 }
  0x4e   :  { %1254 = vmatmul.mubr.msk.bf16.gmra.mxu0 %vm192_vm1, %v1340_v20  ;;  %1306 = vmatmul.mubr.msk.bf16.gmra.mxu1 %vm192_vm1, %v1341_v21 }
  0x4f   :  { %1257 = vmatprep.mubr.msk.bf16.mxu0 %vm1348_vm0, %v1347_v0  ;;  %1309 = vmatprep.mubr.msk.bf16.mxu1 %vm1348_vm0, %v1347_v0 }
  0x56   :  { %1258 = vmatmul.mubr.msk.bf16.gmra.mxu0 %vm192_vm1, %v1342_v22  ;;  %1310 = vmatmul.mubr.msk.bf16.gmra.mxu1 %vm192_vm1, %v1343_v23 }
  0x57   :  { %1261 = vmatprep.mubr.msk.bf16.mxu0 %vm1348_vm0, %v1347_v0  ;;  %1313 = vmatprep.mubr.msk.bf16.mxu1 %vm1348_vm0, %v1347_v0 }
  0x5e   :  { %1262 = vmatmul.mubr.msk.bf16.gmra.mxu0 %vm192_vm1, %v1344_v24  ;;  %1314 = vmatmul.mubr.msk.bf16.gmra.mxu1 %vm192_vm1, %v1345_v25 }
  0x5f   :  { %1265 = vmatprep.mubr.msk.bf16.mxu0 %vm1348_vm0, %v1347_v0 }
  0x66   :  { %1266 = vmatmul.mubr.msk.bf16.gmra.mxu0 %vm192_vm1, %v1346_v26 }
  0xc6   :  { %v302_v27 = vpop.f32.mrf.mxu0  ;;  %v406_v28 = vpop.f32.mrf.mxu1 }
  0xc7   :  { %vm526_vm2 = vcmp.ge.f32.partialorder %v406_v28, 0.0  ;;  %v575_v29 = vmul.f32 0.2, %v406_v28  ;;  %v549_v32 = vmul.f32 0.2, %v302_v27  ;;  %vm500_vm3 = vcmp.ge.f32.partialorder %v302_v27, 0.0 }
  0xc8   :  { %v1219_v30 = vpop.f32.mrf.mxu0  ;;  %v1271_v31 = vpop.f32.mrf.mxu1 }
  0xc9   :  { %v624_v34 = vsel %vm526_vm2, %v406_v28, %v575_v29  ;;  %v598_v40 = vsel %vm500_vm3, %v302_v27, %v549_v32 }
  0xca   :  { %v305_v33 = vpop.f32.mrf.mxu0  ;;  %v409_v35 = vpop.f32.mrf.mxu1 }
  0xcb   :  { %vm501_vm4 = vcmp.ge.f32.partialorder %v305_v33, 0.0  ;;  %v550_v36 = vmul.f32 0.2, %v305_v33  ;;  %vm527_vm5 = vcmp.ge.f32.partialorder %v409_v35, 0.0  ;;  %v576_v37 = vmul.f32 0.2, %v409_v35 }
  0xcc   :  { %v1220_v38 = vpop.f32.mrf.mxu0  ;;  %v1272_v39 = vpop.f32.mrf.mxu1 }
  0xcd   :  { %v599_v41 = vsel %vm501_vm4, %v305_v33, %v550_v36  ;;  %v625_v42 = vsel %vm527_vm5, %v409_v35, %v576_v37 }
  0xce   :  { %v1049_v43 = vpack.c.bf16 %v599_v41, %v598_v40  ;;  %v310_v44 = vpop.f32.mrf.mxu0  ;;  %v1114_v45 = vpack.c.bf16 %v625_v42, %v624_v34  ;;  %v414_v46 = vpop.f32.mrf.mxu1 }
  0xcf   :  { %vm528_vm6 = vcmp.ge.f32.partialorder %v414_v46, 0.0  ;;  %v577_v47 = vmul.f32 0.2, %v414_v46  ;;  %v551_v50 = vmul.f32 0.2, %v310_v44  ;;  %vm502_vm7 = vcmp.ge.f32.partialorder %v310_v44, 0.0 }
  0xd0   :  { %1050 = vst [vmem:[%s1596_s2] sm:$0xff] %v1049_v43   ;;  %v1223_v48 = vpop.f32.mrf.mxu0  ;;  %1178 = vst [vmem:[%s1596_s2 + $0x68] sm:$0xff] %v1114_v45   ;;  %v1275_v49 = vpop.f32.mrf.mxu1 }
  0xd1   :  { %v626_v52 = vsel %vm528_vm6, %v414_v46, %v577_v47  ;;  %v600_v58 = vsel %vm502_vm7, %v310_v44, %v551_v50 }
  0xd2   :  { %v313_v51 = vpop.f32.mrf.mxu0  ;;  %v417_v53 = vpop.f32.mrf.mxu1 }
  0xd3   :  { %vm503_vm8 = vcmp.ge.f32.partialorder %v313_v51, 0.0  ;;  %v552_v54 = vmul.f32 0.2, %v313_v51  ;;  %vm529_vm9 = vcmp.ge.f32.partialorder %v417_v53, 0.0  ;;  %v578_v55 = vmul.f32 0.2, %v417_v53 }
  0xd4   :  { %v1224_v56 = vpop.f32.mrf.mxu0  ;;  %v1276_v57 = vpop.f32.mrf.mxu1 }
  0xd5   :  { %v601_v59 = vsel %vm503_vm8, %v313_v51, %v552_v54  ;;  %v627_v60 = vsel %vm529_vm9, %v417_v53, %v578_v55 }
  0xd6   :  { %v1054_v61 = vpack.c.bf16 %v601_v59, %v600_v58  ;;  %v318_v62 = vpop.f32.mrf.mxu0  ;;  %v1119_v63 = vpack.c.bf16 %v627_v60, %v626_v52  ;;  %v422_v0 = vpop.f32.mrf.mxu1 }
  0xd7   :  { %vm530_vm10 = vcmp.ge.f32.partialorder %v422_v0, 0.0  ;;  %v579_v1 = vmul.f32 0.2, %v422_v0  ;;  %v553_v4 = vmul.f32 0.2, %v318_v62  ;;  %vm504_vm11 = vcmp.ge.f32.partialorder %v318_v62, 0.0 }
  0xd8   :  { %1166 = vst [vmem:[%s1596_s2 + $0x8] sm:$0xff] %v1054_v61   ;;  %v1227_v2 = vpop.f32.mrf.mxu0  ;;  %1179 = vst [vmem:[%s1596_s2 + $0x70] sm:$0xff] %v1119_v63   ;;  %v1279_v3 = vpop.f32.mrf.mxu1 }
  0xd9   :  { %v628_v6 = vsel %vm530_vm10, %v422_v0, %v579_v1  ;;  %v602_v12 = vsel %vm504_vm11, %v318_v62, %v553_v4 }
  0xda   :  { %v321_v5 = vpop.f32.mrf.mxu0  ;;  %v425_v7 = vpop.f32.mrf.mxu1 }
  0xdb   :  { %vm505_vm12 = vcmp.ge.f32.partialorder %v321_v5, 0.0  ;;  %v554_v8 = vmul.f32 0.2, %v321_v5  ;;  %vm531_vm13 = vcmp.ge.f32.partialorder %v425_v7, 0.0  ;;  %v580_v9 = vmul.f32 0.2, %v425_v7 }
  0xdc   :  { %v1228_v10 = vpop.f32.mrf.mxu0  ;;  %v1280_v11 = vpop.f32.mrf.mxu1 }
  0xdd   :  { %v603_v13 = vsel %vm505_vm12, %v321_v5, %v554_v8  ;;  %v629_v14 = vsel %vm531_vm13, %v425_v7, %v580_v9 }
  0xde   :  { %v1059_v15 = vpack.c.bf16 %v603_v13, %v602_v12  ;;  %v326_v16 = vpop.f32.mrf.mxu0  ;;  %v1124_v17 = vpack.c.bf16 %v629_v14, %v628_v6  ;;  %v430_v18 = vpop.f32.mrf.mxu1 }
  0xdf   :  { %vm532_vm14 = vcmp.ge.f32.partialorder %v430_v18, 0.0  ;;  %v581_v19 = vmul.f32 0.2, %v430_v18  ;;  %v555_v22 = vmul.f32 0.2, %v326_v16  ;;  %vm506_vm15 = vcmp.ge.f32.partialorder %v326_v16, 0.0 }
  0xe0   :  { %1167 = vst [vmem:[%s1596_s2 + $0x10] sm:$0xff] %v1059_v15   ;;  %v1231_v20 = vpop.f32.mrf.mxu0  ;;  %1180 = vst [vmem:[%s1596_s2 + $0x78] sm:$0xff] %v1124_v17   ;;  %v1283_v21 = vpop.f32.mrf.mxu1 }
  0xe1   :  { %v630_v24 = vsel %vm532_vm14, %v430_v18, %v581_v19  ;;  %v604_v30 = vsel %vm506_vm15, %v326_v16, %v555_v22 }
  0xe2   :  { %v329_v23 = vpop.f32.mrf.mxu0  ;;  %v433_v25 = vpop.f32.mrf.mxu1 }
  0xe3   :  { %vm507_vm0 = vcmp.ge.f32.partialorder %v329_v23, 0.0  ;;  %v556_v26 = vmul.f32 0.2, %v329_v23  ;;  %vm533_vm1 = vcmp.ge.f32.partialorder %v433_v25, 0.0  ;;  %v582_v27 = vmul.f32 0.2, %v433_v25 }
  0xe4   :  { %v1232_v28 = vpop.f32.mrf.mxu0  ;;  %v1284_v29 = vpop.f32.mrf.mxu1 }
  0xe5   :  { %v605_v31 = vsel %vm507_vm0, %v329_v23, %v556_v26  ;;  %v631_v32 = vsel %vm533_vm1, %v433_v25, %v582_v27 }
  0xe6   :  { %v1064_v33 = vpack.c.bf16 %v605_v31, %v604_v30  ;;  %v334_v34 = vpop.f32.mrf.mxu0  ;;  %v1129_v35 = vpack.c.bf16 %v631_v32, %v630_v24  ;;  %v438_v36 = vpop.f32.mrf.mxu1 }
  0xe7   :  { %vm534_vm2 = vcmp.ge.f32.partialorder %v438_v36, 0.0  ;;  %v583_v37 = vmul.f32 0.2, %v438_v36  ;;  %v557_v40 = vmul.f32 0.2, %v334_v34  ;;  %vm508_vm3 = vcmp.ge.f32.partialorder %v334_v34, 0.0 }
  0xe8   :  { %1168 = vst [vmem:[%s1596_s2 + $0x18] sm:$0xff] %v1064_v33   ;;  %v1235_v38 = vpop.f32.mrf.mxu0  ;;  %1181 = vst [vmem:[%s1596_s2 + $0x80] sm:$0xff] %v1129_v35   ;;  %v1287_v39 = vpop.f32.mrf.mxu1 }
  0xe9   :  { %v632_v42 = vsel %vm534_vm2, %v438_v36, %v583_v37  ;;  %v606_v48 = vsel %vm508_vm3, %v334_v34, %v557_v40 }
  0xea   :  { %v337_v41 = vpop.f32.mrf.mxu0  ;;  %v441_v43 = vpop.f32.mrf.mxu1 }
  0xeb   :  { %vm509_vm4 = vcmp.ge.f32.partialorder %v337_v41, 0.0  ;;  %v558_v44 = vmul.f32 0.2, %v337_v41  ;;  %vm535_vm5 = vcmp.ge.f32.partialorder %v441_v43, 0.0  ;;  %v584_v45 = vmul.f32 0.2, %v441_v43 }
  0xec   :  { %v1236_v46 = vpop.f32.mrf.mxu0  ;;  %v1288_v47 = vpop.f32.mrf.mxu1 }
  0xed   :  { %v607_v49 = vsel %vm509_vm4, %v337_v41, %v558_v44  ;;  %v633_v50 = vsel %vm535_vm5, %v441_v43, %v584_v45 }
  0xee   :  { %v1069_v51 = vpack.c.bf16 %v607_v49, %v606_v48  ;;  %v342_v52 = vpop.f32.mrf.mxu0  ;;  %v1134_v53 = vpack.c.bf16 %v633_v50, %v632_v42  ;;  %v446_v54 = vpop.f32.mrf.mxu1 }
  0xef   :  { %vm536_vm6 = vcmp.ge.f32.partialorder %v446_v54, 0.0  ;;  %v585_v55 = vmul.f32 0.2, %v446_v54  ;;  %v559_v58 = vmul.f32 0.2, %v342_v52  ;;  %vm510_vm7 = vcmp.ge.f32.partialorder %v342_v52, 0.0 }
  0xf0   :  { %1169 = vst [vmem:[%s1596_s2 + $0x20] sm:$0xff] %v1069_v51   ;;  %v1239_v56 = vpop.f32.mrf.mxu0  ;;  %1182 = vst [vmem:[%s1596_s2 + $0x88] sm:$0xff] %v1134_v53   ;;  %v1291_v57 = vpop.f32.mrf.mxu1 }
  0xf1   :  { %v634_v60 = vsel %vm536_vm6, %v446_v54, %v585_v55  ;;  %v608_v2 = vsel %vm510_vm7, %v342_v52, %v559_v58 }
  0xf2   :  { %v345_v59 = vpop.f32.mrf.mxu0  ;;  %v449_v61 = vpop.f32.mrf.mxu1 }
  0xf3   :  { %vm511_vm8 = vcmp.ge.f32.partialorder %v345_v59, 0.0  ;;  %v560_v62 = vmul.f32 0.2, %v345_v59  ;;  %vm537_vm9 = vcmp.ge.f32.partialorder %v449_v61, 0.0  ;;  %v586_v63 = vmul.f32 0.2, %v449_v61 }
  0xf4   :  { %v1240_v0 = vpop.f32.mrf.mxu0  ;;  %v1292_v1 = vpop.f32.mrf.mxu1 }
  0xf5   :  { %v609_v3 = vsel %vm511_vm8, %v345_v59, %v560_v62  ;;  %v635_v4 = vsel %vm537_vm9, %v449_v61, %v586_v63 }
  0xf6   :  { %v1074_v5 = vpack.c.bf16 %v609_v3, %v608_v2  ;;  %v350_v6 = vpop.f32.mrf.mxu0  ;;  %v1139_v7 = vpack.c.bf16 %v635_v4, %v634_v60  ;;  %v454_v8 = vpop.f32.mrf.mxu1 }
  0xf7   :  { %vm538_vm10 = vcmp.ge.f32.partialorder %v454_v8, 0.0  ;;  %v587_v9 = vmul.f32 0.2, %v454_v8  ;;  %v561_v12 = vmul.f32 0.2, %v350_v6  ;;  %vm512_vm11 = vcmp.ge.f32.partialorder %v350_v6, 0.0 }
  0xf8   :  { %1170 = vst [vmem:[%s1596_s2 + $0x28] sm:$0xff] %v1074_v5   ;;  %v1243_v10 = vpop.f32.mrf.mxu0  ;;  %1183 = vst [vmem:[%s1596_s2 + $0x90] sm:$0xff] %v1139_v7   ;;  %v1295_v11 = vpop.f32.mrf.mxu1 }
  0xf9   :  { %v636_v14 = vsel %vm538_vm10, %v454_v8, %v587_v9  ;;  %v610_v20 = vsel %vm512_vm11, %v350_v6, %v561_v12 }
  0xfa   :  { %v353_v13 = vpop.f32.mrf.mxu0  ;;  %v457_v15 = vpop.f32.mrf.mxu1 }
  0xfb   :  { %vm513_vm12 = vcmp.ge.f32.partialorder %v353_v13, 0.0  ;;  %v562_v16 = vmul.f32 0.2, %v353_v13  ;;  %vm539_vm13 = vcmp.ge.f32.partialorder %v457_v15, 0.0  ;;  %v588_v17 = vmul.f32 0.2, %v457_v15 }
  0xfc   :  { %v1244_v18 = vpop.f32.mrf.mxu0  ;;  %v1296_v19 = vpop.f32.mrf.mxu1 }
  0xfd   :  { %v611_v21 = vsel %vm513_vm12, %v353_v13, %v562_v16  ;;  %v637_v22 = vsel %vm539_vm13, %v457_v15, %v588_v17 }
  0xfe   :  { %v1079_v23 = vpack.c.bf16 %v611_v21, %v610_v20  ;;  %v358_v24 = vpop.f32.mrf.mxu0  ;;  %v1144_v25 = vpack.c.bf16 %v637_v22, %v636_v14  ;;  %v462_v26 = vpop.f32.mrf.mxu1 }
  0xff   :  { %vm540_vm14 = vcmp.ge.f32.partialorder %v462_v26, 0.0  ;;  %v589_v27 = vmul.f32 0.2, %v462_v26  ;;  %v563_v30 = vmul.f32 0.2, %v358_v24  ;;  %vm514_vm15 = vcmp.ge.f32.partialorder %v358_v24, 0.0 }
 0x100   :  { %1171 = vst [vmem:[%s1596_s2 + $0x30] sm:$0xff] %v1079_v23   ;;  %v1247_v28 = vpop.f32.mrf.mxu0  ;;  %1184 = vst [vmem:[%s1596_s2 + $0x98] sm:$0xff] %v1144_v25   ;;  %v1299_v29 = vpop.f32.mrf.mxu1 }
 0x101   :  { %v638_v32 = vsel %vm540_vm14, %v462_v26, %v589_v27  ;;  %v612_v38 = vsel %vm514_vm15, %v358_v24, %v563_v30 }
 0x102   :  { %v361_v31 = vpop.f32.mrf.mxu0  ;;  %v465_v33 = vpop.f32.mrf.mxu1 }
 0x103   :  { %vm515_vm0 = vcmp.ge.f32.partialorder %v361_v31, 0.0  ;;  %v564_v34 = vmul.f32 0.2, %v361_v31  ;;  %vm541_vm1 = vcmp.ge.f32.partialorder %v465_v33, 0.0  ;;  %v590_v35 = vmul.f32 0.2, %v465_v33 }
 0x104   :  { %v1248_v36 = vpop.f32.mrf.mxu0  ;;  %v1300_v37 = vpop.f32.mrf.mxu1 }
 0x105   :  { %v613_v39 = vsel %vm515_vm0, %v361_v31, %v564_v34  ;;  %v639_v40 = vsel %vm541_vm1, %v465_v33, %v590_v35 }
 0x106   :  { %v1084_v41 = vpack.c.bf16 %v613_v39, %v612_v38  ;;  %v366_v42 = vpop.f32.mrf.mxu0  ;;  %v1149_v43 = vpack.c.bf16 %v639_v40, %v638_v32  ;;  %v470_v44 = vpop.f32.mrf.mxu1 }
 0x107   :  { %vm542_vm2 = vcmp.ge.f32.partialorder %v470_v44, 0.0  ;;  %v591_v45 = vmul.f32 0.2, %v470_v44  ;;  %v565_v48 = vmul.f32 0.2, %v366_v42  ;;  %vm516_vm3 = vcmp.ge.f32.partialorder %v366_v42, 0.0 }
 0x108   :  { %1172 = vst [vmem:[%s1596_s2 + $0x38] sm:$0xff] %v1084_v41   ;;  %v1251_v46 = vpop.f32.mrf.mxu0  ;;  %1185 = vst [vmem:[%s1596_s2 + $0xa0] sm:$0xff] %v1149_v43   ;;  %v1303_v47 = vpop.f32.mrf.mxu1 }
 0x109   :  { %v640_v50 = vsel %vm542_vm2, %v470_v44, %v591_v45  ;;  %v614_v56 = vsel %vm516_vm3, %v366_v42, %v565_v48 }
 0x10a   :  { %v369_v49 = vpop.f32.mrf.mxu0  ;;  %v473_v51 = vpop.f32.mrf.mxu1 }
 0x10b   :  { %vm517_vm4 = vcmp.ge.f32.partialorder %v369_v49, 0.0  ;;  %v566_v52 = vmul.f32 0.2, %v369_v49  ;;  %vm543_vm5 = vcmp.ge.f32.partialorder %v473_v51, 0.0  ;;  %v592_v53 = vmul.f32 0.2, %v473_v51 }
 0x10c   :  { %v1252_v54 = vpop.f32.mrf.mxu0  ;;  %v1304_v55 = vpop.f32.mrf.mxu1 }
 0x10d   :  { %v615_v57 = vsel %vm517_vm4, %v369_v49, %v566_v52  ;;  %v641_v58 = vsel %vm543_vm5, %v473_v51, %v592_v53 }
 0x10e   :  { %v1089_v59 = vpack.c.bf16 %v615_v57, %v614_v56  ;;  %v374_v60 = vpop.f32.mrf.mxu0  ;;  %v1154_v61 = vpack.c.bf16 %v641_v58, %v640_v50  ;;  %v478_v62 = vpop.f32.mrf.mxu1 }
 0x10f   :  { %vm544_vm6 = vcmp.ge.f32.partialorder %v478_v62, 0.0  ;;  %v593_v63 = vmul.f32 0.2, %v478_v62  ;;  %v567_v2 = vmul.f32 0.2, %v374_v60  ;;  %vm518_vm7 = vcmp.ge.f32.partialorder %v374_v60, 0.0 }
 0x110   :  { %1173 = vst [vmem:[%s1596_s2 + $0x40] sm:$0xff] %v1089_v59   ;;  %v1255_v0 = vpop.f32.mrf.mxu0  ;;  %1186 = vst [vmem:[%s1596_s2 + $0xa8] sm:$0xff] %v1154_v61   ;;  %v1307_v1 = vpop.f32.mrf.mxu1 }
 0x111   :  { %v642_v4 = vsel %vm544_vm6, %v478_v62, %v593_v63  ;;  %v616_v10 = vsel %vm518_vm7, %v374_v60, %v567_v2 }
 0x112   :  { %v377_v3 = vpop.f32.mrf.mxu0  ;;  %v481_v5 = vpop.f32.mrf.mxu1 }
 0x113   :  { %vm519_vm8 = vcmp.ge.f32.partialorder %v377_v3, 0.0  ;;  %v568_v6 = vmul.f32 0.2, %v377_v3  ;;  %vm545_vm9 = vcmp.ge.f32.partialorder %v481_v5, 0.0  ;;  %v594_v7 = vmul.f32 0.2, %v481_v5 }
 0x114   :  { %v1256_v8 = vpop.f32.mrf.mxu0  ;;  %v1308_v9 = vpop.f32.mrf.mxu1 }
 0x115   :  { %v617_v11 = vsel %vm519_vm8, %v377_v3, %v568_v6  ;;  %v643_v12 = vsel %vm545_vm9, %v481_v5, %v594_v7 }
 0x116   :  { %v1094_v13 = vpack.c.bf16 %v617_v11, %v616_v10  ;;  %v382_v14 = vpop.f32.mrf.mxu0  ;;  %v1159_v15 = vpack.c.bf16 %v643_v12, %v642_v4  ;;  %v486_v16 = vpop.f32.mrf.mxu1 }
 0x117   :  { %vm546_vm10 = vcmp.ge.f32.partialorder %v486_v16, 0.0  ;;  %v595_v17 = vmul.f32 0.2, %v486_v16  ;;  %v569_v20 = vmul.f32 0.2, %v382_v14  ;;  %vm520_vm11 = vcmp.ge.f32.partialorder %v382_v14, 0.0 }
 0x118   :  { %1174 = vst [vmem:[%s1596_s2 + $0x48] sm:$0xff] %v1094_v13   ;;  %v1259_v18 = vpop.f32.mrf.mxu0  ;;  %1187 = vst [vmem:[%s1596_s2 + $0xb0] sm:$0xff] %v1159_v15   ;;  %v1311_v19 = vpop.f32.mrf.mxu1 }
 0x119   :  { %v644_v22 = vsel %vm546_vm10, %v486_v16, %v595_v17  ;;  %v618_v28 = vsel %vm520_vm11, %v382_v14, %v569_v20 }
 0x11a   :  { %v385_v21 = vpop.f32.mrf.mxu0  ;;  %v489_v23 = vpop.f32.mrf.mxu1 }
 0x11b   :  { %vm521_vm12 = vcmp.ge.f32.partialorder %v385_v21, 0.0  ;;  %v570_v24 = vmul.f32 0.2, %v385_v21  ;;  %vm547_vm13 = vcmp.ge.f32.partialorder %v489_v23, 0.0  ;;  %v596_v25 = vmul.f32 0.2, %v489_v23 }
 0x11c   :  { %v1260_v26 = vpop.f32.mrf.mxu0  ;;  %v1312_v27 = vpop.f32.mrf.mxu1 }
 0x11d   :  { %v619_v29 = vsel %vm521_vm12, %v385_v21, %v570_v24  ;;  %v645_v30 = vsel %vm547_vm13, %v489_v23, %v596_v25 }
 0x11e   :  { %v1099_v31 = vpack.c.bf16 %v619_v29, %v618_v28  ;;  %v390_v32 = vpop.f32.mrf.mxu0  ;;  %v1164_v33 = vpack.c.bf16 %v645_v30, %v644_v22  ;;  %v494_v34 = vpop.f32.mrf.mxu1 }
 0x11f   :  { %vm548_vm14 = vcmp.ge.f32.partialorder %v494_v34, 0.0  ;;  %v597_v35 = vmul.f32 0.2, %v494_v34  ;;  %v571_v38 = vmul.f32 0.2, %v390_v32  ;;  %vm522_vm15 = vcmp.ge.f32.partialorder %v390_v32, 0.0 }
 0x120   :  { %1175 = vst [vmem:[%s1596_s2 + $0x50] sm:$0xff] %v1099_v31   ;;  %v1263_v36 = vpop.f32.mrf.mxu0  ;;  %1188 = vst [vmem:[%s1596_s2 + $0xb8] sm:$0xff] %v1164_v33   ;;  %v1315_v37 = vpop.f32.mrf.mxu1 }
 0x121   :  { %v646_v39 = vsel %vm548_vm14, %v494_v34, %v597_v35  ;;  %v620_v46 = vsel %vm522_vm15, %v390_v32, %v571_v38 }
 0x122   :  { %v393_v40 = vpop.f32.mrf.mxu0  ;;  %v1045_v41 = vpack.c.bf16 %v646_v39, %v646_v39  ;;  %v497_v42 = vpop.f32.mrf.mxu1 }
 0x123   :  { %vm523_vm0 = vcmp.ge.f32.partialorder %v393_v40, 0.0  ;;  %v572_v43 = vmul.f32 0.2, %v393_v40 }
 0x124   :  { %v1264_v44 = vpop.f32.mrf.mxu0  ;;  %892 = vst [vmem:[%s1596_s2 + $0xc0] sm:$0xf] %v1045_v41  ;;  %v1316_v45 = vpop.f32.mrf.mxu1 }
 0x125   :  { %v621_v47 = vsel %vm523_vm0, %v393_v40, %v572_v43 }
 0x126   :  { %v1104_v48 = vpack.c.bf16 %v621_v47, %v620_v46  ;;  %v398_v49 = vpop.f32.mrf.mxu0 }
 0x127   :  { %v573_v51 = vmul.f32 0.2, %v398_v49  ;;  %vm524_vm1 = vcmp.ge.f32.partialorder %v398_v49, 0.0 }
 0x128   :  { %1176 = vst [vmem:[%s1596_s2 + $0x58] sm:$0xff] %v1104_v48   ;;  %v1267_v50 = vpop.f32.mrf.mxu0 }
 0x129   :  { %v622_v55 = vsel %vm524_vm1, %v398_v49, %v573_v51 }
 0x12a   :  { %v401_v52 = vpop.f32.mrf.mxu0 }
 0x12b   :  { %vm525_vm2 = vcmp.ge.f32.partialorder %v401_v52, 0.0  ;;  %v574_v53 = vmul.f32 0.2, %v401_v52 }
 0x12c   :  { %v1268_v54 = vpop.f32.mrf.mxu0 }
 0x12d   :  { %v623_v56 = vsel %vm525_vm2, %v401_v52, %v574_v53 }
 0x12e   :  { %v1109_v57 = vpack.c.bf16 %v623_v56, %v622_v55 }
 0x130   :  { %1177 = vst [vmem:[%s1596_s2 + $0x60] sm:$0xff] %v1109_v57  }

// kernel: discriminator_forward.6
= control target key start
LH: loop header
LB: loop body
LE: loop exit
PB: predicated region body
PF: predicated region fallthrough
CT: control target
= control target key end

     0   :  { %v55_v0 = vlaneseq  ;;  %s514_s0 = inlined_call_operand.vmem [shape: bf16[104,256], index: 0, kind: input, shape index: {}]   ;;  %s515_s1 = inlined_call_operand.vmem [shape: f32[1,256], index: 1, kind: input, shape index: {}]   ;;  %s516_s2 = inlined_call_operand.vmem [shape: f32[1,256], index: 2, kind: input, shape index: {}]   ;;  %s517_s3 = inlined_call_operand.vmem [shape: bf16[104,256], index: 3, kind: output, shape index: {}]  }
   0x1   :  { %v14_v1 = vld [vmem:[%s514_s0] sm:$0xff]  ;;  %v15_v6 = vld [vmem:[%s514_s0 + $0x8] sm:$0xff]  ;;  %v16_v7 = vld [vmem:[%s514_s0 + $0x10] sm:$0xff] }
   0x2   :  { %v53_v2 = vld [vmem:[%s515_s1] sm:$0x3]  ;;  %v27_v3 = vunpack.c.l.bf16 %v14_v1  ;;  %v28_v4 = vunpack.c.h.bf16 %v14_v1  ;;  %v56_v5 = vshrl.u32 %v55_v0, 7  ;;  %v17_v8 = vld [vmem:[%s514_s0 + $0x18] sm:$0xff]  ;;  %v29_v10 = vunpack.c.l.bf16 %v15_v6  ;;  %v376_v15 = vld [vmem:[%s514_s0 + $0x28] sm:$0xff] }
   0x3   :  { %v91_v9 = vld [vmem:[%s516_s2] sm:$0x3]  ;;  %v30_v11 = vunpack.c.h.bf16 %v15_v6  ;;  %v31_v12 = vunpack.c.l.bf16 %v16_v7  ;;  %v32_v13 = vunpack.c.h.bf16 %v16_v7  ;;  %v33_v18 = vunpack.c.l.bf16 %v17_v8  ;;  %v381_v20 = vld [vmem:[%s514_s0 + $0x30] sm:$0xff]  ;;  %v386_v21 = vld [vmem:[%s514_s0 + $0x38] sm:$0xff] }
   0x4   :  { %v371_v14 = vld [vmem:[%s514_s0 + $0x20] sm:$0xff]  ;;  %v57_v16 = vsub.s32 0, %v56_v5  ;;  %v61_v17 = vsub.s32 1, %v56_v5  ;;  %v34_v19 = vunpack.c.h.bf16 %v17_v8  ;;  %v37_v24 = vunpack.c.l.bf16 %v376_v15 }
   0x5   :  { %v35_v22 = vunpack.c.l.bf16 %v371_v14  ;;  %v36_v23 = vunpack.c.h.bf16 %v371_v14  ;;  %v38_v25 = vunpack.c.h.bf16 %v376_v15  ;;  %v39_v30 = vunpack.c.l.bf16 %v381_v20 }
   0x6   :  { %v392_v26 = vrot.slane %v53_v2, %v57_v16  ;;  %v394_v27 = vrot.slane %v53_v2, %v61_v17  ;;  %v396_v28 = vrot.slane %v91_v9, %v57_v16  ;;  %v398_v29 = vrot.slane %v91_v9, %v61_v17 }
   0x7   :  { %v40_v31 = vunpack.c.h.bf16 %v381_v20  ;;  %v41_v32 = vunpack.c.l.bf16 %v386_v21  ;;  %v42_v33 = vunpack.c.h.bf16 %v386_v21 }
   0x8   :  { %v65_v34 = vmul.f32 %v392_v26, %v27_v3  ;;  %v66_v35 = vmul.f32 %v394_v27, %v28_v4  ;;  %v67_v36 = vmul.f32 %v392_v26, %v29_v10  ;;  %v68_v37 = vmul.f32 %v394_v27, %v30_v11 }
   0x9   :  { %v69_v38 = vmul.f32 %v392_v26, %v31_v12  ;;  %v70_v39 = vmul.f32 %v394_v27, %v32_v13  ;;  %v71_v40 = vmul.f32 %v392_v26, %v33_v18  ;;  %v72_v41 = vmul.f32 %v394_v27, %v34_v19 }
   0xa   :  { %v103_v42 = vadd.f32 %v396_v28, %v65_v34  ;;  %v104_v43 = vadd.f32 %v398_v29, %v66_v35  ;;  %v105_v44 = vadd.f32 %v396_v28, %v67_v36  ;;  %v106_v45 = vadd.f32 %v398_v29, %v68_v37  ;;  %v23_v37 = vld [vmem:[%s514_s0 + $0x48] sm:$0xff] }
   0xb   :  { %v107_v46 = vadd.f32 %v396_v28, %v69_v38  ;;  %v108_v47 = vadd.f32 %v398_v29, %v70_v39  ;;  %v109_v48 = vadd.f32 %v396_v28, %v71_v40  ;;  %v110_v49 = vadd.f32 %v398_v29, %v72_v41 }
   0xc   :  { %vm129_vm0 = vcmp.ge.f32.partialorder %v103_v42, 0.0  ;;  %vm130_vm1 = vcmp.ge.f32.partialorder %v104_v43, 0.0  ;;  %v155_v50 = vmul.f32 0.2, %v103_v42  ;;  %v156_v51 = vmul.f32 0.2, %v104_v43 }
   0xd   :  { %vm131_vm2 = vcmp.ge.f32.partialorder %v105_v44, 0.0  ;;  %vm132_vm3 = vcmp.ge.f32.partialorder %v106_v45, 0.0  ;;  %v157_v52 = vmul.f32 0.2, %v105_v44  ;;  %v158_v53 = vmul.f32 0.2, %v106_v45 }
   0xe   :  { %v181_v54 = vsel %vm129_vm0, %v103_v42, %v155_v50  ;;  %v182_v55 = vsel %vm130_vm1, %v104_v43, %v156_v51  ;;  %vm133_vm4 = vcmp.ge.f32.partialorder %v107_v46, 0.0  ;;  %vm134_vm5 = vcmp.ge.f32.partialorder %v108_v47, 0.0 }
   0xf   :  { %v317_v56 = vpack.c.bf16 %v182_v55, %v181_v54  ;;  %v183_v57 = vsel %vm131_vm2, %v105_v44, %v157_v52  ;;  %v184_v58 = vsel %vm132_vm3, %v106_v45, %v158_v53  ;;  %v159_v59 = vmul.f32 0.2, %v107_v46 }
  0x10   :  { %v318_v60 = vpack.c.bf16 %v184_v58, %v183_v57  ;;  %v160_v61 = vmul.f32 0.2, %v108_v47  ;;  %vm135_vm6 = vcmp.ge.f32.partialorder %v109_v48, 0.0  ;;  %vm136_vm7 = vcmp.ge.f32.partialorder %v110_v49, 0.0 }
  0x11   :  { %287 = vst [vmem:[%s517_s3] sm:$0xff] %v317_v56  ;;  %v185_v62 = vsel %vm133_vm4, %v107_v46, %v159_v59  ;;  %v161_v63 = vmul.f32 0.2, %v109_v48  ;;  %v162_v0 = vmul.f32 0.2, %v110_v49  ;;  %v73_v1 = vmul.f32 %v392_v26, %v35_v22  ;;  %v24_v46 = vld [vmem:[%s514_s0 + $0x50] sm:$0xff] }
  0x12   :  { %288 = vst [vmem:[%s517_s3 + $0x8] sm:$0xff] %v318_v60  ;;  %v186_v2 = vsel %vm134_vm5, %v108_v47, %v160_v61  ;;  %v74_v3 = vmul.f32 %v394_v27, %v36_v23  ;;  %v75_v4 = vmul.f32 %v392_v26, %v37_v24  ;;  %v76_v5 = vmul.f32 %v394_v27, %v38_v25 }
  0x13   :  { %v319_v6 = vpack.c.bf16 %v186_v2, %v185_v62  ;;  %v187_v7 = vsel %vm135_vm6, %v109_v48, %v161_v63  ;;  %v188_v8 = vsel %vm136_vm7, %v110_v49, %v162_v0  ;;  %v111_v9 = vadd.f32 %v396_v28, %v73_v1  ;;  %v25_v1 = vld [vmem:[%s514_s0 + $0x58] sm:$0xff] }
  0x14   :  { %v320_v10 = vpack.c.bf16 %v188_v8, %v187_v7  ;;  %v112_v11 = vadd.f32 %v398_v29, %v74_v3  ;;  %v113_v12 = vadd.f32 %v396_v28, %v75_v4  ;;  %v114_v13 = vadd.f32 %v398_v29, %v76_v5 }
  0x15   :  { %289 = vst [vmem:[%s517_s3 + $0x10] sm:$0xff] %v319_v6  ;;  %vm137_vm8 = vcmp.ge.f32.partialorder %v111_v9, 0.0  ;;  %v163_v14 = vmul.f32 0.2, %v111_v9  ;;  %v77_v15 = vmul.f32 %v392_v26, %v39_v30  ;;  %v78_v16 = vmul.f32 %v394_v27, %v40_v31  ;;  %v22_v31 = vld [vmem:[%s514_s0 + $0x40] sm:$0xff] }
  0x16   :  { %290 = vst [vmem:[%s517_s3 + $0x18] sm:$0xff] %v320_v10  ;;  %vm138_vm9 = vcmp.ge.f32.partialorder %v112_v11, 0.0  ;;  %v164_v17 = vmul.f32 0.2, %v112_v11  ;;  %vm139_vm10 = vcmp.ge.f32.partialorder %v113_v12, 0.0  ;;  %vm140_vm11 = vcmp.ge.f32.partialorder %v114_v13, 0.0 }
  0x17   :  { %v189_v18 = vsel %vm137_vm8, %v111_v9, %v163_v14  ;;  %v165_v19 = vmul.f32 0.2, %v113_v12  ;;  %v166_v20 = vmul.f32 0.2, %v114_v13  ;;  %v115_v22 = vadd.f32 %v396_v28, %v77_v15  ;;  %v26_v10 = vld [vmem:[%s514_s0 + $0x60] sm:$0xff] }
  0x18   :  { %v190_v23 = vsel %vm138_vm9, %v112_v11, %v164_v17  ;;  %v116_v24 = vadd.f32 %v398_v29, %v78_v16  ;;  %v79_v25 = vmul.f32 %v392_v26, %v41_v32  ;;  %v80_v30 = vmul.f32 %v394_v27, %v42_v33 }
  0x19   :  { %v321_v34 = vpack.c.bf16 %v190_v23, %v189_v18  ;;  %v191_v35 = vsel %vm139_vm10, %v113_v12, %v165_v19  ;;  %v192_v36 = vsel %vm140_vm11, %v114_v13, %v166_v20  ;;  %vm141_vm12 = vcmp.ge.f32.partialorder %v115_v22, 0.0 }
  0x1a   :  { %v322_v38 = vpack.c.bf16 %v192_v36, %v191_v35  ;;  %vm142_vm13 = vcmp.ge.f32.partialorder %v116_v24, 0.0  ;;  %v167_v39 = vmul.f32 0.2, %v115_v22  ;;  %v168_v32 = vmul.f32 0.2, %v116_v24 }
  0x1b   :  { %291 = vst [vmem:[%s517_s3 + $0x20] sm:$0xff] %v321_v34  ;;  %v117_v21 = vadd.f32 %v396_v28, %v79_v25  ;;  %v118_v33 = vadd.f32 %v398_v29, %v80_v30  ;;  %v43_v40 = vunpack.c.l.bf16 %v22_v31  ;;  %v44_v41 = vunpack.c.h.bf16 %v22_v31 }
  0x1c   :  { %292 = vst [vmem:[%s517_s3 + $0x28] sm:$0xff] %v322_v38  ;;  %v193_v42 = vsel %vm141_vm12, %v115_v22, %v167_v39  ;;  %v194_v43 = vsel %vm142_vm13, %v116_v24, %v168_v32  ;;  %v45_v44 = vunpack.c.l.bf16 %v23_v37  ;;  %v46_v45 = vunpack.c.h.bf16 %v23_v37 }
  0x1d   :  { %v323_v47 = vpack.c.bf16 %v194_v43, %v193_v42  ;;  %vm143_vm14 = vcmp.ge.f32.partialorder %v117_v21, 0.0  ;;  %vm144_vm15 = vcmp.ge.f32.partialorder %v118_v33, 0.0  ;;  %v169_v48 = vmul.f32 0.2, %v117_v21 }
  0x1e   :  { %v170_v49 = vmul.f32 0.2, %v118_v33  ;;  %v81_v50 = vmul.f32 %v392_v26, %v43_v40  ;;  %v82_v51 = vmul.f32 %v394_v27, %v44_v41  ;;  %v83_v52 = vmul.f32 %v392_v26, %v45_v44 }
  0x1f   :  { %293 = vst [vmem:[%s517_s3 + $0x30] sm:$0xff] %v323_v47  ;;  %v195_v53 = vsel %vm143_vm14, %v117_v21, %v169_v48  ;;  %v84_v54 = vmul.f32 %v394_v27, %v46_v45  ;;  %v47_v55 = vunpack.c.l.bf16 %v24_v46  ;;  %v48_v56 = vunpack.c.h.bf16 %v24_v46 }
  0x20   :  { %v196_v57 = vsel %vm144_vm15, %v118_v33, %v170_v49  ;;  %v119_v58 = vadd.f32 %v396_v28, %v81_v50  ;;  %v120_v59 = vadd.f32 %v398_v29, %v82_v51  ;;  %v121_v60 = vadd.f32 %v396_v28, %v83_v52 }
  0x21   :  { %v324_v61 = vpack.c.bf16 %v196_v57, %v195_v53  ;;  %v122_v62 = vadd.f32 %v398_v29, %v84_v54  ;;  %v85_v63 = vmul.f32 %v392_v26, %v47_v55  ;;  %v86_v0 = vmul.f32 %v394_v27, %v48_v56 }
  0x22   :  { %vm145_vm0 = vcmp.ge.f32.partialorder %v119_v58, 0.0  ;;  %vm146_vm1 = vcmp.ge.f32.partialorder %v120_v59, 0.0  ;;  %v171_v2 = vmul.f32 0.2, %v119_v58  ;;  %v172_v3 = vmul.f32 0.2, %v120_v59 }
  0x23   :  { %294 = vst [vmem:[%s517_s3 + $0x38] sm:$0xff] %v324_v61  ;;  %vm147_vm2 = vcmp.ge.f32.partialorder %v121_v60, 0.0  ;;  %vm148_vm3 = vcmp.ge.f32.partialorder %v122_v62, 0.0  ;;  %v173_v4 = vmul.f32 0.2, %v121_v60  ;;  %v123_v8 = vadd.f32 %v396_v28, %v85_v63 }
  0x24   :  { %v174_v5 = vmul.f32 0.2, %v122_v62  ;;  %v197_v6 = vsel %vm145_vm0, %v119_v58, %v171_v2  ;;  %v198_v7 = vsel %vm146_vm1, %v120_v59, %v172_v3  ;;  %v124_v9 = vadd.f32 %v398_v29, %v86_v0 }
  0x25   :  { %v325_v11 = vpack.c.bf16 %v198_v7, %v197_v6  ;;  %v199_v12 = vsel %vm147_vm2, %v121_v60, %v173_v4  ;;  %v49_v14 = vunpack.c.l.bf16 %v25_v1  ;;  %vm149_vm4 = vcmp.ge.f32.partialorder %v123_v8, 0.0 }
  0x26   :  { %v200_v13 = vsel %vm148_vm3, %v122_v62, %v174_v5  ;;  %vm150_vm5 = vcmp.ge.f32.partialorder %v124_v9, 0.0  ;;  %v175_v16 = vmul.f32 0.2, %v123_v8  ;;  %v176_v17 = vmul.f32 0.2, %v124_v9 }
  0x27   :  { %v326_v15 = vpack.c.bf16 %v200_v13, %v199_v12  ;;  %295 = vst [vmem:[%s517_s3 + $0x40] sm:$0xff] %v325_v11  ;;  %v50_v18 = vunpack.c.h.bf16 %v25_v1  ;;  %v87_v19 = vmul.f32 %v392_v26, %v49_v14  ;;  %v51_v20 = vunpack.c.l.bf16 %v26_v10 }
  0x28   :  { %v201_v22 = vsel %vm149_vm4, %v123_v8, %v175_v16  ;;  %v52_v23 = vunpack.c.h.bf16 %v26_v10  ;;  %v202_v24 = vsel %vm150_vm5, %v124_v9, %v176_v17 }
  0x29   :  { %296 = vst [vmem:[%s517_s3 + $0x48] sm:$0xff] %v326_v15  ;;  %v88_v25 = vmul.f32 %v394_v27, %v50_v18  ;;  %v125_v30 = vadd.f32 %v396_v28, %v87_v19  ;;  %v89_v31 = vmul.f32 %v392_v26, %v51_v20  ;;  %v327_v34 = vpack.c.bf16 %v202_v24, %v201_v22 }
  0x2a   :  { %v90_v35 = vmul.f32 %v394_v27, %v52_v23 }
  0x2b   :  { %v126_v36 = vadd.f32 %v398_v29, %v88_v25  ;;  %vm151_vm6 = vcmp.ge.f32.partialorder %v125_v30, 0.0  ;;  %v177_v37 = vmul.f32 0.2, %v125_v30  ;;  %v127_v38 = vadd.f32 %v396_v28, %v89_v31  ;;  %297 = vst [vmem:[%s517_s3 + $0x50] sm:$0xff] %v327_v34 }
  0x2c   :  { %v128_v39 = vadd.f32 %v398_v29, %v90_v35 }
  0x2d   :  { %vm152_vm7 = vcmp.ge.f32.partialorder %v126_v36, 0.0  ;;  %v178_v32 = vmul.f32 0.2, %v126_v36  ;;  %v203_v21 = vsel %vm151_vm6, %v125_v30, %v177_v37  ;;  %vm153_vm8 = vcmp.ge.f32.partialorder %v127_v38, 0.0 }
  0x2e   :  { %vm154_vm9 = vcmp.ge.f32.partialorder %v128_v39, 0.0  ;;  %v179_v26 = vmul.f32 0.2, %v127_v38  ;;  %v180_v33 = vmul.f32 0.2, %v128_v39 }
  0x2f   :  { %v204_v27 = vsel %vm152_vm7, %v126_v36, %v178_v32 }
  0x30   :  { %v328_v40 = vpack.c.bf16 %v204_v27, %v203_v21  ;;  %v205_v41 = vsel %vm153_vm8, %v127_v38, %v179_v26  ;;  %v206_v42 = vsel %vm154_vm9, %v128_v39, %v180_v33 }
  0x31   :  { %v329_v43 = vpack.c.bf16 %v206_v42, %v205_v41 }
  0x32   :  { %298 = vst [vmem:[%s517_s3 + $0x58] sm:$0xff] %v328_v40 }
  0x33   :  { %299 = vst [vmem:[%s517_s3 + $0x60] sm:$0xff] %v329_v43 }

// kernel: discriminator_forward.5
= control target key start
LH: loop header
LB: loop body
LE: loop exit
PB: predicated region body
PF: predicated region fallthrough
CT: control target
= control target key end

     0   :  { %s5530_s1 = inlined_call_operand.vmem [shape: bf16[2048,256], index: 1, kind: input, shape index: {}]   ;;  %s5531_s0 = inlined_call_operand.vmem [shape: bf16[104,2048], index: 0, kind: input, shape index: {}]   ;;  %s5532_s3 = inlined_call_operand.vmem [shape: f32[1,256], index: 3, kind: output, shape index: {1}]   ;;  %s5533_s4 = inlined_call_operand.vmem [shape: f32[1,256], index: 4, kind: output, shape index: {2}]   ;;  %s5534_s2 = inlined_call_operand.vmem [shape: bf16[104,256], index: 2, kind: output, shape index: {0}]  }
   0x1   :  { %v3679_v0 = vld [vmem:[%s5530_s1 + $0x74] ss:$8 sps:$4 sm:$0xff]   ;;  %v3683_v2 = vld [vmem:[%s5530_s1 + $0x70] ss:$8 sps:$4 sm:$0xff]   ;;  %v3685_v4 = vld [vmem:[%s5530_s1 + $0x64] ss:$8 sps:$4 sm:$0xff]  }
   0x2   :  { %v3681_v1 = vld [vmem:[%s5530_s1 + $0x174] ss:$8 sps:$4 sm:$0xff]   ;;  %2190 = vmatprep.subr.bf16.mxu0 %v3679_v0  ;;  %v3684_v3 = vld [vmem:[%s5530_s1 + $0x170] ss:$8 sps:$4 sm:$0xff]   ;;  %v3687_v5 = vld [vmem:[%s5530_s1 + $0x164] ss:$8 sps:$4 sm:$0xff]  }
   0x3   :  { %2291 = vmatprep.subr.bf16.mxu1 %v3681_v1  ;;  %2191 = vmatpush1.bf16.msra.mxu0 %v3683_v2  ;;  %v3689_v6 = vld [vmem:[%s5530_s1 + $0x60] ss:$8 sps:$4 sm:$0xff]   ;;  %v3691_v8 = vld [vmem:[%s5530_s1 + $0x54] ss:$8 sps:$4 sm:$0xff]   ;;  %v3695_v10 = vld [vmem:[%s5530_s1 + $0x50] ss:$8 sps:$4 sm:$0xff]  }
   0x4   :  { %2292 = vmatpush1.bf16.msra.mxu1 %v3684_v3  ;;  %2192 = vmatprep.subr.bf16.mxu0 %v3685_v4  ;;  %v3690_v7 = vld [vmem:[%s5530_s1 + $0x160] ss:$8 sps:$4 sm:$0xff]   ;;  %v3693_v9 = vld [vmem:[%s5530_s1 + $0x154] ss:$8 sps:$4 sm:$0xff]   ;;  %v3696_v11 = vld [vmem:[%s5530_s1 + $0x150] ss:$8 sps:$4 sm:$0xff]  }
   0x5   :  { %2293 = vmatprep.subr.bf16.mxu1 %v3687_v5  ;;  %v3697_v12 = vld [vmem:[%s5530_s1 + $0x44] ss:$8 sps:$4 sm:$0xff]   ;;  %v3701_v14 = vld [vmem:[%s5530_s1 + $0x40] ss:$8 sps:$4 sm:$0xff]   ;;  %v3703_v16 = vld [vmem:[%s5530_s1 + $0x34] ss:$8 sps:$4 sm:$0xff]  }
   0x6   :  { %v3699_v13 = vld [vmem:[%s5530_s1 + $0x144] ss:$8 sps:$4 sm:$0xff]   ;;  %v3702_v15 = vld [vmem:[%s5530_s1 + $0x140] ss:$8 sps:$4 sm:$0xff]   ;;  %v3705_v17 = vld [vmem:[%s5530_s1 + $0x134] ss:$8 sps:$4 sm:$0xff]  }
   0x7   :  { %2193 = vmatpush1.bf16.msra.mxu0 %v3689_v6  ;;  %v3707_v18 = vld [vmem:[%s5530_s1 + $0x30] ss:$8 sps:$4 sm:$0xff]   ;;  %v3709_v20 = vld [vmem:[%s5530_s1 + $0x24] ss:$8 sps:$4 sm:$0xff]   ;;  %v3713_v22 = vld [vmem:[%s5530_s1 + $0x20] ss:$8 sps:$4 sm:$0xff]  }
   0x8   :  { %2294 = vmatpush1.bf16.msra.mxu1 %v3690_v7  ;;  %2194 = vmatprep.subr.bf16.mxu0 %v3691_v8  ;;  %v3708_v19 = vld [vmem:[%s5530_s1 + $0x130] ss:$8 sps:$4 sm:$0xff]   ;;  %v3711_v21 = vld [vmem:[%s5530_s1 + $0x124] ss:$8 sps:$4 sm:$0xff]   ;;  %v3714_v23 = vld [vmem:[%s5530_s1 + $0x120] ss:$8 sps:$4 sm:$0xff]  }
   0x9   :  { %2295 = vmatprep.subr.bf16.mxu1 %v3693_v9  ;;  %v3715_v24 = vld [vmem:[%s5530_s1 + $0x14] ss:$8 sps:$4 sm:$0xff]   ;;  %v3719_v26 = vld [vmem:[%s5530_s1 + $0x10] ss:$8 sps:$4 sm:$0xff]   ;;  %v3721_v28 = vld [vmem:[%s5530_s1 + $0x4] ss:$8 sps:$4 sm:$0xff]  }
   0xa   :  { %v3717_v25 = vld [vmem:[%s5530_s1 + $0x114] ss:$8 sps:$4 sm:$0xff]   ;;  %v3720_v27 = vld [vmem:[%s5530_s1 + $0x110] ss:$8 sps:$4 sm:$0xff]   ;;  %v3723_v29 = vld [vmem:[%s5530_s1 + $0x104] ss:$8 sps:$4 sm:$0xff]  }
   0xb   :  { %2195 = vmatpush1.bf16.msra.mxu0 %v3695_v10  ;;  %v3725_v30 = vld [vmem:[%s5530_s1] ss:$8 sps:$4 sm:$0xff]   ;;  %v3727_v32 = vld [vmem:[%s5530_s1 + $0xf4] ss:$8 sps:$4 sm:$0xff]   ;;  %v3731_v34 = vld [vmem:[%s5530_s1 + $0xf0] ss:$8 sps:$4 sm:$0xff]  }
   0xc   :  { %2296 = vmatpush1.bf16.msra.mxu1 %v3696_v11  ;;  %2196 = vmatprep.subr.bf16.mxu0 %v3697_v12  ;;  %v3726_v31 = vld [vmem:[%s5530_s1 + $0x100] ss:$8 sps:$4 sm:$0xff]   ;;  %v3729_v33 = vld [vmem:[%s5530_s1 + $0x1f4] ss:$8 sps:$4 sm:$0xff]   ;;  %v3732_v35 = vld [vmem:[%s5530_s1 + $0x1f0] ss:$8 sps:$4 sm:$0xff]  }
   0xd   :  { %2297 = vmatprep.subr.bf16.mxu1 %v3699_v13  ;;  %v3733_v36 = vld [vmem:[%s5530_s1 + $0xe4] ss:$8 sps:$4 sm:$0xff]   ;;  %v3737_v38 = vld [vmem:[%s5530_s1 + $0xe0] ss:$8 sps:$4 sm:$0xff]   ;;  %v3739_v40 = vld [vmem:[%s5530_s1 + $0xd4] ss:$8 sps:$4 sm:$0xff]  }
   0xe   :  { %v3735_v37 = vld [vmem:[%s5530_s1 + $0x1e4] ss:$8 sps:$4 sm:$0xff]   ;;  %v3738_v39 = vld [vmem:[%s5530_s1 + $0x1e0] ss:$8 sps:$4 sm:$0xff]   ;;  %v3741_v41 = vld [vmem:[%s5530_s1 + $0x1d4] ss:$8 sps:$4 sm:$0xff]  }
   0xf   :  { %2197 = vmatpush1.bf16.msra.mxu0 %v3701_v14  ;;  %v3743_v42 = vld [vmem:[%s5530_s1 + $0xd0] ss:$8 sps:$4 sm:$0xff]   ;;  %v3745_v44 = vld [vmem:[%s5530_s1 + $0xc4] ss:$8 sps:$4 sm:$0xff]   ;;  %v3749_v46 = vld [vmem:[%s5530_s1 + $0xc0] ss:$8 sps:$4 sm:$0xff]  }
  0x10   :  { %2298 = vmatpush1.bf16.msra.mxu1 %v3702_v15  ;;  %2198 = vmatprep.subr.bf16.mxu0 %v3703_v16  ;;  %v3744_v43 = vld [vmem:[%s5530_s1 + $0x1d0] ss:$8 sps:$4 sm:$0xff]   ;;  %v3747_v45 = vld [vmem:[%s5530_s1 + $0x1c4] ss:$8 sps:$4 sm:$0xff]   ;;  %v3750_v47 = vld [vmem:[%s5530_s1 + $0x1c0] ss:$8 sps:$4 sm:$0xff]  }
  0x11   :  { %2299 = vmatprep.subr.bf16.mxu1 %v3705_v17  ;;  %v14_v48 = vld [vmem:[%s5531_s0] sm:$0xff]  ;;  %v15_v50 = vld [vmem:[%s5531_s0 + $0x8] sm:$0xff]  ;;  %v3751_v52 = vld [vmem:[%s5530_s1 + $0xb4] ss:$8 sps:$4 sm:$0xff]  }
  0x12   :  { %v22_v49 = vld [vmem:[%s5531_s0 + $0x40] sm:$0xff]  ;;  %v23_v51 = vld [vmem:[%s5531_s0 + $0x48] sm:$0xff]  ;;  %v3753_v54 = vld [vmem:[%s5530_s1 + $0x1b4] ss:$8 sps:$4 sm:$0xff]  }
  0x13   :  { %2199 = vmatpush1.bf16.msra.mxu0 %v3707_v18  ;;  %v3284_v53 = vcombine.high %v14_v48, %v22_v49  ;;  %v3286_v55 = vcombine.high %v15_v50, %v23_v51  ;;  %v3755_v56 = vld [vmem:[%s5530_s1 + $0xb0] ss:$8 sps:$4 sm:$0xff]   ;;  %v3757_v58 = vld [vmem:[%s5530_s1 + $0xa4] ss:$8 sps:$4 sm:$0xff]   ;;  %v3761_v60 = vld [vmem:[%s5530_s1 + $0xa0] ss:$8 sps:$4 sm:$0xff]   ;;  %v3283_v11 = vcombine.low %v14_v48, %v22_v49  ;;  %v3285_v12 = vcombine.low %v15_v50, %v23_v51 }
  0x14   :  { %2300 = vmatpush1.bf16.msra.mxu1 %v3708_v19  ;;  %2200 = vmatprep.subr.bf16.mxu0 %v3709_v20  ;;  %v3756_v57 = vld [vmem:[%s5530_s1 + $0x1b0] ss:$8 sps:$4 sm:$0xff]   ;;  %v3759_v59 = vld [vmem:[%s5530_s1 + $0x1a4] ss:$8 sps:$4 sm:$0xff]   ;;  %v3762_v61 = vld [vmem:[%s5530_s1 + $0x1a0] ss:$8 sps:$4 sm:$0xff]  }
  0x15   :  { %2301 = vmatprep.subr.bf16.mxu1 %v3711_v21  ;;  %2222 = vmatprep.mubr.bf16.mxu0 %v3284_v53  ;;  %v3763_v62 = vld [vmem:[%s5530_s1 + $0x94] ss:$8 sps:$4 sm:$0xff]   ;;  %v3767_v0 = vld [vmem:[%s5530_s1 + $0x90] ss:$8 sps:$4 sm:$0xff]   ;;  %v3769_v2 = vld [vmem:[%s5530_s1 + $0x84] ss:$8 sps:$4 sm:$0xff]  }
  0x16   :  { %2323 = vmatprep.mubr.bf16.mxu1 %v3286_v55  ;;  %v3765_v63 = vld [vmem:[%s5530_s1 + $0x194] ss:$8 sps:$4 sm:$0xff]   ;;  %v3768_v1 = vld [vmem:[%s5530_s1 + $0x190] ss:$8 sps:$4 sm:$0xff]   ;;  %v3771_v3 = vld [vmem:[%s5530_s1 + $0x184] ss:$8 sps:$4 sm:$0xff]  }
  0x17   :  { %2201 = vmatpush1.bf16.msra.mxu0 %v3713_v22  ;;  %v3773_v4 = vld [vmem:[%s5530_s1 + $0x80] ss:$8 sps:$4 sm:$0xff]   ;;  %v3777_v6 = vld [vmem:[%s5530_s1 + $0x274] ss:$8 sps:$4 sm:$0xff]   ;;  %v3775_v8 = vld [vmem:[%s5530_s1 + $0x270] ss:$8 sps:$4 sm:$0xff]  }
  0x18   :  { %2302 = vmatpush1.bf16.msra.mxu1 %v3714_v23  ;;  %2202 = vmatprep.subr.bf16.mxu0 %v3715_v24  ;;  %v3774_v5 = vld [vmem:[%s5530_s1 + $0x180] ss:$8 sps:$4 sm:$0xff]   ;;  %v3780_v7 = vld [vmem:[%s5530_s1 + $0x374] ss:$8 sps:$4 sm:$0xff]   ;;  %v3778_v15 = vld [vmem:[%s5530_s1 + $0x370] ss:$8 sps:$4 sm:$0xff]  }
  0x19   :  { %2303 = vmatprep.subr.bf16.mxu1 %v3717_v25  ;;  %v30_v9 = vld [vmem:[%s5531_s0 + $0x80] sm:$0xff]  ;;  %v31_v13 = vld [vmem:[%s5531_s0 + $0x88] sm:$0xff]  ;;  %v3789_v22 = vld [vmem:[%s5530_s1 + $0x254] ss:$8 sps:$4 sm:$0xff]  }
  0x1a   :  { %v38_v10 = vld [vmem:[%s5531_s0 + $0xc0] sm:$0xff]  ;;  %v39_v14 = vld [vmem:[%s5531_s0 + $0xc8] sm:$0xff]  ;;  %v3792_v23 = vld [vmem:[%s5530_s1 + $0x354] ss:$8 sps:$4 sm:$0xff]  }
  0x1b   :  { %2203 = vmatpush1.bf16.msra.mxu0 %v3719_v26  ;;  %v3783_v16 = vld [vmem:[%s5530_s1 + $0x264] ss:$8 sps:$4 sm:$0xff]   ;;  %v3300_v18 = vcombine.high %v30_v9, %v38_v10  ;;  %v3302_v19 = vcombine.high %v31_v13, %v39_v14  ;;  %v3781_v20 = vld [vmem:[%s5530_s1 + $0x260] ss:$8 sps:$4 sm:$0xff]   ;;  %v3299_v26 = vcombine.low %v30_v9, %v38_v10  ;;  %v3816_v55 = vld [vmem:[%s5530_s1 + $0x314] ss:$8 sps:$4 sm:$0xff]  }
  0x1c   :  { %2304 = vmatpush1.bf16.msra.mxu1 %v3720_v27  ;;  %2204 = vmatprep.subr.bf16.mxu0 %v3721_v28  ;;  %v3786_v17 = vld [vmem:[%s5530_s1 + $0x364] ss:$8 sps:$4 sm:$0xff]   ;;  %v3784_v21 = vld [vmem:[%s5530_s1 + $0x360] ss:$8 sps:$4 sm:$0xff]   ;;  %v3301_v27 = vcombine.low %v31_v13, %v39_v14  ;;  %v3823_v14 = vld [vmem:[%s5530_s1 + $0x2f0] ss:$8 sps:$4 sm:$0xff]  }
  0x1d   :  { %2305 = vmatprep.subr.bf16.mxu1 %v3723_v29  ;;  %v46_v24 = vld [vmem:[%s5531_s0 + $0x100] sm:$0xff]  ;;  %v47_v28 = vld [vmem:[%s5531_s0 + $0x108] sm:$0xff] }
  0x1e   :  { %v54_v25 = vld [vmem:[%s5531_s0 + $0x140] sm:$0xff]  ;;  %v55_v29 = vld [vmem:[%s5531_s0 + $0x148] sm:$0xff] }
  0x1f   :  { %2205 = vmatpush1.bf16.msra.mxu0 %v3725_v30  ;;  %v3787_v30 = vld [vmem:[%s5530_s1 + $0x250] ss:$8 sps:$4 sm:$0xff]   ;;  %v3807_v48 = vld [vmem:[%s5530_s1 + $0x224] ss:$8 sps:$4 sm:$0xff]   ;;  %v3808_v53 = vld [vmem:[%s5530_s1 + $0x320] ss:$8 sps:$4 sm:$0xff]  }
  0x20   :  { %2306 = vmatpush1.bf16.msra.mxu1 %v3726_v31  ;;  %2206 = vmatprep.subr.bf16.mxu0 %v3727_v32  ;;  %v3790_v31 = vld [vmem:[%s5530_s1 + $0x350] ss:$8 sps:$4 sm:$0xff]   ;;  %v3795_v32 = vld [vmem:[%s5530_s1 + $0x244] ss:$8 sps:$4 sm:$0xff]  }
  0x21   :  { %2307 = vmatprep.subr.bf16.mxu1 %v3729_v33  ;;  %v3798_v33 = vld [vmem:[%s5530_s1 + $0x344] ss:$8 sps:$4 sm:$0xff]  }
  0x22   :  { %v3810_v49 = vld [vmem:[%s5530_s1 + $0x324] ss:$8 sps:$4 sm:$0xff]  }
  0x23   :  { %2207 = vmatpush2.bf16.msra.mxu0 %v3731_v34  ;;  %v3316_v34 = vcombine.high %v46_v24, %v54_v25  ;;  %v102_v9 = vld [vmem:[%s5531_s0 + $0x2c0] sm:$0xff]  ;;  %v95_v10 = vld [vmem:[%s5531_s0 + $0x288] sm:$0xff] }
  0x24   :  { %2308 = vmatpush2.bf16.msra.mxu1 %v3732_v35  ;;  %2208 = vmatprep.subr.bf16.mxu0 %v3733_v36  ;;  %v3318_v35 = vcombine.high %v47_v28, %v55_v29  ;;  %v3793_v36 = vld [vmem:[%s5530_s1 + $0x240] ss:$8 sps:$4 sm:$0xff]  }
  0x25   :  { %2309 = vmatprep.subr.bf16.mxu1 %v3735_v37  ;;  %v3796_v37 = vld [vmem:[%s5530_s1 + $0x340] ss:$8 sps:$4 sm:$0xff]  }
  0x26   :  { %v103_v13 = vld [vmem:[%s5531_s0 + $0x2c8] sm:$0xff] }
  0x27   :  { %2209 = vmatpush2.bf16.msra.mxu0 %v3737_v38  ;;  %v3801_v38 = vld [vmem:[%s5530_s1 + $0x234] ss:$8 sps:$4 sm:$0xff]  }
  0x28   :  { %2310 = vmatpush2.bf16.msra.mxu1 %v3738_v39  ;;  %2210 = vmatprep.subr.bf16.mxu0 %v3739_v40  ;;  %v3804_v39 = vld [vmem:[%s5530_s1 + $0x334] ss:$8 sps:$4 sm:$0xff]   ;;  %v3799_v40 = vld [vmem:[%s5530_s1 + $0x230] ss:$8 sps:$4 sm:$0xff]  }
  0x29   :  { %2311 = vmatprep.subr.bf16.mxu1 %v3741_v41  ;;  %v3802_v41 = vld [vmem:[%s5530_s1 + $0x330] ss:$8 sps:$4 sm:$0xff]  }
  0x2b   :  { %2211 = vmatpush2.bf16.msra.mxu0 %v3743_v42  ;;  %v62_v42 = vld [vmem:[%s5531_s0 + $0x180] sm:$0xff] }
  0x2c   :  { %2312 = vmatpush2.bf16.msra.mxu1 %v3744_v43  ;;  %2212 = vmatprep.subr.bf16.mxu0 %v3745_v44  ;;  %v3315_v43 = vcombine.low %v46_v24, %v54_v25  ;;  %v3317_v44 = vcombine.low %v47_v28, %v55_v29  ;;  %v3365_v25 = vcombine.low %v95_v10, %v103_v13  ;;  %v3835_v28 = vld [vmem:[%s5530_s1 + $0x2d0] ss:$8 sps:$4 sm:$0xff]  }
  0x2d   :  { %2313 = vmatprep.subr.bf16.mxu1 %v3747_v45  ;;  %v70_v45 = vld [vmem:[%s5531_s0 + $0x1c0] sm:$0xff]  ;;  %v3838_v29 = vld [vmem:[%s5530_s1 + $0x3d0] ss:$8 sps:$4 sm:$0xff]  }
  0x2e   :  { %v3332_v50 = vcombine.high %v62_v42, %v70_v45 }
  0x2f   :  { %2213 = vmatpush2.bf16.msra.mxu0 %v3749_v46  ;;  %v63_v46 = vld [vmem:[%s5531_s0 + $0x188] sm:$0xff] }
  0x30   :  { %2314 = vmatpush2.bf16.msra.mxu1 %v3750_v47  ;;  %2214 = vmatprep.subr.bf16.mxu0 %v3751_v52  ;;  %v71_v47 = vld [vmem:[%s5531_s0 + $0x1c8] sm:$0xff] }
  0x31   :  { %2315 = vmatprep.subr.bf16.mxu1 %v3753_v54  ;;  %v3334_v51 = vcombine.high %v63_v46, %v71_v47  ;;  %v3805_v52 = vld [vmem:[%s5530_s1 + $0x220] ss:$8 sps:$4 sm:$0xff]   ;;  %v3813_v54 = vld [vmem:[%s5530_s1 + $0x214] ss:$8 sps:$4 sm:$0xff]  }
  0x33   :  { %2215 = vmatpush2.bf16.msra.mxu0 %v3755_v56  ;;  %v78_v56 = vld [vmem:[%s5531_s0 + $0x200] sm:$0xff] }
  0x34   :  { %2316 = vmatpush2.bf16.msra.mxu1 %v3756_v57  ;;  %2216 = vmatprep.subr.bf16.mxu0 %v3757_v58  ;;  %v86_v57 = vld [vmem:[%s5531_s0 + $0x240] sm:$0xff]  ;;  %v79_v58 = vld [vmem:[%s5531_s0 + $0x208] sm:$0xff] }
  0x35   :  { %2317 = vmatprep.subr.bf16.mxu1 %v3759_v59  ;;  %v3331_v59 = vcombine.low %v62_v42, %v70_v45  ;;  %v3850_v45 = vld [vmem:[%s5530_s1 + $0x3b0] ss:$8 sps:$4 sm:$0xff]  }
  0x37   :  { %2217 = vmatpush2.bf16.msra.mxu0 %v3761_v60  ;;  %v3333_v60 = vcombine.low %v63_v46, %v71_v47  ;;  %v3858_v46 = vld [vmem:[%s5530_s1 + $0x2a4] ss:$8 sps:$4 sm:$0xff]  }
  0x38   :  { %2318 = vmatpush2.bf16.msra.mxu1 %v3762_v61  ;;  %2218 = vmatprep.subr.bf16.mxu0 %v3763_v62  ;;  %v87_v61 = vld [vmem:[%s5531_s0 + $0x248] sm:$0xff]  ;;  %v3811_v62 = vld [vmem:[%s5530_s1 + $0x210] ss:$8 sps:$4 sm:$0xff]  }
  0x39   :  { %2319 = vmatprep.subr.bf16.mxu1 %v3765_v63  ;;  %v3814_v63 = vld [vmem:[%s5530_s1 + $0x310] ss:$8 sps:$4 sm:$0xff]   ;;  %v3861_v47 = vld [vmem:[%s5530_s1 + $0x3a4] ss:$8 sps:$4 sm:$0xff]  }
  0x3b   :  { %2219 = vmatpush2.bf16.msra.mxu0 %v3767_v0  ;;  %v3819_v0 = vld [vmem:[%s5530_s1 + $0x204] ss:$8 sps:$4 sm:$0xff]  }
  0x3c   :  { %2320 = vmatpush2.bf16.msra.mxu1 %v3768_v1  ;;  %2220 = vmatprep.subr.bf16.mxu0 %v3769_v2  ;;  %v3822_v1 = vld [vmem:[%s5530_s1 + $0x304] ss:$8 sps:$4 sm:$0xff]   ;;  %v3348_v2 = vcombine.high %v78_v56, %v86_v57 }
  0x3d   :  { %2321 = vmatprep.subr.bf16.mxu1 %v3771_v3  ;;  %v3350_v3 = vcombine.high %v79_v58, %v87_v61 }
  0x3f   :  { %2221 = vmatpush2.bf16.msra.mxu0 %v3773_v4  ;;  %v3817_v4 = vld [vmem:[%s5530_s1 + $0x200] ss:$8 sps:$4 sm:$0xff]  }
  0x40   :  { %2322 = vmatpush2.bf16.msra.mxu1 %v3774_v5  ;;  %2392 = vmatprep.subr.bf16.mxu0 %v3777_v6  ;;  %v3820_v5 = vld [vmem:[%s5530_s1 + $0x300] ss:$8 sps:$4 sm:$0xff]   ;;  %v3825_v6 = vld [vmem:[%s5530_s1 + $0x2f4] ss:$8 sps:$4 sm:$0xff]  }
  0x41   :  { %2493 = vmatprep.subr.bf16.mxu1 %v3780_v7  ;;  %v3828_v7 = vld [vmem:[%s5530_s1 + $0x3f4] ss:$8 sps:$4 sm:$0xff]  }
  0x42   :  { %2223 = vmatmul.mubr.bf16.vlgmr.msra.gmra.mxu0 %v3283_v11  ;;  %v3347_v11 = vcombine.low %v78_v56, %v86_v57  ;;  %v3871_v56 = vld [vmem:[%s5530_s1 + $0x284] ss:$8 sps:$4 sm:$0xff]  }
  0x43   :  { %2324 = vmatmul.mubr.bf16.vlgmr.msra.gmra.mxu1 %v3285_v12  ;;  %2393 = vmatpush1.bf16.msra.mxu0 %v3775_v8  ;;  %v94_v8 = vld [vmem:[%s5531_s0 + $0x280] sm:$0xff]  ;;  %v3349_v12 = vcombine.low %v79_v58, %v87_v61  ;;  %v3880_v61 = vld [vmem:[%s5530_s1 + $0x574] ss:$8 sps:$4 sm:$0xff]  }
  0x44   :  { %2494 = vmatpush1.bf16.msra.mxu1 %v3778_v15  ;;  %2394 = vmatprep.subr.bf16.mxu0 %v3783_v16  ;;  %v3826_v15 = vld [vmem:[%s5530_s1 + $0x3f0] ss:$8 sps:$4 sm:$0xff]   ;;  %v3831_v16 = vld [vmem:[%s5530_s1 + $0x2e4] ss:$8 sps:$4 sm:$0xff]   ;;  %v3363_v24 = vcombine.low %v94_v8, %v102_v9  ;;  %v3869_v58 = vld [vmem:[%s5530_s1 + $0x280] ss:$8 sps:$4 sm:$0xff]  }
  0x45   :  { %2495 = vmatprep.subr.bf16.mxu1 %v3786_v17  ;;  %2232 = vmatprep.mubr.bf16.mxu0 %v3300_v18  ;;  %v3834_v17 = vld [vmem:[%s5530_s1 + $0x3e4] ss:$8 sps:$4 sm:$0xff]   ;;  %v3364_v18 = vcombine.high %v94_v8, %v102_v9 }
  0x46   :  { %2333 = vmatprep.mubr.bf16.mxu1 %v3302_v19  ;;  %v3366_v19 = vcombine.high %v95_v10, %v103_v13  ;;  %v3874_v57 = vld [vmem:[%s5530_s1 + $0x384] ss:$8 sps:$4 sm:$0xff]   ;;  %v3881_v10 = vld [vmem:[%s5530_s1 + $0x460] ss:$8 sps:$4 sm:$0xff]   ;;  %v3892_v13 = vld [vmem:[%s5530_s1 + $0x554] ss:$8 sps:$4 sm:$0xff]  }
  0x47   :  { %2395 = vmatpush1.bf16.msra.mxu0 %v3781_v20  ;;  %v3829_v20 = vld [vmem:[%s5530_s1 + $0x2e0] ss:$8 sps:$4 sm:$0xff]  }
  0x48   :  { %2496 = vmatpush1.bf16.msra.mxu1 %v3784_v21  ;;  %2396 = vmatprep.subr.bf16.mxu0 %v3789_v22  ;;  %v3832_v21 = vld [vmem:[%s5530_s1 + $0x3e0] ss:$8 sps:$4 sm:$0xff]   ;;  %v3837_v22 = vld [vmem:[%s5530_s1 + $0x2d4] ss:$8 sps:$4 sm:$0xff]  }
  0x49   :  { %2497 = vmatprep.subr.bf16.mxu1 %v3792_v23  ;;  %v3840_v23 = vld [vmem:[%s5530_s1 + $0x3d4] ss:$8 sps:$4 sm:$0xff]  }
  0x4a   :  { %2233 = vmatmul.mubr.bf16.gmra.mxu0 %v3299_v26  ;;  %v110_v26 = vld [vmem:[%s5531_s0 + $0x300] sm:$0xff] }
  0x4b   :  { %2334 = vmatmul.mubr.bf16.gmra.mxu1 %v3301_v27  ;;  %2397 = vmatpush1.bf16.msra.mxu0 %v3787_v30  ;;  %v111_v27 = vld [vmem:[%s5531_s0 + $0x308] sm:$0xff] }
  0x4c   :  { %2498 = vmatpush1.bf16.msra.mxu1 %v3790_v31  ;;  %2398 = vmatprep.subr.bf16.mxu0 %v3795_v32  ;;  %v3843_v30 = vld [vmem:[%s5530_s1 + $0x2c4] ss:$8 sps:$4 sm:$0xff]   ;;  %v3380_v32 = vcombine.high %v110_v26, %v110_v26  ;;  %v3381_v42 = vcombine.low %v111_v27, %v111_v27 }
  0x4d   :  { %2499 = vmatprep.subr.bf16.mxu1 %v3798_v33  ;;  %2242 = vmatprep.mubr.bf16.mxu0 %v3316_v34  ;;  %v3846_v31 = vld [vmem:[%s5530_s1 + $0x3c4] ss:$8 sps:$4 sm:$0xff]   ;;  %v3382_v33 = vcombine.high %v111_v27, %v111_v27  ;;  %v3841_v34 = vld [vmem:[%s5530_s1 + $0x2c0] ss:$8 sps:$4 sm:$0xff]  }
  0x4e   :  { %2343 = vmatprep.mubr.bf16.mxu1 %v3318_v35  ;;  %v3844_v35 = vld [vmem:[%s5530_s1 + $0x3c0] ss:$8 sps:$4 sm:$0xff]  }
  0x4f   :  { %2399 = vmatpush1.bf16.msra.mxu0 %v3793_v36  ;;  %v3849_v36 = vld [vmem:[%s5530_s1 + $0x2b4] ss:$8 sps:$4 sm:$0xff]   ;;  %v3896_v27 = vld [vmem:[%s5530_s1 + $0x540] ss:$8 sps:$4 sm:$0xff]  }
  0x50   :  { %2500 = vmatpush1.bf16.msra.mxu1 %v3796_v37  ;;  %2400 = vmatprep.subr.bf16.mxu0 %v3801_v38  ;;  %v3852_v37 = vld [vmem:[%s5530_s1 + $0x3b4] ss:$8 sps:$4 sm:$0xff]  }
  0x51   :  { %2501 = vmatprep.subr.bf16.mxu1 %v3804_v39  ;;  %v16_v38 = vld [vmem:[%s5531_s0 + $0x10] sm:$0xff] }
  0x52   :  { %2243 = vmatmul.mubr.bf16.gmra.mxu0 %v3315_v43  ;;  %v24_v39 = vld [vmem:[%s5531_s0 + $0x50] sm:$0xff]  ;;  %v25_v43 = vld [vmem:[%s5531_s0 + $0x58] sm:$0xff] }
  0x53   :  { %2344 = vmatmul.mubr.bf16.gmra.mxu1 %v3317_v44  ;;  %2401 = vmatpush1.bf16.msra.mxu0 %v3799_v40  ;;  %v17_v40 = vld [vmem:[%s5531_s0 + $0x18] sm:$0xff] }
  0x54   :  { %2502 = vmatpush1.bf16.msra.mxu1 %v3802_v41  ;;  %2402 = vmatprep.subr.bf16.mxu0 %v3807_v48  ;;  %v3379_v41 = vcombine.low %v110_v26, %v110_v26  ;;  %v3847_v44 = vld [vmem:[%s5530_s1 + $0x2b0] ss:$8 sps:$4 sm:$0xff]   ;;  %v3288_v48 = vcombine.high %v16_v38, %v24_v39  ;;  %v3893_v26 = vld [vmem:[%s5530_s1 + $0x440] ss:$8 sps:$4 sm:$0xff]  }
  0x55   :  { %2503 = vmatprep.subr.bf16.mxu1 %v3810_v49  ;;  %2252 = vmatprep.mubr.bf16.mxu0 %v3332_v50  ;;  %v3290_v49 = vcombine.high %v17_v40, %v25_v43  ;;  %v3856_v50 = vld [vmem:[%s5530_s1 + $0x2a0] ss:$8 sps:$4 sm:$0xff]  }
  0x56   :  { %2353 = vmatprep.mubr.bf16.mxu1 %v3334_v51  ;;  %v3859_v51 = vld [vmem:[%s5530_s1 + $0x3a0] ss:$8 sps:$4 sm:$0xff]  }
  0x57   :  { %2403 = vmatpush1.bf16.msra.mxu0 %v3805_v52  ;;  %v3865_v52 = vld [vmem:[%s5530_s1 + $0x294] ss:$8 sps:$4 sm:$0xff]  }
  0x58   :  { %2504 = vmatpush1.bf16.msra.mxu1 %v3808_v53  ;;  %2404 = vmatprep.subr.bf16.mxu0 %v3813_v54  ;;  %v3868_v53 = vld [vmem:[%s5530_s1 + $0x394] ss:$8 sps:$4 sm:$0xff]   ;;  %v3863_v54 = vld [vmem:[%s5530_s1 + $0x290] ss:$8 sps:$4 sm:$0xff]  }
  0x59   :  { %2505 = vmatprep.subr.bf16.mxu1 %v3816_v55  ;;  %v3866_v55 = vld [vmem:[%s5530_s1 + $0x390] ss:$8 sps:$4 sm:$0xff]  }
  0x5a   :  { %2253 = vmatmul.mubr.bf16.gmra.mxu0 %v3331_v59  ;;  %v3872_v59 = vld [vmem:[%s5530_s1 + $0x380] ss:$8 sps:$4 sm:$0xff]  }
  0x5b   :  { %2354 = vmatmul.mubr.bf16.gmra.mxu1 %v3333_v60  ;;  %2405 = vmatpush1.bf16.msra.mxu0 %v3811_v62  ;;  %v3877_v60 = vld [vmem:[%s5530_s1 + $0x474] ss:$8 sps:$4 sm:$0xff]   ;;  %v3875_v62 = vld [vmem:[%s5530_s1 + $0x470] ss:$8 sps:$4 sm:$0xff]  }
  0x5c   :  { %2506 = vmatpush1.bf16.msra.mxu1 %v3814_v63  ;;  %2406 = vmatprep.subr.bf16.mxu0 %v3819_v0  ;;  %v3878_v63 = vld [vmem:[%s5530_s1 + $0x570] ss:$8 sps:$4 sm:$0xff]  }
  0x5d   :  { %2507 = vmatprep.subr.bf16.mxu1 %v3822_v1  ;;  %2262 = vmatprep.mubr.bf16.mxu0 %v3348_v2  ;;  %v32_v0 = vld [vmem:[%s5531_s0 + $0x90] sm:$0xff]  ;;  %v3287_v1 = vcombine.low %v16_v38, %v24_v39  ;;  %v3289_v2 = vcombine.low %v17_v40, %v25_v43  ;;  %v3907_v38 = vld [vmem:[%s5530_s1 + $0x424] ss:$8 sps:$4 sm:$0xff]   ;;  %v3908_v43 = vld [vmem:[%s5530_s1 + $0x520] ss:$8 sps:$4 sm:$0xff]  }
  0x5e   :  { %2363 = vmatprep.mubr.bf16.mxu1 %v3350_v3  ;;  %v40_v3 = vld [vmem:[%s5531_s0 + $0xd0] sm:$0xff]  ;;  %v3910_v39 = vld [vmem:[%s5530_s1 + $0x524] ss:$8 sps:$4 sm:$0xff]  }
  0x5f   :  { %2407 = vmatpush1.bf16.msra.mxu0 %v3817_v4  ;;  %v33_v4 = vld [vmem:[%s5531_s0 + $0x98] sm:$0xff]  ;;  %v3304_v8 = vcombine.high %v32_v0, %v40_v3 }
  0x60   :  { %2508 = vmatpush1.bf16.msra.mxu1 %v3820_v5  ;;  %2408 = vmatprep.subr.bf16.mxu0 %v3825_v6  ;;  %v41_v5 = vld [vmem:[%s5531_s0 + $0xd8] sm:$0xff]  ;;  %v3883_v6 = vld [vmem:[%s5530_s1 + $0x464] ss:$8 sps:$4 sm:$0xff]  }
  0x61   :  { %2509 = vmatprep.subr.bf16.mxu1 %v3828_v7  ;;  %v3886_v7 = vld [vmem:[%s5530_s1 + $0x564] ss:$8 sps:$4 sm:$0xff]   ;;  %v3306_v9 = vcombine.high %v33_v4, %v41_v5 }
  0x62   :  { %2263 = vmatmul.mubr.bf16.gmra.mxu0 %v3347_v11  ;;  %v3884_v11 = vld [vmem:[%s5530_s1 + $0x560] ss:$8 sps:$4 sm:$0xff]  }
  0x63   :  { %2364 = vmatmul.mubr.bf16.gmra.mxu1 %v3349_v12  ;;  %2409 = vmatpush2.bf16.msra.mxu0 %v3823_v14  ;;  %v3889_v12 = vld [vmem:[%s5530_s1 + $0x454] ss:$8 sps:$4 sm:$0xff]  }
  0x64   :  { %2510 = vmatpush2.bf16.msra.mxu1 %v3826_v15  ;;  %2410 = vmatprep.subr.bf16.mxu0 %v3831_v16  ;;  %v48_v14 = vld [vmem:[%s5531_s0 + $0x110] sm:$0xff] }
  0x65   :  { %2511 = vmatprep.subr.bf16.mxu1 %v3834_v17  ;;  %2272 = vmatprep.mubr.bf16.mxu0 %v3364_v18  ;;  %v3887_v15 = vld [vmem:[%s5530_s1 + $0x450] ss:$8 sps:$4 sm:$0xff]   ;;  %v3303_v17 = vcombine.low %v32_v0, %v40_v3  ;;  %v3305_v18 = vcombine.low %v33_v4, %v41_v5 }
  0x66   :  { %2373 = vmatprep.mubr.bf16.mxu1 %v3366_v19  ;;  %v56_v16 = vld [vmem:[%s5531_s0 + $0x150] sm:$0xff]  ;;  %v49_v19 = vld [vmem:[%s5531_s0 + $0x118] sm:$0xff] }
  0x67   :  { %2411 = vmatpush2.bf16.msra.mxu0 %v3829_v20  ;;  %v57_v20 = vld [vmem:[%s5531_s0 + $0x158] sm:$0xff] }
  0x68   :  { %2512 = vmatpush2.bf16.msra.mxu1 %v3832_v21  ;;  %2412 = vmatprep.subr.bf16.mxu0 %v3837_v22  ;;  %v3890_v21 = vld [vmem:[%s5530_s1 + $0x550] ss:$8 sps:$4 sm:$0xff]   ;;  %v3895_v22 = vld [vmem:[%s5530_s1 + $0x444] ss:$8 sps:$4 sm:$0xff]  }
  0x69   :  { %2513 = vmatprep.subr.bf16.mxu1 %v3840_v23  ;;  %v3898_v23 = vld [vmem:[%s5530_s1 + $0x544] ss:$8 sps:$4 sm:$0xff]   ;;  %v97_v0 = vld [vmem:[%s5531_s0 + $0x298] sm:$0xff] }
  0x6a   :  { %2273 = vmatmul.mubr.bf16.gmra.mxu0 %v3363_v24  ;;  %v3320_v24 = vcombine.high %v48_v14, %v56_v16  ;;  %v105_v3 = vld [vmem:[%s5531_s0 + $0x2d8] sm:$0xff] }
  0x6b   :  { %2374 = vmatmul.mubr.bf16.gmra.mxu1 %v3365_v25  ;;  %2413 = vmatpush2.bf16.msra.mxu0 %v3835_v28  ;;  %v3322_v25 = vcombine.high %v49_v19, %v57_v20  ;;  %v3901_v28 = vld [vmem:[%s5530_s1 + $0x434] ss:$8 sps:$4 sm:$0xff]   ;;  %v3923_v4 = vld [vmem:[%s5530_s1 + $0x4f0] ss:$8 sps:$4 sm:$0xff]  }
  0x6c   :  { %2514 = vmatpush2.bf16.msra.mxu1 %v3838_v29  ;;  %2414 = vmatprep.subr.bf16.mxu0 %v3843_v30  ;;  %v3904_v29 = vld [vmem:[%s5530_s1 + $0x534] ss:$8 sps:$4 sm:$0xff]   ;;  %v3899_v30 = vld [vmem:[%s5530_s1 + $0x430] ss:$8 sps:$4 sm:$0xff]  }
  0x6d   :  { %2515 = vmatprep.subr.bf16.mxu1 %v3846_v31  ;;  %2282 = vmatprep.mubr.bf16.mxu0 %v3380_v32  ;;  %v64_v31 = vld [vmem:[%s5531_s0 + $0x190] sm:$0xff] }
  0x6e   :  { %2383 = vmatprep.mubr.bf16.mxu1 %v3382_v33  ;;  %v72_v32 = vld [vmem:[%s5531_s0 + $0x1d0] sm:$0xff]  ;;  %v3319_v33 = vcombine.low %v48_v14, %v56_v16  ;;  %v3369_v16 = vcombine.low %v97_v0, %v105_v3 }
  0x6f   :  { %2415 = vmatpush2.bf16.msra.mxu0 %v3841_v34  ;;  %v3321_v34 = vcombine.low %v49_v19, %v57_v20  ;;  %v3336_v40 = vcombine.high %v64_v31, %v72_v32  ;;  %v3926_v5 = vld [vmem:[%s5530_s1 + $0x5f0] ss:$8 sps:$4 sm:$0xff]   ;;  %v3943_v20 = vld [vmem:[%s5530_s1 + $0x4c4] ss:$8 sps:$4 sm:$0xff]  }
  0x70   :  { %2516 = vmatpush2.bf16.msra.mxu1 %v3844_v35  ;;  %2416 = vmatprep.subr.bf16.mxu0 %v3849_v36  ;;  %v65_v35 = vld [vmem:[%s5531_s0 + $0x198] sm:$0xff]  ;;  %v112_v14 = vld [vmem:[%s5531_s0 + $0x310] sm:$0xff] }
  0x71   :  { %2517 = vmatprep.subr.bf16.mxu1 %v3852_v37  ;;  %v73_v36 = vld [vmem:[%s5531_s0 + $0x1d8] sm:$0xff] }
  0x72   :  { %2283 = vmatmul.mubr.bf16.gmra.mxu0 %v3379_v41  ;;  %v3902_v37 = vld [vmem:[%s5530_s1 + $0x530] ss:$8 sps:$4 sm:$0xff]   ;;  %v3338_v41 = vcombine.high %v65_v35, %v73_v36 }
  0x73   :  { %2384 = vmatmul.mubr.bf16.gmra.mxu1 %v3381_v42  ;;  %2417 = vmatpush2.bf16.msra.mxu0 %v3847_v44  ;;  %v3905_v42 = vld [vmem:[%s5530_s1 + $0x420] ss:$8 sps:$4 sm:$0xff]   ;;  %v3913_v44 = vld [vmem:[%s5530_s1 + $0x414] ss:$8 sps:$4 sm:$0xff]   ;;  %v3938_v19 = vld [vmem:[%s5530_s1 + $0x5d0] ss:$8 sps:$4 sm:$0xff]  }
  0x74   :  { %2518 = vmatpush2.bf16.msra.mxu1 %v3850_v45  ;;  %2418 = vmatprep.subr.bf16.mxu0 %v3858_v46  ;;  %v3916_v45 = vld [vmem:[%s5530_s1 + $0x514] ss:$8 sps:$4 sm:$0xff]  }
  0x75   :  { %2519 = vmatprep.subr.bf16.mxu1 %v3861_v47  ;;  %2424 = vmatprep.mubr.bf16.mxu0 %v3288_v48  ;;  %v80_v46 = vld [vmem:[%s5531_s0 + $0x210] sm:$0xff]  ;;  %v3335_v48 = vcombine.low %v64_v31, %v72_v32  ;;  %v3383_v31 = vcombine.low %v112_v14, %v112_v14 }
  0x76   :  { %2525 = vmatprep.mubr.bf16.mxu1 %v3290_v49  ;;  %v88_v47 = vld [vmem:[%s5531_s0 + $0x250] sm:$0xff]  ;;  %v3337_v49 = vcombine.low %v65_v35, %v73_v36  ;;  %v27_v35 = vld [vmem:[%s5531_s0 + $0x68] sm:$0xff] }
  0x77   :  { %2419 = vmatpush2.bf16.msra.mxu0 %v3856_v50  ;;  %v81_v50 = vld [vmem:[%s5531_s0 + $0x218] sm:$0xff]  ;;  %v3959_v36 = vld [vmem:[%s5530_s1 + $0x4a4] ss:$8 sps:$4 sm:$0xff]  }
  0x78   :  { %2520 = vmatpush2.bf16.msra.mxu1 %v3859_v51  ;;  %2420 = vmatprep.subr.bf16.mxu0 %v3865_v52  ;;  %v89_v51 = vld [vmem:[%s5531_s0 + $0x258] sm:$0xff] }
  0x79   :  { %2521 = vmatprep.subr.bf16.mxu1 %v3868_v53  ;;  %v3911_v52 = vld [vmem:[%s5530_s1 + $0x410] ss:$8 sps:$4 sm:$0xff]  }
  0x7a   :  { %v3914_v53 = vld [vmem:[%s5530_s1 + $0x510] ss:$8 sps:$4 sm:$0xff]  }
  0x7b   :  { %2421 = vmatpush2.bf16.msra.mxu0 %v3863_v54  ;;  %v3919_v54 = vld [vmem:[%s5530_s1 + $0x404] ss:$8 sps:$4 sm:$0xff]  }
  0x7c   :  { %2522 = vmatpush2.bf16.msra.mxu1 %v3866_v55  ;;  %2422 = vmatprep.subr.bf16.mxu0 %v3871_v56  ;;  %v3922_v55 = vld [vmem:[%s5530_s1 + $0x504] ss:$8 sps:$4 sm:$0xff]   ;;  %v3352_v56 = vcombine.high %v80_v46, %v88_v47 }
  0x7d   :  { %2523 = vmatprep.subr.bf16.mxu1 %v3874_v57  ;;  %v3354_v57 = vcombine.high %v81_v50, %v89_v51 }
  0x7f   :  { %2423 = vmatpush2.bf16.msra.mxu0 %v3869_v58  ;;  %v3917_v58 = vld [vmem:[%s5530_s1 + $0x400] ss:$8 sps:$4 sm:$0xff]  }
  0x80   :  { %2524 = vmatpush2.bf16.msra.mxu1 %v3872_v59  ;;  %2594 = vmatprep.subr.bf16.mxu0 %v3877_v60  ;;  %v3920_v59 = vld [vmem:[%s5530_s1 + $0x500] ss:$8 sps:$4 sm:$0xff]   ;;  %v3925_v60 = vld [vmem:[%s5530_s1 + $0x4f4] ss:$8 sps:$4 sm:$0xff]  }
  0x81   :  { %2695 = vmatprep.subr.bf16.mxu1 %v3880_v61  ;;  %v3928_v61 = vld [vmem:[%s5530_s1 + $0x5f4] ss:$8 sps:$4 sm:$0xff]  }
  0x82   :  { %2425 = vmatmul.mubr.bf16.vlgmr.msra.gmra.mxu0 %v3287_v1  ;;  %v3351_v1 = vcombine.low %v80_v46, %v88_v47  ;;  %v3971_v46 = vld [vmem:[%s5530_s1 + $0x484] ss:$8 sps:$4 sm:$0xff]  }
  0x83   :  { %2526 = vmatmul.mubr.bf16.vlgmr.msra.gmra.mxu1 %v3289_v2  ;;  %2595 = vmatpush1.bf16.msra.mxu0 %v3875_v62  ;;  %v96_v62 = vld [vmem:[%s5531_s0 + $0x290] sm:$0xff]  ;;  %v3353_v2 = vcombine.low %v81_v50, %v89_v51  ;;  %v3974_v47 = vld [vmem:[%s5530_s1 + $0x584] ss:$8 sps:$4 sm:$0xff]  }
  0x84   :  { %2696 = vmatpush1.bf16.msra.mxu1 %v3878_v63  ;;  %2596 = vmatprep.subr.bf16.mxu0 %v3883_v6  ;;  %v104_v63 = vld [vmem:[%s5531_s0 + $0x2d0] sm:$0xff]  ;;  %v3931_v6 = vld [vmem:[%s5530_s1 + $0x4e4] ss:$8 sps:$4 sm:$0xff]  }
  0x85   :  { %2697 = vmatprep.subr.bf16.mxu1 %v3886_v7  ;;  %2434 = vmatprep.mubr.bf16.mxu0 %v3304_v8  ;;  %v3934_v7 = vld [vmem:[%s5530_s1 + $0x5e4] ss:$8 sps:$4 sm:$0xff]   ;;  %v3368_v8 = vcombine.high %v96_v62, %v104_v63  ;;  %v3977_v50 = vld [vmem:[%s5530_s1 + $0x674] ss:$8 sps:$4 sm:$0xff]  }
  0x86   :  { %2535 = vmatprep.mubr.bf16.mxu1 %v3306_v9  ;;  %v3370_v9 = vcombine.high %v97_v0, %v105_v3  ;;  %v3980_v51 = vld [vmem:[%s5530_s1 + $0x774] ss:$8 sps:$4 sm:$0xff]   ;;  %v3981_v0 = vld [vmem:[%s5530_s1 + $0x660] ss:$8 sps:$4 sm:$0xff]  }
  0x87   :  { %2597 = vmatpush1.bf16.msra.mxu0 %v3881_v10  ;;  %v3929_v10 = vld [vmem:[%s5530_s1 + $0x4e0] ss:$8 sps:$4 sm:$0xff]   ;;  %v3992_v3 = vld [vmem:[%s5530_s1 + $0x754] ss:$8 sps:$4 sm:$0xff]  }
  0x88   :  { %2698 = vmatpush1.bf16.msra.mxu1 %v3884_v11  ;;  %2598 = vmatprep.subr.bf16.mxu0 %v3889_v12  ;;  %v3932_v11 = vld [vmem:[%s5530_s1 + $0x5e0] ss:$8 sps:$4 sm:$0xff]   ;;  %v3937_v12 = vld [vmem:[%s5530_s1 + $0x4d4] ss:$8 sps:$4 sm:$0xff]  }
  0x89   :  { %2699 = vmatprep.subr.bf16.mxu1 %v3892_v13  ;;  %v3940_v13 = vld [vmem:[%s5530_s1 + $0x5d4] ss:$8 sps:$4 sm:$0xff]  }
  0x8a   :  { %2435 = vmatmul.mubr.bf16.gmra.mxu0 %v3303_v17  ;;  %v113_v17 = vld [vmem:[%s5531_s0 + $0x318] sm:$0xff] }
  0x8b   :  { %2536 = vmatmul.mubr.bf16.gmra.mxu1 %v3305_v18  ;;  %2599 = vmatpush1.bf16.msra.mxu0 %v3887_v15  ;;  %v3367_v15 = vcombine.low %v96_v62, %v104_v63  ;;  %v3935_v18 = vld [vmem:[%s5530_s1 + $0x4d0] ss:$8 sps:$4 sm:$0xff]   ;;  %v3385_v32 = vcombine.low %v113_v17, %v113_v17 }
  0x8c   :  { %2700 = vmatpush1.bf16.msra.mxu1 %v3890_v21  ;;  %2600 = vmatprep.subr.bf16.mxu0 %v3895_v22  ;;  %v3946_v21 = vld [vmem:[%s5530_s1 + $0x5c4] ss:$8 sps:$4 sm:$0xff]   ;;  %v3384_v22 = vcombine.high %v112_v14, %v112_v14 }
  0x8d   :  { %2701 = vmatprep.subr.bf16.mxu1 %v3898_v23  ;;  %2444 = vmatprep.mubr.bf16.mxu0 %v3320_v24  ;;  %v3386_v23 = vcombine.high %v113_v17, %v113_v17  ;;  %v3941_v24 = vld [vmem:[%s5530_s1 + $0x4c0] ss:$8 sps:$4 sm:$0xff]  }
  0x8e   :  { %2545 = vmatprep.mubr.bf16.mxu1 %v3322_v25  ;;  %v3944_v25 = vld [vmem:[%s5530_s1 + $0x5c0] ss:$8 sps:$4 sm:$0xff]  }
  0x8f   :  { %2601 = vmatpush1.bf16.msra.mxu0 %v3893_v26  ;;  %v3951_v26 = vld [vmem:[%s5530_s1 + $0x4b4] ss:$8 sps:$4 sm:$0xff]   ;;  %v3996_v17 = vld [vmem:[%s5530_s1 + $0x740] ss:$8 sps:$4 sm:$0xff]  }
  0x90   :  { %2702 = vmatpush1.bf16.msra.mxu1 %v3896_v27  ;;  %2602 = vmatprep.subr.bf16.mxu0 %v3901_v28  ;;  %v3954_v27 = vld [vmem:[%s5530_s1 + $0x5b4] ss:$8 sps:$4 sm:$0xff]   ;;  %v3949_v28 = vld [vmem:[%s5530_s1 + $0x4b0] ss:$8 sps:$4 sm:$0xff]  }
  0x91   :  { %2703 = vmatprep.subr.bf16.mxu1 %v3904_v29  ;;  %v3952_v29 = vld [vmem:[%s5530_s1 + $0x5b0] ss:$8 sps:$4 sm:$0xff]  }
  0x92   :  { %2445 = vmatmul.mubr.bf16.gmra.mxu0 %v3319_v33  ;;  %v26_v33 = vld [vmem:[%s5531_s0 + $0x60] sm:$0xff] }
  0x93   :  { %2546 = vmatmul.mubr.bf16.gmra.mxu1 %v3321_v34  ;;  %2603 = vmatpush1.bf16.msra.mxu0 %v3899_v30  ;;  %v18_v30 = vld [vmem:[%s5531_s0 + $0x20] sm:$0xff]  ;;  %v19_v34 = vld [vmem:[%s5531_s0 + $0x28] sm:$0xff] }
  0x94   :  { %2704 = vmatpush1.bf16.msra.mxu1 %v3902_v37  ;;  %2604 = vmatprep.subr.bf16.mxu0 %v3907_v38  ;;  %v3962_v37 = vld [vmem:[%s5530_s1 + $0x5a4] ss:$8 sps:$4 sm:$0xff]   ;;  %v3292_v38 = vcombine.high %v18_v30, %v26_v33 }
  0x95   :  { %2705 = vmatprep.subr.bf16.mxu1 %v3910_v39  ;;  %2454 = vmatprep.mubr.bf16.mxu0 %v3336_v40  ;;  %v3294_v39 = vcombine.high %v19_v34, %v27_v35  ;;  %v3957_v40 = vld [vmem:[%s5530_s1 + $0x4a0] ss:$8 sps:$4 sm:$0xff]  }
  0x96   :  { %2555 = vmatprep.mubr.bf16.mxu1 %v3338_v41  ;;  %v3960_v41 = vld [vmem:[%s5530_s1 + $0x5a0] ss:$8 sps:$4 sm:$0xff]  }
  0x97   :  { %2605 = vmatpush1.bf16.msra.mxu0 %v3905_v42  ;;  %v3965_v42 = vld [vmem:[%s5530_s1 + $0x494] ss:$8 sps:$4 sm:$0xff]  }
  0x98   :  { %2706 = vmatpush1.bf16.msra.mxu1 %v3908_v43  ;;  %2606 = vmatprep.subr.bf16.mxu0 %v3913_v44  ;;  %v3968_v43 = vld [vmem:[%s5530_s1 + $0x594] ss:$8 sps:$4 sm:$0xff]   ;;  %v3963_v44 = vld [vmem:[%s5530_s1 + $0x490] ss:$8 sps:$4 sm:$0xff]  }
  0x99   :  { %2707 = vmatprep.subr.bf16.mxu1 %v3916_v45  ;;  %v3966_v45 = vld [vmem:[%s5530_s1 + $0x590] ss:$8 sps:$4 sm:$0xff]  }
  0x9a   :  { %2455 = vmatmul.mubr.bf16.gmra.mxu0 %v3335_v48  ;;  %v3969_v48 = vld [vmem:[%s5530_s1 + $0x480] ss:$8 sps:$4 sm:$0xff]  }
  0x9b   :  { %2556 = vmatmul.mubr.bf16.gmra.mxu1 %v3337_v49  ;;  %2607 = vmatpush1.bf16.msra.mxu0 %v3911_v52  ;;  %v3972_v49 = vld [vmem:[%s5530_s1 + $0x580] ss:$8 sps:$4 sm:$0xff]  }
  0x9c   :  { %2708 = vmatpush1.bf16.msra.mxu1 %v3914_v53  ;;  %2608 = vmatprep.subr.bf16.mxu0 %v3919_v54  ;;  %v34_v52 = vld [vmem:[%s5531_s0 + $0xa0] sm:$0xff]  ;;  %v35_v54 = vld [vmem:[%s5531_s0 + $0xa8] sm:$0xff] }
  0x9d   :  { %2709 = vmatprep.subr.bf16.mxu1 %v3922_v55  ;;  %2464 = vmatprep.mubr.bf16.mxu0 %v3352_v56  ;;  %v42_v53 = vld [vmem:[%s5531_s0 + $0xe0] sm:$0xff]  ;;  %v3291_v55 = vcombine.low %v18_v30, %v26_v33  ;;  %v3293_v56 = vcombine.low %v19_v34, %v27_v35  ;;  %v4013_v34 = vld [vmem:[%s5530_s1 + $0x614] ss:$8 sps:$4 sm:$0xff]  }
  0x9e   :  { %2565 = vmatprep.mubr.bf16.mxu1 %v3354_v57  ;;  %v43_v57 = vld [vmem:[%s5531_s0 + $0xe8] sm:$0xff]  ;;  %v3308_v62 = vcombine.high %v34_v52, %v42_v53  ;;  %v4016_v35 = vld [vmem:[%s5530_s1 + $0x714] ss:$8 sps:$4 sm:$0xff]  }
  0x9f   :  { %2609 = vmatpush1.bf16.msra.mxu0 %v3917_v58  ;;  %v3975_v58 = vld [vmem:[%s5530_s1 + $0x670] ss:$8 sps:$4 sm:$0xff]   ;;  %v3310_v63 = vcombine.high %v35_v54, %v43_v57  ;;  %v4008_v33 = vld [vmem:[%s5530_s1 + $0x720] ss:$8 sps:$4 sm:$0xff]  }
  0xa0   :  { %2710 = vmatpush1.bf16.msra.mxu1 %v3920_v59  ;;  %2610 = vmatprep.subr.bf16.mxu0 %v3925_v60  ;;  %v3978_v59 = vld [vmem:[%s5530_s1 + $0x770] ss:$8 sps:$4 sm:$0xff]   ;;  %v3983_v60 = vld [vmem:[%s5530_s1 + $0x664] ss:$8 sps:$4 sm:$0xff]  }
  0xa1   :  { %2711 = vmatprep.subr.bf16.mxu1 %v3928_v61  ;;  %v3986_v61 = vld [vmem:[%s5530_s1 + $0x764] ss:$8 sps:$4 sm:$0xff]  }
  0xa2   :  { %2465 = vmatmul.mubr.bf16.gmra.mxu0 %v3351_v1  ;;  %v3984_v1 = vld [vmem:[%s5530_s1 + $0x760] ss:$8 sps:$4 sm:$0xff]  }
  0xa3   :  { %2566 = vmatmul.mubr.bf16.gmra.mxu1 %v3353_v2  ;;  %2611 = vmatpush2.bf16.msra.mxu0 %v3923_v4  ;;  %v3989_v2 = vld [vmem:[%s5530_s1 + $0x654] ss:$8 sps:$4 sm:$0xff]   ;;  %v50_v4 = vld [vmem:[%s5531_s0 + $0x120] sm:$0xff] }
  0xa4   :  { %2712 = vmatpush2.bf16.msra.mxu1 %v3926_v5  ;;  %2612 = vmatprep.subr.bf16.mxu0 %v3931_v6  ;;  %v3307_v5 = vcombine.low %v34_v52, %v42_v53  ;;  %v3309_v6 = vcombine.low %v35_v54, %v43_v57  ;;  %v98_v52 = vld [vmem:[%s5531_s0 + $0x2a0] sm:$0xff]  ;;  %v107_v57 = vld [vmem:[%s5531_s0 + $0x2e8] sm:$0xff] }
  0xa5   :  { %2713 = vmatprep.subr.bf16.mxu1 %v3934_v7  ;;  %2474 = vmatprep.mubr.bf16.mxu0 %v3368_v8  ;;  %v58_v7 = vld [vmem:[%s5531_s0 + $0x160] sm:$0xff]  ;;  %v51_v8 = vld [vmem:[%s5531_s0 + $0x128] sm:$0xff] }
  0xa6   :  { %2575 = vmatprep.mubr.bf16.mxu1 %v3370_v9  ;;  %v59_v9 = vld [vmem:[%s5531_s0 + $0x168] sm:$0xff]  ;;  %v3324_v14 = vcombine.high %v50_v4, %v58_v7 }
  0xa7   :  { %2613 = vmatpush2.bf16.msra.mxu0 %v3929_v10  ;;  %v3987_v10 = vld [vmem:[%s5530_s1 + $0x650] ss:$8 sps:$4 sm:$0xff]  }
  0xa8   :  { %2714 = vmatpush2.bf16.msra.mxu1 %v3932_v11  ;;  %2614 = vmatprep.subr.bf16.mxu0 %v3937_v12  ;;  %v3990_v11 = vld [vmem:[%s5530_s1 + $0x750] ss:$8 sps:$4 sm:$0xff]   ;;  %v3995_v12 = vld [vmem:[%s5530_s1 + $0x644] ss:$8 sps:$4 sm:$0xff]  }
  0xa9   :  { %2715 = vmatprep.subr.bf16.mxu1 %v3940_v13  ;;  %v3998_v13 = vld [vmem:[%s5530_s1 + $0x744] ss:$8 sps:$4 sm:$0xff]  }
  0xaa   :  { %2475 = vmatmul.mubr.bf16.gmra.mxu0 %v3367_v15  ;;  %v3326_v15 = vcombine.high %v51_v8, %v59_v9 }
  0xab   :  { %2576 = vmatmul.mubr.bf16.gmra.mxu1 %v3369_v16  ;;  %2615 = vmatpush2.bf16.msra.mxu0 %v3935_v18  ;;  %v3993_v16 = vld [vmem:[%s5530_s1 + $0x640] ss:$8 sps:$4 sm:$0xff]   ;;  %v4001_v18 = vld [vmem:[%s5530_s1 + $0x634] ss:$8 sps:$4 sm:$0xff]  }
  0xac   :  { %2716 = vmatpush2.bf16.msra.mxu1 %v3938_v19  ;;  %2616 = vmatprep.subr.bf16.mxu0 %v3943_v20  ;;  %v4004_v19 = vld [vmem:[%s5530_s1 + $0x734] ss:$8 sps:$4 sm:$0xff]   ;;  %v66_v20 = vld [vmem:[%s5531_s0 + $0x1a0] sm:$0xff] }
  0xad   :  { %2717 = vmatprep.subr.bf16.mxu1 %v3946_v21  ;;  %2484 = vmatprep.mubr.bf16.mxu0 %v3384_v22  ;;  %v3323_v21 = vcombine.low %v50_v4, %v58_v7  ;;  %v3325_v22 = vcombine.low %v51_v8, %v59_v9  ;;  %v115_v7 = vld [vmem:[%s5531_s0 + $0x328] sm:$0xff]  ;;  %v4035_v8 = vld [vmem:[%s5530_s1 + $0x6d0] ss:$8 sps:$4 sm:$0xff]  }
  0xae   :  { %2585 = vmatprep.mubr.bf16.mxu1 %v3386_v23  ;;  %v74_v23 = vld [vmem:[%s5531_s0 + $0x1e0] sm:$0xff]  ;;  %v4038_v9 = vld [vmem:[%s5530_s1 + $0x7d0] ss:$8 sps:$4 sm:$0xff]  }
  0xaf   :  { %2617 = vmatpush2.bf16.msra.mxu0 %v3941_v24  ;;  %v67_v24 = vld [vmem:[%s5531_s0 + $0x1a8] sm:$0xff]  ;;  %v3340_v30 = vcombine.high %v66_v20, %v74_v23 }
  0xb0   :  { %2718 = vmatpush2.bf16.msra.mxu1 %v3944_v25  ;;  %2618 = vmatprep.subr.bf16.mxu0 %v3951_v26  ;;  %v75_v25 = vld [vmem:[%s5531_s0 + $0x1e8] sm:$0xff]  ;;  %v3999_v26 = vld [vmem:[%s5530_s1 + $0x630] ss:$8 sps:$4 sm:$0xff]  }
  0xb1   :  { %2719 = vmatprep.subr.bf16.mxu1 %v3954_v27  ;;  %v4002_v27 = vld [vmem:[%s5530_s1 + $0x730] ss:$8 sps:$4 sm:$0xff]  }
  0xb2   :  { %2485 = vmatmul.mubr.bf16.gmra.mxu0 %v3383_v31  ;;  %v3342_v31 = vcombine.high %v67_v24, %v75_v25 }
  0xb3   :  { %2586 = vmatmul.mubr.bf16.gmra.mxu1 %v3385_v32  ;;  %2619 = vmatpush2.bf16.msra.mxu0 %v3949_v28  ;;  %v4007_v28 = vld [vmem:[%s5530_s1 + $0x624] ss:$8 sps:$4 sm:$0xff]   ;;  %v4005_v32 = vld [vmem:[%s5530_s1 + $0x620] ss:$8 sps:$4 sm:$0xff]  }
  0xb4   :  { %2720 = vmatpush2.bf16.msra.mxu1 %v3952_v29  ;;  %2620 = vmatprep.subr.bf16.mxu0 %v3959_v36  ;;  %v4010_v29 = vld [vmem:[%s5530_s1 + $0x724] ss:$8 sps:$4 sm:$0xff]  }
  0xb5   :  { %2721 = vmatprep.subr.bf16.mxu1 %v3962_v37  ;;  %2626 = vmatprep.mubr.bf16.mxu0 %v3292_v38  ;;  %v82_v36 = vld [vmem:[%s5531_s0 + $0x220] sm:$0xff]  ;;  %v3339_v37 = vcombine.low %v66_v20, %v74_v23  ;;  %v3341_v38 = vcombine.low %v67_v24, %v75_v25  ;;  %v3389_v20 = vcombine.low %v115_v7, %v115_v7  ;;  %v29_v23 = vld [vmem:[%s5531_s0 + $0x78] sm:$0xff] }
  0xb6   :  { %2727 = vmatprep.mubr.bf16.mxu1 %v3294_v39  ;;  %v90_v39 = vld [vmem:[%s5531_s0 + $0x260] sm:$0xff]  ;;  %v4049_v24 = vld [vmem:[%s5530_s1 + $0x6b0] ss:$8 sps:$4 sm:$0xff]  }
  0xb7   :  { %2621 = vmatpush2.bf16.msra.mxu0 %v3957_v40  ;;  %v83_v40 = vld [vmem:[%s5531_s0 + $0x228] sm:$0xff]  ;;  %v3355_v53 = vcombine.low %v82_v36, %v90_v39  ;;  %v4052_v25 = vld [vmem:[%s5530_s1 + $0x7b0] ss:$8 sps:$4 sm:$0xff]  }
  0xb8   :  { %2722 = vmatpush2.bf16.msra.mxu1 %v3960_v41  ;;  %2622 = vmatprep.subr.bf16.mxu0 %v3965_v42  ;;  %v91_v41 = vld [vmem:[%s5531_s0 + $0x268] sm:$0xff]  ;;  %v4011_v42 = vld [vmem:[%s5530_s1 + $0x610] ss:$8 sps:$4 sm:$0xff]  }
  0xb9   :  { %2723 = vmatprep.subr.bf16.mxu1 %v3968_v43  ;;  %v4014_v43 = vld [vmem:[%s5530_s1 + $0x710] ss:$8 sps:$4 sm:$0xff]   ;;  %v3357_v54 = vcombine.low %v83_v40, %v91_v41 }
  0xbb   :  { %2623 = vmatpush2.bf16.msra.mxu0 %v3963_v44  ;;  %v4019_v44 = vld [vmem:[%s5530_s1 + $0x604] ss:$8 sps:$4 sm:$0xff]  }
  0xbc   :  { %2724 = vmatpush2.bf16.msra.mxu1 %v3966_v45  ;;  %2624 = vmatprep.subr.bf16.mxu0 %v3971_v46  ;;  %v4022_v45 = vld [vmem:[%s5530_s1 + $0x704] ss:$8 sps:$4 sm:$0xff]   ;;  %v3356_v46 = vcombine.high %v82_v36, %v90_v39  ;;  %v4072_v39 = vld [vmem:[%s5530_s1 + $0x780] ss:$8 sps:$4 sm:$0xff]  }
  0xbd   :  { %2725 = vmatprep.subr.bf16.mxu1 %v3974_v47  ;;  %v3358_v47 = vcombine.high %v83_v40, %v91_v41  ;;  %v4071_v36 = vld [vmem:[%s5530_s1 + $0x684] ss:$8 sps:$4 sm:$0xff]   ;;  %v36_v40 = vld [vmem:[%s5531_s0 + $0xb0] sm:$0xff] }
  0xbe   :  { %v44_v41 = vld [vmem:[%s5531_s0 + $0xf0] sm:$0xff] }
  0xbf   :  { %2625 = vmatpush2.bf16.msra.mxu0 %v3969_v48  ;;  %v4017_v48 = vld [vmem:[%s5530_s1 + $0x600] ss:$8 sps:$4 sm:$0xff]  }
  0xc0   :  { %2726 = vmatpush2.bf16.msra.mxu1 %v3972_v49  ;;  %2796 = vmatprep.subr.bf16.mxu0 %v3977_v50  ;;  %v4020_v49 = vld [vmem:[%s5530_s1 + $0x700] ss:$8 sps:$4 sm:$0xff]   ;;  %v4025_v50 = vld [vmem:[%s5530_s1 + $0x6f4] ss:$8 sps:$4 sm:$0xff]  }
  0xc1   :  { %2897 = vmatprep.subr.bf16.mxu1 %v3980_v51  ;;  %v4028_v51 = vld [vmem:[%s5530_s1 + $0x7f4] ss:$8 sps:$4 sm:$0xff]  }
  0xc2   :  { %2627 = vmatmul.mubr.bf16.vlgmr.msra.gmra.mxu0 %v3291_v55  ;;  %v106_v55 = vld [vmem:[%s5531_s0 + $0x2e0] sm:$0xff] }
  0xc3   :  { %2728 = vmatmul.mubr.bf16.vlgmr.msra.gmra.mxu1 %v3293_v56  ;;  %2797 = vmatpush1.bf16.msra.mxu0 %v3975_v58  ;;  %v99_v56 = vld [vmem:[%s5531_s0 + $0x2a8] sm:$0xff]  ;;  %v4023_v58 = vld [vmem:[%s5530_s1 + $0x6f0] ss:$8 sps:$4 sm:$0xff]   ;;  %v3371_v4 = vcombine.low %v98_v52, %v106_v55 }
  0xc4   :  { %2898 = vmatpush1.bf16.msra.mxu1 %v3978_v59  ;;  %2798 = vmatprep.subr.bf16.mxu0 %v3983_v60  ;;  %v4026_v59 = vld [vmem:[%s5530_s1 + $0x7f0] ss:$8 sps:$4 sm:$0xff]   ;;  %v4031_v60 = vld [vmem:[%s5530_s1 + $0x6e4] ss:$8 sps:$4 sm:$0xff]  }
  0xc5   :  { %2899 = vmatprep.subr.bf16.mxu1 %v3986_v61  ;;  %2636 = vmatprep.mubr.bf16.mxu0 %v3308_v62  ;;  %v4034_v61 = vld [vmem:[%s5530_s1 + $0x7e4] ss:$8 sps:$4 sm:$0xff]   ;;  %v3372_v62 = vcombine.high %v98_v52, %v106_v55  ;;  %v53_v55 = vld [vmem:[%s5531_s0 + $0x138] sm:$0xff] }
  0xc6   :  { %2737 = vmatprep.mubr.bf16.mxu1 %v3310_v63  ;;  %v3374_v63 = vcombine.high %v99_v56, %v107_v57 }
  0xc7   :  { %2799 = vmatpush1.bf16.msra.mxu0 %v3981_v0  ;;  %v4029_v0 = vld [vmem:[%s5530_s1 + $0x6e0] ss:$8 sps:$4 sm:$0xff]  }
  0xc8   :  { %2900 = vmatpush1.bf16.msra.mxu1 %v3984_v1  ;;  %2800 = vmatprep.subr.bf16.mxu0 %v3989_v2  ;;  %v4032_v1 = vld [vmem:[%s5530_s1 + $0x7e0] ss:$8 sps:$4 sm:$0xff]   ;;  %v4037_v2 = vld [vmem:[%s5530_s1 + $0x6d4] ss:$8 sps:$4 sm:$0xff]  }
  0xc9   :  { %2901 = vmatprep.subr.bf16.mxu1 %v3992_v3  ;;  %v4040_v3 = vld [vmem:[%s5530_s1 + $0x7d4] ss:$8 sps:$4 sm:$0xff]  }
  0xca   :  { %2637 = vmatmul.mubr.bf16.gmra.mxu0 %v3307_v5  ;;  %v3373_v5 = vcombine.low %v99_v56, %v107_v57  ;;  %v61_v56 = vld [vmem:[%s5531_s0 + $0x178] sm:$0xff] }
  0xcb   :  { %2738 = vmatmul.mubr.bf16.gmra.mxu1 %v3309_v6  ;;  %2801 = vmatpush1.bf16.msra.mxu0 %v3987_v10  ;;  %v114_v6 = vld [vmem:[%s5531_s0 + $0x320] sm:$0xff] }
  0xcc   :  { %2902 = vmatpush1.bf16.msra.mxu1 %v3990_v11  ;;  %2802 = vmatprep.subr.bf16.mxu0 %v3995_v12  ;;  %v4043_v10 = vld [vmem:[%s5530_s1 + $0x6c4] ss:$8 sps:$4 sm:$0xff]   ;;  %v3388_v12 = vcombine.high %v114_v6, %v114_v6 }
  0xcd   :  { %2903 = vmatprep.subr.bf16.mxu1 %v3998_v13  ;;  %2646 = vmatprep.mubr.bf16.mxu0 %v3324_v14  ;;  %v4046_v11 = vld [vmem:[%s5530_s1 + $0x7c4] ss:$8 sps:$4 sm:$0xff]   ;;  %v3390_v13 = vcombine.high %v115_v7, %v115_v7  ;;  %v4041_v14 = vld [vmem:[%s5530_s1 + $0x6c0] ss:$8 sps:$4 sm:$0xff]   ;;  %v68_v7 = vld [vmem:[%s5531_s0 + $0x1b0] sm:$0xff] }
  0xce   :  { %2747 = vmatprep.mubr.bf16.mxu1 %v3326_v15  ;;  %v4044_v15 = vld [vmem:[%s5530_s1 + $0x7c0] ss:$8 sps:$4 sm:$0xff]  }
  0xcf   :  { %2803 = vmatpush1.bf16.msra.mxu0 %v3993_v16  ;;  %v4051_v16 = vld [vmem:[%s5530_s1 + $0x6b4] ss:$8 sps:$4 sm:$0xff]  }
  0xd0   :  { %2904 = vmatpush1.bf16.msra.mxu1 %v3996_v17  ;;  %2804 = vmatprep.subr.bf16.mxu0 %v4001_v18  ;;  %v4054_v17 = vld [vmem:[%s5530_s1 + $0x7b4] ss:$8 sps:$4 sm:$0xff]  }
  0xd1   :  { %2905 = vmatprep.subr.bf16.mxu1 %v4004_v19  ;;  %v20_v18 = vld [vmem:[%s5531_s0 + $0x30] sm:$0xff]  ;;  %v3387_v19 = vcombine.low %v114_v6, %v114_v6 }
  0xd2   :  { %2647 = vmatmul.mubr.bf16.gmra.mxu0 %v3323_v21  ;;  %v28_v21 = vld [vmem:[%s5531_s0 + $0x70] sm:$0xff] }
  0xd3   :  { %2748 = vmatmul.mubr.bf16.gmra.mxu1 %v3325_v22  ;;  %2805 = vmatpush1.bf16.msra.mxu0 %v3999_v26  ;;  %v21_v22 = vld [vmem:[%s5531_s0 + $0x38] sm:$0xff]  ;;  %v4059_v26 = vld [vmem:[%s5530_s1 + $0x6a4] ss:$8 sps:$4 sm:$0xff]  }
  0xd4   :  { %2906 = vmatpush1.bf16.msra.mxu1 %v4002_v27  ;;  %2806 = vmatprep.subr.bf16.mxu0 %v4007_v28  ;;  %v4062_v27 = vld [vmem:[%s5530_s1 + $0x7a4] ss:$8 sps:$4 sm:$0xff]   ;;  %v3296_v28 = vcombine.high %v20_v18, %v28_v21 }
  0xd5   :  { %2907 = vmatprep.subr.bf16.mxu1 %v4010_v29  ;;  %2656 = vmatprep.mubr.bf16.mxu0 %v3340_v30  ;;  %v3298_v29 = vcombine.high %v21_v22, %v29_v23  ;;  %v4057_v30 = vld [vmem:[%s5530_s1 + $0x6a0] ss:$8 sps:$4 sm:$0xff]  }
  0xd6   :  { %2757 = vmatprep.mubr.bf16.mxu1 %v3342_v31  ;;  %v4060_v31 = vld [vmem:[%s5530_s1 + $0x7a0] ss:$8 sps:$4 sm:$0xff]  }
  0xd7   :  { %2807 = vmatpush1.bf16.msra.mxu0 %v4005_v32  ;;  %v4065_v32 = vld [vmem:[%s5530_s1 + $0x694] ss:$8 sps:$4 sm:$0xff]  }
  0xd8   :  { %2908 = vmatpush1.bf16.msra.mxu1 %v4008_v33  ;;  %2808 = vmatprep.subr.bf16.mxu0 %v4013_v34  ;;  %v4068_v33 = vld [vmem:[%s5530_s1 + $0x794] ss:$8 sps:$4 sm:$0xff]   ;;  %v4063_v34 = vld [vmem:[%s5530_s1 + $0x690] ss:$8 sps:$4 sm:$0xff]  }
  0xd9   :  { %2909 = vmatprep.subr.bf16.mxu1 %v4016_v35  ;;  %v4066_v35 = vld [vmem:[%s5530_s1 + $0x790] ss:$8 sps:$4 sm:$0xff]  }
  0xda   :  { %2657 = vmatmul.mubr.bf16.gmra.mxu0 %v3339_v37  ;;  %v4074_v37 = vld [vmem:[%s5530_s1 + $0x784] ss:$8 sps:$4 sm:$0xff]  }
  0xdb   :  { %2758 = vmatmul.mubr.bf16.gmra.mxu1 %v3341_v38  ;;  %2809 = vmatpush1.bf16.msra.mxu0 %v4011_v42  ;;  %v4069_v38 = vld [vmem:[%s5530_s1 + $0x680] ss:$8 sps:$4 sm:$0xff]   ;;  %v37_v42 = vld [vmem:[%s5531_s0 + $0xb8] sm:$0xff] }
  0xdc   :  { %2910 = vmatpush1.bf16.msra.mxu1 %v4014_v43  ;;  %2810 = vmatprep.subr.bf16.mxu0 %v4019_v44  ;;  %v45_v43 = vld [vmem:[%s5531_s0 + $0xf8] sm:$0xff]  ;;  %v3295_v44 = vcombine.low %v20_v18, %v28_v21 }
  0xdd   :  { %2911 = vmatprep.subr.bf16.mxu1 %v4022_v45  ;;  %2666 = vmatprep.mubr.bf16.mxu0 %v3356_v46  ;;  %v3297_v45 = vcombine.low %v21_v22, %v29_v23  ;;  %v3312_v46 = vcombine.high %v36_v40, %v44_v41 }
  0xde   :  { %2767 = vmatprep.mubr.bf16.mxu1 %v3358_v47  ;;  %v3314_v47 = vcombine.high %v37_v42, %v45_v43 }
  0xdf   :  { %2811 = vmatpush1.bf16.msra.mxu0 %v4017_v48 }
  0xe0   :  { %2912 = vmatpush1.bf16.msra.mxu1 %v4020_v49  ;;  %2812 = vmatprep.subr.bf16.mxu0 %v4025_v50 }
  0xe1   :  { %2913 = vmatprep.subr.bf16.mxu1 %v4028_v51  ;;  %v52_v51 = vld [vmem:[%s5531_s0 + $0x130] sm:$0xff] }
  0xe2   :  { %2667 = vmatmul.mubr.bf16.gmra.mxu0 %v3355_v53 }
  0xe3   :  { %2768 = vmatmul.mubr.bf16.gmra.mxu1 %v3357_v54  ;;  %2813 = vmatpush2.bf16.msra.mxu0 %v4023_v58  ;;  %v60_v54 = vld [vmem:[%s5531_s0 + $0x170] sm:$0xff] }
  0xe4   :  { %2914 = vmatpush2.bf16.msra.mxu1 %v4026_v59  ;;  %2814 = vmatprep.subr.bf16.mxu0 %v4031_v60  ;;  %v3311_v60 = vcombine.low %v36_v40, %v44_v41 }
  0xe5   :  { %2915 = vmatprep.subr.bf16.mxu1 %v4034_v61  ;;  %2676 = vmatprep.mubr.bf16.mxu0 %v3372_v62  ;;  %v3313_v61 = vcombine.low %v37_v42, %v45_v43 }
  0xe6   :  { %2777 = vmatprep.mubr.bf16.mxu1 %v3374_v63  ;;  %v3328_v63 = vcombine.high %v52_v51, %v60_v54 }
  0xe7   :  { %2815 = vmatpush2.bf16.msra.mxu0 %v4029_v0  ;;  %v3330_v0 = vcombine.high %v53_v55, %v61_v56 }
  0xe8   :  { %2916 = vmatpush2.bf16.msra.mxu1 %v4032_v1  ;;  %2816 = vmatprep.subr.bf16.mxu0 %v4037_v2 }
  0xe9   :  { %2917 = vmatprep.subr.bf16.mxu1 %v4040_v3 }
  0xea   :  { %2677 = vmatmul.mubr.bf16.gmra.mxu0 %v3371_v4 }
  0xeb   :  { %2778 = vmatmul.mubr.bf16.gmra.mxu1 %v3373_v5  ;;  %2817 = vmatpush2.bf16.msra.mxu0 %v4035_v8 }
  0xec   :  { %2918 = vmatpush2.bf16.msra.mxu1 %v4038_v9  ;;  %2818 = vmatprep.subr.bf16.mxu0 %v4043_v10  ;;  %v76_v10 = vld [vmem:[%s5531_s0 + $0x1f0] sm:$0xff] }
  0xed   :  { %2919 = vmatprep.subr.bf16.mxu1 %v4046_v11  ;;  %2686 = vmatprep.mubr.bf16.mxu0 %v3388_v12  ;;  %v69_v11 = vld [vmem:[%s5531_s0 + $0x1b8] sm:$0xff] }
  0xee   :  { %2787 = vmatprep.mubr.bf16.mxu1 %v3390_v13  ;;  %v77_v12 = vld [vmem:[%s5531_s0 + $0x1f8] sm:$0xff] }
  0xef   :  { %2819 = vmatpush2.bf16.msra.mxu0 %v4041_v14 }
  0xf0   :  { %2920 = vmatpush2.bf16.msra.mxu1 %v4044_v15  ;;  %2820 = vmatprep.subr.bf16.mxu0 %v4051_v16  ;;  %v3327_v16 = vcombine.low %v52_v51, %v60_v54  ;;  %v108_v51 = vld [vmem:[%s5531_s0 + $0x2f0] sm:$0xff] }
  0xf1   :  { %2921 = vmatprep.subr.bf16.mxu1 %v4054_v17  ;;  %v3329_v17 = vcombine.low %v53_v55, %v61_v56 }
  0xf2   :  { %2687 = vmatmul.mubr.bf16.gmra.mxu0 %v3387_v19  ;;  %v3344_v19 = vcombine.high %v68_v7, %v76_v10 }
  0xf3   :  { %2788 = vmatmul.mubr.bf16.gmra.mxu1 %v3389_v20  ;;  %2821 = vmatpush2.bf16.msra.mxu0 %v4049_v24  ;;  %v3346_v20 = vcombine.high %v69_v11, %v77_v12 }
  0xf4   :  { %2922 = vmatpush2.bf16.msra.mxu1 %v4052_v25  ;;  %2822 = vmatprep.subr.bf16.mxu0 %v4059_v26 }
  0xf5   :  { %2923 = vmatprep.subr.bf16.mxu1 %v4062_v27  ;;  %2828 = vmatprep.mubr.bf16.mxu0 %v3296_v28  ;;  %v84_v27 = vld [vmem:[%s5531_s0 + $0x230] sm:$0xff] }
  0xf6   :  { %2929 = vmatprep.mubr.bf16.mxu1 %v3298_v29 }
  0xf7   :  { %2823 = vmatpush2.bf16.msra.mxu0 %v4057_v30  ;;  %v92_v30 = vld [vmem:[%s5531_s0 + $0x270] sm:$0xff] }
  0xf8   :  { %2924 = vmatpush2.bf16.msra.mxu1 %v4060_v31  ;;  %2824 = vmatprep.subr.bf16.mxu0 %v4065_v32  ;;  %v85_v31 = vld [vmem:[%s5531_s0 + $0x238] sm:$0xff] }
  0xf9   :  { %2925 = vmatprep.subr.bf16.mxu1 %v4068_v33  ;;  %v93_v32 = vld [vmem:[%s5531_s0 + $0x278] sm:$0xff] }
  0xfa   :  { %v3362_v40 = vcombine.high %v85_v31, %v93_v32 }
  0xfb   :  { %2825 = vmatpush2.bf16.msra.mxu0 %v4063_v34 }
  0xfc   :  { %2926 = vmatpush2.bf16.msra.mxu1 %v4066_v35  ;;  %2826 = vmatprep.subr.bf16.mxu0 %v4071_v36  ;;  %v3343_v36 = vcombine.low %v68_v7, %v76_v10  ;;  %v116_v10 = vld [vmem:[%s5531_s0 + $0x330] sm:$0xff] }
  0xfd   :  { %2927 = vmatprep.subr.bf16.mxu1 %v4074_v37  ;;  %v3345_v37 = vcombine.low %v69_v11, %v77_v12  ;;  %v117_v11 = vld [vmem:[%s5531_s0 + $0x338] sm:$0xff] }
  0xff   :  { %2827 = vmatpush2.bf16.msra.mxu0 %v4069_v38 }
 0x100   :  { %2928 = vmatpush2.bf16.msra.mxu1 %v4072_v39  ;;  %v3360_v39 = vcombine.high %v84_v27, %v92_v30 }
 0x102   :  { %v2224_v48 = vpop.f32.mrf.mxu0  ;;  %2829 = vmatmul.mubr.bf16.vlgmr.msra.gmra.mxu0 %v3295_v44 }
 0x103   :  { %v2325_v49 = vpop.f32.mrf.mxu1  ;;  %2930 = vmatmul.mubr.bf16.vlgmr.msra.gmra.mxu1 %v3297_v45  ;;  %2838 = vmatprep.mubr.bf16.mxu0 %v3312_v46 }
 0x104   :  { %v5132_v50 = vadd.f32 %v2325_v49, %v2224_v48  ;;  %2939 = vmatprep.mubr.bf16.mxu1 %v3314_v47  ;;  %v2226_v52 = vpop.f32.mrf.mxu0  ;;  %v100_v47 = vld [vmem:[%s5531_s0 + $0x2b0] sm:$0xff] }
 0x105   :  { %v2327_v53 = vpop.f32.mrf.mxu1 }
 0x106   :  { %v5146_v57 = vadd.f32 %v2327_v53, %v2226_v52  ;;  %v2228_v58 = vpop.f32.mrf.mxu0  ;;  %v101_v52 = vld [vmem:[%s5531_s0 + $0x2b8] sm:$0xff] }
 0x107   :  { %v2329_v59 = vpop.f32.mrf.mxu1  ;;  %v109_v53 = vld [vmem:[%s5531_s0 + $0x2f8] sm:$0xff] }
 0x108   :  { %v5148_v62 = vadd.f32 %v2329_v59, %v2228_v58  ;;  %v2230_v1 = vpop.f32.mrf.mxu0  ;;  %v3359_v58 = vcombine.low %v84_v27, %v92_v30  ;;  %v3361_v59 = vcombine.low %v85_v31, %v93_v32 }
 0x109   :  { %v2331_v2 = vpop.f32.mrf.mxu1 }
 0x10a   :  { %v5150_v3 = vadd.f32 %v2331_v2, %v2230_v1  ;;  %2839 = vmatmul.mubr.bf16.gmra.mxu0 %v3311_v60  ;;  %v2234_v4 = vpop.f32.mrf.mxu0 }
 0x10b   :  { %2940 = vmatmul.mubr.bf16.gmra.mxu1 %v3313_v61  ;;  %v2335_v5 = vpop.f32.mrf.mxu1  ;;  %2848 = vmatprep.mubr.bf16.mxu0 %v3328_v63  ;;  %v3376_v61 = vcombine.high %v100_v47, %v108_v51  ;;  %v3378_v63 = vcombine.high %v101_v52, %v109_v53 }
 0x10c   :  { %v5152_v6 = vadd.f32 %v2335_v5, %v2234_v4  ;;  %2949 = vmatprep.mubr.bf16.mxu1 %v3330_v0  ;;  %v2236_v8 = vpop.f32.mrf.mxu0 }
 0x10d   :  { %v2337_v9 = vpop.f32.mrf.mxu1 }
 0x10e   :  { %v5166_v13 = vadd.f32 %v2337_v9, %v2236_v8  ;;  %v2238_v14 = vpop.f32.mrf.mxu0 }
 0x10f   :  { %v2339_v15 = vpop.f32.mrf.mxu1 }
 0x110   :  { %v5168_v18 = vadd.f32 %v2339_v15, %v2238_v14  ;;  %v2240_v21 = vpop.f32.mrf.mxu0 }
 0x111   :  { %v2341_v22 = vpop.f32.mrf.mxu1 }
 0x112   :  { %v5170_v23 = vadd.f32 %v2341_v22, %v2240_v21  ;;  %2849 = vmatmul.mubr.bf16.gmra.mxu0 %v3327_v16  ;;  %v2244_v24 = vpop.f32.mrf.mxu0  ;;  %v3375_v16 = vcombine.low %v100_v47, %v108_v51  ;;  %v3394_v21 = vcombine.high %v117_v11, %v117_v11 }
 0x113   :  { %2950 = vmatmul.mubr.bf16.gmra.mxu1 %v3329_v17  ;;  %v2345_v25 = vpop.f32.mrf.mxu1  ;;  %2858 = vmatprep.mubr.bf16.mxu0 %v3344_v19  ;;  %v3377_v17 = vcombine.low %v101_v52, %v109_v53 }
 0x114   :  { %v5172_v26 = vadd.f32 %v2345_v25, %v2244_v24  ;;  %2959 = vmatprep.mubr.bf16.mxu1 %v3346_v20  ;;  %v2246_v28 = vpop.f32.mrf.mxu0  ;;  %v3392_v20 = vcombine.high %v116_v10, %v116_v10 }
 0x115   :  { %v2347_v29 = vpop.f32.mrf.mxu1 }
 0x116   :  { %v5186_v33 = vadd.f32 %v2347_v29, %v2246_v28  ;;  %v2248_v34 = vpop.f32.mrf.mxu0 }
 0x117   :  { %v2349_v35 = vpop.f32.mrf.mxu1 }
 0x118   :  { %v5188_v38 = vadd.f32 %v2349_v35, %v2248_v34  ;;  %v2250_v41 = vpop.f32.mrf.mxu0 }
 0x119   :  { %v2351_v42 = vpop.f32.mrf.mxu1 }
 0x11a   :  { %v5190_v43 = vadd.f32 %v2351_v42, %v2250_v41  ;;  %2859 = vmatmul.mubr.bf16.gmra.mxu0 %v3343_v36  ;;  %v2254_v44 = vpop.f32.mrf.mxu0  ;;  %v3391_v36 = vcombine.low %v116_v10, %v116_v10 }
 0x11b   :  { %2960 = vmatmul.mubr.bf16.gmra.mxu1 %v3345_v37  ;;  %v2355_v45 = vpop.f32.mrf.mxu1  ;;  %2868 = vmatprep.mubr.bf16.mxu0 %v3360_v39  ;;  %v3393_v37 = vcombine.low %v117_v11, %v117_v11 }
 0x11c   :  { %v5192_v46 = vadd.f32 %v2355_v45, %v2254_v44  ;;  %2969 = vmatprep.mubr.bf16.mxu1 %v3362_v40  ;;  %v2256_v48 = vpop.f32.mrf.mxu0 }
 0x11d   :  { %v2357_v49 = vpop.f32.mrf.mxu1 }
 0x11e   :  { %v5206_v54 = vadd.f32 %v2357_v49, %v2256_v48  ;;  %v2258_v55 = vpop.f32.mrf.mxu0 }
 0x11f   :  { %v2359_v56 = vpop.f32.mrf.mxu1 }
 0x120   :  { %v5208_v60 = vadd.f32 %v2359_v56, %v2258_v55  ;;  %v2260_v0 = vpop.f32.mrf.mxu0 }
 0x121   :  { %v2361_v1 = vpop.f32.mrf.mxu1 }
 0x122   :  { %v5210_v2 = vadd.f32 %v2361_v1, %v2260_v0  ;;  %2869 = vmatmul.mubr.bf16.gmra.mxu0 %v3359_v58  ;;  %v2264_v4 = vpop.f32.mrf.mxu0 }
 0x123   :  { %2970 = vmatmul.mubr.bf16.gmra.mxu1 %v3361_v59  ;;  %v2365_v5 = vpop.f32.mrf.mxu1  ;;  %2878 = vmatprep.mubr.bf16.mxu0 %v3376_v61 }
 0x124   :  { %v5212_v7 = vadd.f32 %v2365_v5, %v2264_v4  ;;  %2979 = vmatprep.mubr.bf16.mxu1 %v3378_v63  ;;  %v2266_v8 = vpop.f32.mrf.mxu0 }
 0x125   :  { %v2367_v9 = vpop.f32.mrf.mxu1 }
 0x126   :  { %v5220_v12 = vadd.f32 %v2367_v9, %v2266_v8  ;;  %v2268_v14 = vpop.f32.mrf.mxu0 }
 0x127   :  { %v2369_v15 = vpop.f32.mrf.mxu1 }
 0x128   :  { %v5222_v19 = vadd.f32 %v2369_v15, %v2268_v14  ;;  %v2270_v22 = vpop.f32.mrf.mxu0 }
 0x129   :  { %v2371_v24 = vpop.f32.mrf.mxu1 }
 0x12a   :  { %v5224_v25 = vadd.f32 %v2371_v24, %v2270_v22  ;;  %2879 = vmatmul.mubr.bf16.gmra.mxu0 %v3375_v16  ;;  %v2274_v27 = vpop.f32.mrf.mxu0 }
 0x12b   :  { %2980 = vmatmul.mubr.bf16.gmra.mxu1 %v3377_v17  ;;  %v2375_v28 = vpop.f32.mrf.mxu1  ;;  %2888 = vmatprep.mubr.bf16.mxu0 %v3392_v20 }
 0x12c   :  { %v5226_v29 = vadd.f32 %v2375_v28, %v2274_v27  ;;  %2989 = vmatprep.mubr.bf16.mxu1 %v3394_v21  ;;  %v2276_v30 = vpop.f32.mrf.mxu0 }
 0x12d   :  { %v2377_v31 = vpop.f32.mrf.mxu1 }
 0x12e   :  { %v5228_v32 = vadd.f32 %v2377_v31, %v2276_v30  ;;  %v2278_v34 = vpop.f32.mrf.mxu0 }
 0x12f   :  { %v2379_v35 = vpop.f32.mrf.mxu1 }
 0x130   :  { %v5230_v39 = vadd.f32 %v2379_v35, %v2278_v34  ;;  %v2280_v40 = vpop.f32.mrf.mxu0 }
 0x131   :  { %v2381_v41 = vpop.f32.mrf.mxu1 }
 0x132   :  { %v5232_v42 = vadd.f32 %v2381_v41, %v2280_v40  ;;  %2889 = vmatmul.mubr.bf16.gmra.mxu0 %v3391_v36  ;;  %v2284_v44 = vpop.f32.mrf.mxu0 }
 0x133   :  { %2990 = vmatmul.mubr.bf16.gmra.mxu1 %v3393_v37  ;;  %v2385_v45 = vpop.f32.mrf.mxu1 }
 0x134   :  { %v5234_v47 = vadd.f32 %v2385_v45, %v2284_v44  ;;  %v2286_v48 = vpop.f32.mrf.mxu0 }
 0x135   :  { %v2387_v49 = vpop.f32.mrf.mxu1 }
 0x136   :  { %v5236_v51 = vadd.f32 %v2387_v49, %v2286_v48  ;;  %v2288_v52 = vpop.f32.mrf.mxu0 }
 0x137   :  { %v2389_v53 = vpop.f32.mrf.mxu1 }
 0x138   :  { %v2289_v55 = vpop.f32.mrf.mxu0 }
 0x139   :  { %v2390_v56 = vpop.f32.mrf.mxu1 }
 0x142   :  { %v2426_v58 = vpop.f32.mrf.mxu0 }
 0x143   :  { %v2527_v59 = vpop.f32.mrf.mxu1  ;;  %v2427_v61 = vadd.f32 %v2426_v58, %v5132_v50 }
 0x144   :  { %v2428_v63 = vpop.f32.mrf.mxu0 }
 0x145   :  { %v2529_v0 = vpop.f32.mrf.mxu1  ;;  %v5239_v1 = vadd.f32 %v2527_v59, %v2427_v61  ;;  %v2429_v4 = vadd.f32 %v2428_v63, %v5146_v57 }
 0x146   :  { %v2430_v5 = vpop.f32.mrf.mxu0 }
 0x147   :  { %v2531_v8 = vpop.f32.mrf.mxu1  ;;  %v5242_v9 = vadd.f32 %v2529_v0, %v2429_v4  ;;  %v2431_v10 = vadd.f32 %v2430_v5, %v5148_v62 }
 0x148   :  { %v2432_v11 = vpop.f32.mrf.mxu0 }
 0x149   :  { %v2533_v14 = vpop.f32.mrf.mxu1  ;;  %v5245_v15 = vadd.f32 %v2531_v8, %v2431_v10  ;;  %v2433_v16 = vadd.f32 %v2432_v11, %v5150_v3 }
 0x14a   :  { %v2436_v17 = vpop.f32.mrf.mxu0 }
 0x14b   :  { %v2537_v50 = vpop.f32.mrf.mxu1  ;;  %v5248_v20 = vadd.f32 %v2533_v14, %v2433_v16  ;;  %v2437_v21 = vadd.f32 %v2436_v17, %v5152_v6 }
 0x14c   :  { %v2438_v22 = vpop.f32.mrf.mxu0 }
 0x14d   :  { %v2539_v57 = vpop.f32.mrf.mxu1  ;;  %v2439_v24 = vadd.f32 %v2438_v22, %v5166_v13  ;;  %v5252_v27 = vadd.f32 %v2537_v50, %v2437_v21 }
 0x14e   :  { %v2440_v28 = vpop.f32.mrf.mxu0 }
 0x14f   :  { %v2541_v62 = vpop.f32.mrf.mxu1  ;;  %v2441_v30 = vadd.f32 %v2440_v28, %v5168_v18  ;;  %v5255_v31 = vadd.f32 %v2539_v57, %v2439_v24 }
 0x150   :  { %v2442_v34 = vpop.f32.mrf.mxu0 }
 0x151   :  { %v2543_v3 = vpop.f32.mrf.mxu1  ;;  %v2443_v35 = vadd.f32 %v2442_v34, %v5170_v23  ;;  %v5258_v36 = vadd.f32 %v2541_v62, %v2441_v30 }
 0x152   :  { %v2446_v37 = vpop.f32.mrf.mxu0 }
 0x153   :  { %v2547_v6 = vpop.f32.mrf.mxu1  ;;  %v2447_v40 = vadd.f32 %v2446_v37, %v5172_v26  ;;  %v5261_v41 = vadd.f32 %v2543_v3, %v2443_v35 }
 0x154   :  { %v2448_v13 = vpop.f32.mrf.mxu0 }
 0x155   :  { %v2549_v44 = vpop.f32.mrf.mxu1  ;;  %v2449_v45 = vadd.f32 %v2448_v13, %v5186_v33  ;;  %v5264_v48 = vadd.f32 %v2547_v6, %v2447_v40 }
 0x156   :  { %v2450_v18 = vpop.f32.mrf.mxu0 }
 0x157   :  { %v2551_v49 = vpop.f32.mrf.mxu1  ;;  %v2451_v52 = vadd.f32 %v2450_v18, %v5188_v38  ;;  %v5267_v53 = vadd.f32 %v2549_v44, %v2449_v45 }
 0x158   :  { %v2452_v23 = vpop.f32.mrf.mxu0 }
 0x159   :  { %v2553_v55 = vpop.f32.mrf.mxu1  ;;  %v2453_v56 = vadd.f32 %v2452_v23, %v5190_v43  ;;  %v5270_v58 = vadd.f32 %v2551_v49, %v2451_v52 }
 0x15a   :  { %v2456_v26 = vpop.f32.mrf.mxu0 }
 0x15b   :  { %v2557_v59 = vpop.f32.mrf.mxu1  ;;  %v2457_v61 = vadd.f32 %v2456_v26, %v5192_v46  ;;  %v5273_v63 = vadd.f32 %v2553_v55, %v2453_v56 }
 0x15c   :  { %v2458_v33 = vpop.f32.mrf.mxu0 }
 0x15d   :  { %v2559_v0 = vpop.f32.mrf.mxu1  ;;  %v2459_v4 = vadd.f32 %v2458_v33, %v5206_v54  ;;  %v5276_v5 = vadd.f32 %v2557_v59, %v2457_v61 }
 0x15e   :  { %v2460_v38 = vpop.f32.mrf.mxu0 }
 0x15f   :  { %v2561_v8 = vpop.f32.mrf.mxu1  ;;  %v2461_v10 = vadd.f32 %v2460_v38, %v5208_v60  ;;  %v5279_v11 = vadd.f32 %v2559_v0, %v2459_v4 }
 0x160   :  { %v2462_v43 = vpop.f32.mrf.mxu0 }
 0x161   :  { %v2563_v14 = vpop.f32.mrf.mxu1  ;;  %v2463_v16 = vadd.f32 %v2462_v43, %v5210_v2  ;;  %v5282_v17 = vadd.f32 %v2561_v8, %v2461_v10 }
 0x162   :  { %v2466_v46 = vpop.f32.mrf.mxu0 }
 0x163   :  { %v2567_v50 = vpop.f32.mrf.mxu1  ;;  %v2467_v21 = vadd.f32 %v2466_v46, %v5212_v7  ;;  %v5285_v22 = vadd.f32 %v2563_v14, %v2463_v16 }
 0x164   :  { %v2468_v54 = vpop.f32.mrf.mxu0 }
 0x165   :  { %v2569_v57 = vpop.f32.mrf.mxu1  ;;  %v2469_v24 = vadd.f32 %v2468_v54, %v5220_v12  ;;  %v5288_v28 = vadd.f32 %v2567_v50, %v2467_v21 }
 0x166   :  { %v2470_v60 = vpop.f32.mrf.mxu0 }
 0x167   :  { %v2571_v62 = vpop.f32.mrf.mxu1  ;;  %v2471_v30 = vadd.f32 %v2470_v60, %v5222_v19  ;;  %v5291_v34 = vadd.f32 %v2569_v57, %v2469_v24 }
 0x168   :  { %v2472_v2 = vpop.f32.mrf.mxu0 }
 0x169   :  { %v2573_v3 = vpop.f32.mrf.mxu1  ;;  %v2473_v35 = vadd.f32 %v2472_v2, %v5224_v25  ;;  %v5294_v37 = vadd.f32 %v2571_v62, %v2471_v30  ;;  %v5535_v62 = vlaneseq }
 0x16a   :  { %v2476_v7 = vpop.f32.mrf.mxu0 }
 0x16b   :  { %v2577_v6 = vpop.f32.mrf.mxu1  ;;  %v2477_v40 = vadd.f32 %v2476_v7, %v5226_v29  ;;  %v5297_v13 = vadd.f32 %v2573_v3, %v2473_v35  ;;  %vm5331_vm0 = vcmp.lt.s32.totalorder %v5535_v62, 256  ;;  %v4079_v7 = vmov 0.0  }
 0x16c   :  { %v2478_v12 = vpop.f32.mrf.mxu0  ;;  %3125 = vst.msk [vmem:[%s5532_s3] sm:$0x3] %vm5331_vm0, %v4079_v7  ;;  %3126 = vst.msk [vmem:[%s5533_s4] sm:$0x3] %vm5331_vm0, %v4079_v7 }
 0x16d   :  { %v2579_v44 = vpop.f32.mrf.mxu1  ;;  %v2479_v45 = vadd.f32 %v2478_v12, %v5228_v32  ;;  %v5300_v18 = vadd.f32 %v2577_v6, %v2477_v40 }
 0x16e   :  { %v2480_v19 = vpop.f32.mrf.mxu0 }
 0x16f   :  { %v2581_v49 = vpop.f32.mrf.mxu1  ;;  %v2481_v52 = vadd.f32 %v2480_v19, %v5230_v39  ;;  %v5303_v23 = vadd.f32 %v2579_v44, %v2479_v45 }
 0x170   :  { %v2482_v25 = vpop.f32.mrf.mxu0 }
 0x171   :  { %v2583_v55 = vpop.f32.mrf.mxu1  ;;  %v2483_v56 = vadd.f32 %v2482_v25, %v5232_v42  ;;  %v5306_v26 = vadd.f32 %v2581_v49, %v2481_v52 }
 0x172   :  { %v2486_v29 = vpop.f32.mrf.mxu0 }
 0x173   :  { %v2587_v59 = vpop.f32.mrf.mxu1  ;;  %v2487_v61 = vadd.f32 %v2486_v29, %v5234_v47  ;;  %v5309_v33 = vadd.f32 %v2583_v55, %v2483_v56 }
 0x174   :  { %v2488_v32 = vpop.f32.mrf.mxu0 }
 0x175   :  { %v2589_v0 = vpop.f32.mrf.mxu1  ;;  %v2489_v4 = vadd.f32 %v2488_v32, %v5236_v51  ;;  %v5312_v38 = vadd.f32 %v2587_v59, %v2487_v61 }
 0x176   :  { %v2490_v39 = vpop.f32.mrf.mxu0 }
 0x177   :  { %v2591_v8 = vpop.f32.mrf.mxu1  ;;  %v5314_v10 = vadd.f32 %v2589_v0, %v2489_v4 }
 0x178   :  { %v2491_v43 = vpop.f32.mrf.mxu0 }
 0x179   :  { %v2592_v42 = vpop.f32.mrf.mxu1 }
 0x182   :  { %v2628_v14 = vpop.f32.mrf.mxu0 }
 0x183   :  { %v2729_v16 = vpop.f32.mrf.mxu1  ;;  %v2629_v46 = vadd.f32 %v2628_v14, %v5239_v1  ;;  %v5538_v1 = vmov 0 }
 0x184   :  { %v5317_v50 = vpop.f32.mrf.mxu0  ;;  %v5539_v1 = vsel %vm5331_vm0, 4294967295, %v5538_v1 }
 0x185   :  { %v5319_v47 = vpop.f32.mrf.mxu1  ;;  %v5321_v21 = vadd.f32 %v2729_v16, %v2629_v46  ;;  %5540 = vst [vmem:[#allocation2_spill] sm:$0xff] %v5539_v1 }
 0x186   :  { %v2632_v54 = vpop.f32.mrf.mxu0 }
 0x187   :  { %v2733_v51 = vpop.f32.mrf.mxu1  ;;  %v2633_v57 = vadd.f32 %v2632_v54, %v5245_v15 }
 0x188   :  { %v5324_v24 = vpop.f32.mrf.mxu0 }
 0x189   :  { %v5326_v60 = vpop.f32.mrf.mxu1  ;;  %v5328_v30 = vadd.f32 %v2733_v51, %v2633_v57 }
 0x18a   :  { %v2638_v2 = vpop.f32.mrf.mxu0 }
 0x18b   :  { %v2739_v3 = vpop.f32.mrf.mxu1  ;;  %v2639_v35 = vadd.f32 %v2638_v2, %v5252_v27 }
 0x18c   :  { %v5346_v15 = vpop.f32.mrf.mxu0 }
 0x18d   :  { %v5348_v6 = vpop.f32.mrf.mxu1  ;;  %v5350_v40 = vadd.f32 %v2739_v3, %v2639_v35 }
 0x18e   :  { %v2642_v27 = vpop.f32.mrf.mxu0 }
 0x18f   :  { %v2743_v12 = vpop.f32.mrf.mxu1  ;;  %v2643_v44 = vadd.f32 %v2642_v27, %v5258_v36 }
 0x190   :  { %v5353_v45 = vpop.f32.mrf.mxu0 }
 0x191   :  { %v5355_v19 = vpop.f32.mrf.mxu1  ;;  %v5357_v49 = vadd.f32 %v2743_v12, %v2643_v44 }
 0x192   :  { %v2648_v52 = vpop.f32.mrf.mxu0 }
 0x193   :  { %v2749_v25 = vpop.f32.mrf.mxu1  ;;  %v2649_v55 = vadd.f32 %v2648_v52, %v5264_v48 }
 0x194   :  { %v5360_v56 = vpop.f32.mrf.mxu0 }
 0x195   :  { %v5362_v29 = vpop.f32.mrf.mxu1  ;;  %v5364_v59 = vadd.f32 %v2749_v25, %v2649_v55 }
 0x196   :  { %v2652_v61 = vpop.f32.mrf.mxu0 }
 0x197   :  { %v2753_v32 = vpop.f32.mrf.mxu1  ;;  %v2653_v36 = vadd.f32 %v2652_v61, %v5270_v58 }
 0x198   :  { %v5367_v0 = vpop.f32.mrf.mxu0 }
 0x199   :  { %v5369_v4 = vpop.f32.mrf.mxu1  ;;  %v5371_v39 = vadd.f32 %v2753_v32, %v2653_v36 }
 0x19a   :  { %v2658_v8 = vpop.f32.mrf.mxu0 }
 0x19b   :  { %v2759_v43 = vpop.f32.mrf.mxu1  ;;  %v2659_v48 = vadd.f32 %v2658_v8, %v5276_v5 }
 0x19c   :  { %v5374_v42 = vpop.f32.mrf.mxu0 }
 0x19d   :  { %v5376_v14 = vpop.f32.mrf.mxu1  ;;  %v5378_v16 = vadd.f32 %v2759_v43, %v2659_v48 }
 0x19e   :  { %v2662_v46 = vpop.f32.mrf.mxu0 }
 0x19f   :  { %v2763_v54 = vpop.f32.mrf.mxu1  ;;  %v2663_v58 = vadd.f32 %v2662_v46, %v5282_v17 }
 0x1a0   :  { %v5381_v51 = vpop.f32.mrf.mxu0 }
 0x1a1   :  { %v5383_v57 = vpop.f32.mrf.mxu1  ;;  %v5385_v2 = vadd.f32 %v2763_v54, %v2663_v58 }
 0x1a2   :  { %v2668_v3 = vpop.f32.mrf.mxu0 }
 0x1a3   :  { %v2769_v35 = vpop.f32.mrf.mxu1  ;;  %v2669_v5 = vadd.f32 %v2668_v3, %v5288_v28 }
 0x1a4   :  { %v5388_v7 = vpop.f32.mrf.mxu0 }
 0x1a5   :  { %v5390_v27 = vpop.f32.mrf.mxu1  ;;  %v5392_v12 = vadd.f32 %v2769_v35, %v2669_v5 }
 0x1a6   :  { %v2672_v44 = vpop.f32.mrf.mxu0 }
 0x1a7   :  { %v2773_v52 = vpop.f32.mrf.mxu1  ;;  %v2673_v17 = vadd.f32 %v2672_v44, %v5294_v37 }
 0x1a8   :  { %v5395_v25 = vpop.f32.mrf.mxu0 }
 0x1a9   :  { %v5397_v55 = vpop.f32.mrf.mxu1  ;;  %v5399_v61 = vadd.f32 %v2773_v52, %v2673_v17 }
 0x1aa   :  { %v2678_v32 = vpop.f32.mrf.mxu0 }
 0x1ab   :  { %v2779_v36 = vpop.f32.mrf.mxu1  ;;  %v2679_v28 = vadd.f32 %v2678_v32, %v5300_v18 }
 0x1ac   :  { %v5402_v8 = vpop.f32.mrf.mxu0 }
 0x1ad   :  { %v5404_v43 = vpop.f32.mrf.mxu1  ;;  %v5406_v48 = vadd.f32 %v2779_v36, %v2679_v28 }
 0x1ae   :  { %v2682_v46 = vpop.f32.mrf.mxu0 }
 0x1af   :  { %v2783_v54 = vpop.f32.mrf.mxu1  ;;  %v2683_v37 = vadd.f32 %v2682_v46, %v5306_v26  ;;  %v2631_v46 = vadd.f32 %v5317_v50, %v5242_v9  ;;  %v2641_v50 = vadd.f32 %v5346_v15, %v5255_v31 }
 0x1b0   :  { %v5409_v58 = vpop.f32.mrf.mxu0 }
 0x1b1   :  { %v5411_v3 = vpop.f32.mrf.mxu1  ;;  %v5413_v35 = vadd.f32 %v2783_v54, %v2683_v37  ;;  %v2732_v37 = vadd.f32 %v5319_v47, %v2631_v46  ;;  %v2742_v31 = vadd.f32 %v5348_v6, %v2641_v50  ;;  %v2665_v50 = vadd.f32 %v5381_v51, %v5285_v22 }
 0x1b2   :  { %v2688_v5 = vpop.f32.mrf.mxu0 }
 0x1b3   :  { %5541 = vst [vmem:[#allocation3_spill] sm:$0xff] %v5413_v35  ;;  %v2789_v44 = vpop.f32.mrf.mxu1  ;;  %v2689_v18 = vadd.f32 %v2688_v5, %v5312_v38  ;;  %v2635_v38 = vadd.f32 %v5324_v24, %v5248_v20 }
 0x1b4   :  { %v5416_v52 = vpop.f32.mrf.mxu0 }
 0x1b5   :  { %v5418_v17 = vpop.f32.mrf.mxu1  ;;  %v5420_v32 = vadd.f32 %v2789_v44, %v2689_v18 }
 0x1b6   :  { %5542 = vst [vmem:[#allocation4_spill] sm:$0xff] %v5418_v17  ;;  %v2692_v36 = vpop.f32.mrf.mxu0 }
 0x1b7   :  { %5543 = vst [vmem:[#allocation5_spill] sm:$0xff] %v5420_v32  ;;  %v2793_v28 = vpop.f32.mrf.mxu1 }
 0x1b8   :  { %v2693_v62 = vpop.f32.mrf.mxu0 }
 0x1b9   :  { %v2794_v26 = vpop.f32.mrf.mxu1  ;;  %v2736_v62 = vadd.f32 %v5326_v60, %v2635_v38  ;;  %v2655_v38 = vadd.f32 %v5367_v0, %v5273_v63 }
 0x1c2   :  { %v2830_v1 = vpop.f32.mrf.mxu0 }
 0x1c3   :  { %v2931_v54 = vpop.f32.mrf.mxu1  ;;  %v2831_v5 = vadd.f32 %v2830_v1, %v5321_v21 }
 0x1c4   :  { %v2832_v35 = vpop.f32.mrf.mxu0 }
 0x1c5   :  { %v2933_v17 = vpop.f32.mrf.mxu1  ;;  %v2833_v44 = vadd.f32 %v2832_v35, %v2732_v37  ;;  %v2932_v28 = vadd.f32 %v2931_v54, %v2831_v5  ;;  %v2645_v35 = vadd.f32 %v5353_v45, %v5261_v41  ;;  %v2651_v37 = vadd.f32 %v5360_v56, %v5267_v53 }
 0x1c6   :  { %v2834_v18 = vpop.f32.mrf.mxu0  ;;  %v2661_v45 = vadd.f32 %v5374_v42, %v5279_v11  ;;  %v2756_v42 = vadd.f32 %v5369_v4, %v2655_v38 }
 0x1c7   :  { %v2935_v36 = vpop.f32.mrf.mxu1  ;;  %v2934_v26 = vadd.f32 %v2933_v17, %v2833_v44  ;;  %v2835_v9 = vadd.f32 %v2834_v18, %v5328_v30  ;;  %v2752_v11 = vadd.f32 %v5362_v29, %v2651_v37 }
 0x1c8   :  { %v2836_v47 = vpop.f32.mrf.mxu0 }
 0x1c9   :  { %v2937_v46 = vpop.f32.mrf.mxu1  ;;  %v3664_v32 = vpack.c.bf16 %v2934_v26, %v2932_v28  ;;  %v2936_v20 = vadd.f32 %v2935_v36, %v2835_v9  ;;  %v2837_v24 = vadd.f32 %v2836_v47, %v2736_v62 }
 0x1ca   :  { %v2840_v21 = vpop.f32.mrf.mxu0 }
 0x1cb   :  { %v2941_v1 = vpop.f32.mrf.mxu1  ;;  %3078 = vst [vmem:[%s5534_s2] sm:$0xff] %v3664_v32  ;;  %v2998_v60 = vpack.c.bf16 %v2936_v20, %v2932_v28  ;;  %v2938_v17 = vadd.f32 %v2937_v46, %v2837_v24  ;;  %v2841_v30 = vadd.f32 %v2840_v21, %v5350_v40  ;;  %v2746_v40 = vadd.f32 %v5355_v19, %v2645_v35 }
 0x1cc   :  { %v2842_v15 = vpop.f32.mrf.mxu0  ;;  %v2762_v19 = vadd.f32 %v5376_v14, %v2661_v45  ;;  %v2671_v21 = vadd.f32 %v5388_v7, %v5291_v34 }
 0x1cd   :  { %v2943_v54 = vpop.f32.mrf.mxu1  ;;  %v2999_v5 = vpack.c.bf16 %v2938_v17, %v2934_v26  ;;  %v3665_v41 = vpack.c.bf16 %v2938_v17, %v2936_v20  ;;  %v2843_v32 = vadd.f32 %v2842_v15, %v2742_v31  ;;  %v3091_v36 = vunpack.c.l.bf16 %v2998_v60 }
 0x1ce   :  { %v2844_v44 = vpop.f32.mrf.mxu0  ;;  %v3093_v6 = vunpack.c.h.bf16 %v2998_v60  ;;  %v2942_v53 = vadd.f32 %v2941_v1, %v2841_v30 }
 0x1cf   :  { %v2945_v18 = vpop.f32.mrf.mxu1  ;;  %3079 = vst [vmem:[%s5534_s2 + $0x8] sm:$0xff] %v3665_v41  ;;  %v3092_v56 = vunpack.c.l.bf16 %v2999_v5  ;;  %v3094_v62 = vunpack.c.h.bf16 %v2999_v5  ;;  %v2944_v63 = vadd.f32 %v2943_v54, %v2843_v32  ;;  %v2845_v0 = vadd.f32 %v2844_v44, %v5357_v49 }
 0x1d0   :  { %v2846_v28 = vpop.f32.mrf.mxu0  ;;  %v3189_v49 = vmul.f32 %v3091_v36, %v3091_v36  ;;  %v3191_v29 = vmul.f32 %v3093_v6, %v3093_v6  ;;  %v3128_v17 = vadd.f32 %v3093_v6, %v3091_v36 }
 0x1d1   :  { %v2947_v26 = vpop.f32.mrf.mxu1  ;;  %v2847_v9 = vadd.f32 %v2846_v28, %v2746_v40  ;;  %v3666_v47 = vpack.c.bf16 %v2944_v63, %v2942_v53  ;;  %v2946_v46 = vadd.f32 %v2945_v18, %v2845_v0  ;;  %v3190_v60 = vmul.f32 %v3092_v56, %v3092_v56 }
 0x1d2   :  { %v2850_v20 = vpop.f32.mrf.mxu0  ;;  %v3192_v4 = vmul.f32 %v3094_v62, %v3094_v62  ;;  %v3146_v54 = vadd.f32 %v3094_v62, %v3092_v56  ;;  %v3215_v44 = vadd.f32 %v3191_v29, %v3189_v49  ;;  %v2766_v49 = vadd.f32 %v5383_v57, %v2665_v50 }
 0x1d3   :  { %v2951_v24 = vpop.f32.mrf.mxu1  ;;  %v2948_v1 = vadd.f32 %v2947_v26, %v2847_v9  ;;  %v2851_v35 = vadd.f32 %v2850_v20, %v5364_v59  ;;  %3080 = vst [vmem:[%s5534_s2 + $0x10] sm:$0xff] %v3666_v47  ;;  %v3000_v14 = vpack.c.bf16 %v2946_v46, %v2942_v53  ;;  %v2681_v57 = vadd.f32 %v5402_v8, %v5303_v23 }
 0x1d4   :  { %v2852_v22 = vpop.f32.mrf.mxu0  ;;  %v3233_v18 = vadd.f32 %v3192_v4, %v3190_v60 }
 0x1d5   :  { %v2953_v51 = vpop.f32.mrf.mxu1  ;;  %v3001_v30 = vpack.c.bf16 %v2948_v1, %v2944_v63  ;;  %v3667_v31 = vpack.c.bf16 %v2948_v1, %v2946_v46  ;;  %v2853_v15 = vadd.f32 %v2852_v22, %v2752_v11  ;;  %v3095_v34 = vunpack.c.l.bf16 %v3000_v14 }
 0x1d6   :  { %v3097_v7 = vunpack.c.h.bf16 %v3000_v14  ;;  %v2952_v37 = vadd.f32 %v2951_v24, %v2851_v35  ;;  %v2854_v38 = vpop.f32.mrf.mxu0  ;;  %v2675_v22 = vadd.f32 %v5395_v25, %v5297_v13 }
 0x1d7   :  { %v2955_v59 = vpop.f32.mrf.mxu1  ;;  %3081 = vst [vmem:[%s5534_s2 + $0x18] sm:$0xff] %v3667_v31  ;;  %v3096_v5 = vunpack.c.l.bf16 %v3001_v30  ;;  %v3098_v41 = vunpack.c.h.bf16 %v3001_v30  ;;  %v2954_v45 = vadd.f32 %v2953_v51, %v2853_v15  ;;  %v2855_v32 = vadd.f32 %v2854_v38, %v5371_v39 }
 0x1d8   :  { %v3129_v40 = vadd.f32 %v3128_v17, %v3095_v34  ;;  %v3193_v36 = vmul.f32 %v3095_v34, %v3095_v34  ;;  %v2856_v6 = vpop.f32.mrf.mxu0  ;;  %v3195_v56 = vmul.f32 %v3097_v7, %v3097_v7 }
 0x1d9   :  { %v2957_v53 = vpop.f32.mrf.mxu1  ;;  %v3147_v62 = vadd.f32 %v3146_v54, %v3096_v5  ;;  %v3194_v63 = vmul.f32 %v3096_v5, %v3096_v5  ;;  %v3668_v0 = vpack.c.bf16 %v2954_v45, %v2952_v37  ;;  %v2956_v11 = vadd.f32 %v2955_v59, %v2855_v32 }
 0x1da   :  { %v3130_v28 = vadd.f32 %v3129_v40, %v3097_v7  ;;  %v3216_v26 = vadd.f32 %v3215_v44, %v3193_v36  ;;  %v2857_v9 = vadd.f32 %v2856_v6, %v2756_v42  ;;  %v2860_v47 = vpop.f32.mrf.mxu0  ;;  %v3196_v24 = vmul.f32 %v3098_v41, %v3098_v41 }
 0x1db   :  { %v2961_v46 = vpop.f32.mrf.mxu1  ;;  %v3148_v20 = vadd.f32 %v3147_v62, %v3098_v41  ;;  %v3234_v1 = vadd.f32 %v3233_v18, %v3194_v63  ;;  %3082 = vst [vmem:[%s5534_s2 + $0x20] sm:$0xff] %v3668_v0  ;;  %v2861_v39 = vadd.f32 %v2860_v47, %v5378_v16  ;;  %v3002_v29 = vpack.c.bf16 %v2956_v11, %v2952_v37 }
 0x1dc   :  { %v3217_v35 = vadd.f32 %v3216_v26, %v3195_v56  ;;  %v2958_v60 = vadd.f32 %v2957_v53, %v2857_v9  ;;  %v2862_v4 = vpop.f32.mrf.mxu0  ;;  %v2772_v42 = vadd.f32 %v5390_v27, %v2671_v21  ;;  %v2776_v40 = vadd.f32 %v5397_v55, %v2675_v22 }
 0x1dd   :  { %v2963_v14 = vpop.f32.mrf.mxu1  ;;  %v3235_v51 = vadd.f32 %v3234_v1, %v3196_v24  ;;  %v2863_v17 = vadd.f32 %v2862_v4, %v2762_v19  ;;  %v3099_v30 = vunpack.c.l.bf16 %v3002_v29  ;;  %v3101_v31 = vunpack.c.h.bf16 %v3002_v29 }
 0x1de   :  { %v3003_v15 = vpack.c.bf16 %v2958_v60, %v2954_v45  ;;  %v3669_v54 = vpack.c.bf16 %v2958_v60, %v2956_v11  ;;  %v2864_v34 = vpop.f32.mrf.mxu0  ;;  %v2962_v50 = vadd.f32 %v2961_v46, %v2861_v39  ;;  %v2782_v55 = vadd.f32 %v5404_v43, %v2681_v57 }
 0x1df   :  { %v2965_v16 = vpop.f32.mrf.mxu1  ;;  %v2964_v7 = vadd.f32 %v2963_v14, %v2863_v17  ;;  %v2865_v37 = vadd.f32 %v2864_v34, %v5385_v2  ;;  %v3131_v38 = vadd.f32 %v3130_v28, %v3099_v30  ;;  %v3197_v27 = vmul.f32 %v3099_v30, %v3099_v30 }
 0x1e0   :  { %v3199_v21 = vmul.f32 %v3101_v31, %v3101_v31  ;;  %3083 = vst [vmem:[%s5534_s2 + $0x28] sm:$0xff] %v3669_v54  ;;  %v3100_v13 = vunpack.c.l.bf16 %v3003_v15  ;;  %v2866_v25 = vpop.f32.mrf.mxu0  ;;  %v3102_v59 = vunpack.c.h.bf16 %v3003_v15 }
 0x1e1   :  { %v2967_v19 = vpop.f32.mrf.mxu1  ;;  %v3670_v5 = vpack.c.bf16 %v2964_v7, %v2962_v50  ;;  %v2966_v41 = vadd.f32 %v2965_v16, %v2865_v37  ;;  %v2867_v45 = vadd.f32 %v2866_v25, %v2766_v49  ;;  %v3132_v32 = vadd.f32 %v3131_v38, %v3101_v31 }
 0x1e2   :  { %v3218_v23 = vadd.f32 %v3217_v35, %v3197_v27  ;;  %v3149_v8 = vadd.f32 %v3148_v20, %v3100_v13  ;;  %v3198_v44 = vmul.f32 %v3100_v13, %v3100_v13  ;;  %v2870_v18 = vpop.f32.mrf.mxu0  ;;  %v3200_v63 = vmul.f32 %v3102_v59, %v3102_v59 }
 0x1e3   :  { %v2971_v2 = vpop.f32.mrf.mxu1  ;;  %3084 = vst [vmem:[%s5534_s2 + $0x30] sm:$0xff] %v3670_v5  ;;  %v3004_v36 = vpack.c.bf16 %v2966_v41, %v2962_v50  ;;  %v2968_v6 = vadd.f32 %v2967_v19, %v2867_v45  ;;  %v2871_v53 = vadd.f32 %v2870_v18, %v5392_v12  ;;  %v2685_v20 = vadd.f32 %v5409_v58, %v5309_v33 }
 0x1e4   :  { %v3219_v56 = vadd.f32 %v3218_v23, %v3199_v21  ;;  %v3150_v62 = vadd.f32 %v3149_v8, %v3102_v59  ;;  %v3236_v0 = vadd.f32 %v3235_v51, %v3198_v44  ;;  %v2872_v28 = vpop.f32.mrf.mxu0 }
 0x1e5   :  { %v2973_v26 = vpop.f32.mrf.mxu1  ;;  %v3103_v11 = vunpack.c.l.bf16 %v3004_v36  ;;  %v3105_v9 = vunpack.c.h.bf16 %v3004_v36  ;;  %v3005_v47 = vpack.c.bf16 %v2968_v6, %v2964_v7  ;;  %v3671_v46 = vpack.c.bf16 %v2968_v6, %v2966_v41 }
 0x1e6   :  { %v3237_v24 = vadd.f32 %v3236_v0, %v3200_v63  ;;  %v2873_v1 = vadd.f32 %v2872_v28, %v2772_v42  ;;  %v2874_v39 = vpop.f32.mrf.mxu0  ;;  %v2972_v60 = vadd.f32 %v2971_v2, %v2871_v53  ;;  %v2786_v25 = vadd.f32 %v5411_v3, %v2685_v20  ;;  %v5544_v2 = vld [vmem:[#allocation3_spill] sm:$0xff] }
 0x1e7   :  { %v2975_v49 = vpop.f32.mrf.mxu1  ;;  %v3133_v12 = vadd.f32 %v3132_v32, %v3103_v11  ;;  %v3201_v35 = vmul.f32 %v3103_v11, %v3103_v11  ;;  %3085 = vst [vmem:[%s5534_s2 + $0x38] sm:$0xff] %v3671_v46  ;;  %v3104_v29 = vunpack.c.l.bf16 %v3005_v47  ;;  %v3203_v4 = vmul.f32 %v3105_v9, %v3105_v9 }
 0x1e8   :  { %v3106_v14 = vunpack.c.h.bf16 %v3005_v47  ;;  %v2974_v22 = vadd.f32 %v2973_v26, %v2873_v1  ;;  %v2875_v43 = vadd.f32 %v2874_v39, %v5399_v61  ;;  %v2876_v51 = vpop.f32.mrf.mxu0  ;;  %v5546_v39 = vld [vmem:[#allocation5_spill] sm:$0xff] }
 0x1e9   :  { %v2977_v17 = vpop.f32.mrf.mxu1  ;;  %v3134_v33 = vadd.f32 %v3133_v12, %v3105_v9  ;;  %v3220_v58 = vadd.f32 %v3219_v56, %v3201_v35  ;;  %v3151_v42 = vadd.f32 %v3150_v62, %v3104_v29  ;;  %v3202_v30 = vmul.f32 %v3104_v29, %v3104_v29 }
 0x1ea   :  { %v3204_v31 = vmul.f32 %v3106_v14, %v3106_v14  ;;  %v3672_v15 = vpack.c.bf16 %v2974_v22, %v2972_v60  ;;  %v2976_v54 = vadd.f32 %v2975_v49, %v2875_v43  ;;  %v2877_v34 = vadd.f32 %v2876_v51, %v2776_v40  ;;  %v2880_v16 = vpop.f32.mrf.mxu0 }
 0x1eb   :  { %v2981_v57 = vpop.f32.mrf.mxu1  ;;  %v3221_v50 = vadd.f32 %v3220_v58, %v3203_v4  ;;  %v3152_v7 = vadd.f32 %v3151_v42, %v3106_v14  ;;  %v3238_v37 = vadd.f32 %v3237_v24, %v3202_v30  ;;  %v2881_v38 = vadd.f32 %v2880_v16, %v5406_v48 }
 0x1ec   :  { %3086 = vst [vmem:[%s5534_s2 + $0x40] sm:$0xff] %v3672_v15  ;;  %v3006_v61 = vpack.c.bf16 %v2976_v54, %v2972_v60  ;;  %v2978_v27 = vadd.f32 %v2977_v17, %v2877_v34  ;;  %v2882_v21 = vpop.f32.mrf.mxu0  ;;  %v2691_v48 = vadd.f32 %v5416_v52, %v5314_v10 }
 0x1ed   :  { %v2983_v13 = vpop.f32.mrf.mxu1  ;;  %v3239_v19 = vadd.f32 %v3238_v37, %v3204_v31  ;;  %v2883_v59 = vadd.f32 %v2882_v21, %v2782_v55  ;;  %v2982_v44 = vadd.f32 %v2981_v57, %v2881_v38  ;;  %v5545_v55 = vld [vmem:[#allocation4_spill] sm:$0xff] }
 0x1ee   :  { %v3107_v5 = vunpack.c.l.bf16 %v3006_v61  ;;  %v3109_v41 = vunpack.c.h.bf16 %v3006_v61  ;;  %v3007_v45 = vpack.c.bf16 %v2978_v27, %v2974_v22  ;;  %v3673_v32 = vpack.c.bf16 %v2978_v27, %v2976_v54  ;;  %v2884_v23 = vpop.f32.mrf.mxu0 }
 0x1ef   :  { %v2985_v8 = vpop.f32.mrf.mxu1  ;;  %v2984_v18 = vadd.f32 %v2983_v13, %v2883_v59  ;;  %v2885_v40 = vadd.f32 %v2884_v23, %v5544_v2  ;;  %v2792_v20 = vadd.f32 %v5545_v55, %v2691_v48  ;;  %v5547_v55 = vlaneseq }
 0x1f0   :  { %v3135_v36 = vadd.f32 %v3134_v33, %v3107_v5  ;;  %v3205_v6 = vmul.f32 %v3107_v5, %v3107_v5  ;;  %v3207_v53 = vmul.f32 %v3109_v41, %v3109_v41  ;;  %3087 = vst [vmem:[%s5534_s2 + $0x48] sm:$0xff] %v3673_v32  ;;  %v3108_v3 = vunpack.c.l.bf16 %v3007_v45  ;;  %v2886_v56 = vpop.f32.mrf.mxu0 }
 0x1f1   :  { %v2987_v62 = vpop.f32.mrf.mxu1  ;;  %v3110_v63 = vunpack.c.h.bf16 %v3007_v45  ;;  %v3674_v0 = vpack.c.bf16 %v2984_v18, %v2982_v44  ;;  %v2986_v28 = vadd.f32 %v2985_v8, %v2885_v40  ;;  %v2887_v26 = vadd.f32 %v2886_v56, %v2786_v25 }
 0x1f2   :  { %v3136_v11 = vadd.f32 %v3135_v36, %v3109_v41  ;;  %v3222_v10 = vadd.f32 %v3221_v50, %v3205_v6  ;;  %v3153_v52 = vadd.f32 %v3152_v7, %v3108_v3  ;;  %v3206_v9 = vmul.f32 %v3108_v3, %v3108_v3  ;;  %v2890_v47 = vpop.f32.mrf.mxu0 }
 0x1f3   :  { %v2991_v46 = vpop.f32.mrf.mxu1  ;;  %3088 = vst [vmem:[%s5534_s2 + $0x50] sm:$0xff] %v3674_v0  ;;  %v3008_v24 = vpack.c.bf16 %v2986_v28, %v2982_v44  ;;  %v2988_v1 = vadd.f32 %v2987_v62, %v2887_v26  ;;  %v2891_v49 = vadd.f32 %v2890_v47, %v5546_v39  ;;  %v3208_v29 = vmul.f32 %v3110_v63, %v3110_v63 }
 0x1f4   :  { %v3223_v12 = vadd.f32 %v3222_v10, %v3207_v53  ;;  %v3154_v35 = vadd.f32 %v3153_v52, %v3110_v63  ;;  %v3240_v60 = vadd.f32 %v3239_v19, %v3206_v9  ;;  %v2892_v4 = vpop.f32.mrf.mxu0  ;;  %v4080_v62 = vmov 1966171168  }
 0x1f5   :  { %v2993_v14 = vpop.f32.mrf.mxu1  ;;  %v3111_v22 = vunpack.c.l.bf16 %v3008_v24  ;;  %v3113_v43 = vunpack.c.h.bf16 %v3008_v24  ;;  %v3009_v51 = vpack.c.bf16 %v2988_v1, %v2984_v18  ;;  %v3675_v17 = vpack.c.bf16 %v2988_v1, %v2986_v28 }
 0x1f6   :  { %v3241_v33 = vadd.f32 %v3240_v60, %v3208_v29  ;;  %v2992_v58 = vadd.f32 %v2991_v46, %v2891_v49  ;;  %v2893_v42 = vadd.f32 %v2892_v4, %v2792_v20  ;;  %v2894_v30 = vpop.f32.mrf.mxu0  ;;  %v3168_v63 = vunpack.c.l.s4 %v4080_v62 }
 0x1f7   :  { %v2995_v31 = vpop.f32.mrf.mxu1  ;;  %v3137_v15 = vadd.f32 %v3136_v11, %v3111_v22  ;;  %v3209_v54 = vmul.f32 %v3111_v22, %v3111_v22  ;;  %3089 = vst [vmem:[%s5534_s2 + $0x58] sm:$0xff] %v3675_v17  ;;  %v3112_v34 = vunpack.c.l.bf16 %v3009_v51  ;;  %v3211_v16 = vmul.f32 %v3113_v43, %v3113_v43 }
 0x1f8   :  { %v3114_v57 = vunpack.c.h.bf16 %v3009_v51  ;;  %v3010_v50 = vpack.c.bf16 %v2992_v58, %v2992_v58  ;;  %v2994_v7 = vadd.f32 %v2993_v14, %v2893_v42  ;;  %v2895_v37 = vpop.f32.mrf.mxu0  ;;  %v3169_v46 = vunpack.c.0.s8 %v3168_v63  ;;  %v3127_v42 = vld [vmem:[%s5532_s3] sm:$0x3] }
 0x1f9   :  { %v2996_v38 = vpop.f32.mrf.mxu1  ;;  %v3138_v61 = vadd.f32 %v3137_v15, %v3113_v43  ;;  %v3224_v27 = vadd.f32 %v3223_v12, %v3209_v54  ;;  %v3155_v21 = vadd.f32 %v3154_v35, %v3112_v34  ;;  %v3210_v13 = vmul.f32 %v3112_v34, %v3112_v34  ;;  %v3188_v15 = vld [vmem:[%s5533_s4] sm:$0x3] }
 0x1fa   :  { %v3115_v25 = vunpack.c.l.bf16 %v3010_v50  ;;  %v3011_v19 = vpack.c.bf16 %v2994_v7, %v2994_v7  ;;  %v3676_v59 = vpack.c.bf16 %v2994_v7, %v2992_v58  ;;  %v3212_v45 = vmul.f32 %v3114_v57, %v3114_v57 }
 0x1fb   :  { %v3225_v5 = vadd.f32 %v3224_v27, %v3211_v16  ;;  %v3156_v41 = vadd.f32 %v3155_v21, %v3114_v57  ;;  %v3242_v32 = vadd.f32 %v3241_v33, %v3210_v13  ;;  %v3171_v20 = vshrl.u32 %v5547_v55, 7 }
 0x1fc   :  { %v3139_v23 = vadd.f32 %v3138_v61, %v3115_v25  ;;  %v3213_v8 = vmul.f32 %v3115_v25, %v3115_v25  ;;  %3090 = vst [vmem:[%s5534_s2 + $0x60] sm:$0xff] %v3676_v59  ;;  %v3116_v48 = vunpack.c.l.bf16 %v3011_v19 }
 0x1fd   :  { %v3243_v44 = vadd.f32 %v3242_v32, %v3212_v45  ;;  %v3172_v14 = vsub.s32 %v3169_v46, %v3171_v20 }
 0x1fe   :  { %v3140_v18 = vrot.slane %v3139_v23, 4  ;;  %v3226_v2 = vadd.f32 %v3225_v5, %v3213_v8  ;;  %v3157_v40 = vadd.f32 %v3156_v41, %v3116_v48  ;;  %v3214_v36 = vmul.f32 %v3116_v48, %v3116_v48 }
 0x200   :  { %v3141_v6 = vadd.f32 %v3140_v18, %v3139_v23  ;;  %v3227_v53 = vrot.slane %v3226_v2, 4  ;;  %v3158_v3 = vrot.slane %v3157_v40, 4  ;;  %v3244_v56 = vadd.f32 %v3243_v44, %v3214_v36 }
 0x202   :  { %v3142_v0 = vrot.slane %v3141_v6, 2  ;;  %v3228_v28 = vadd.f32 %v3227_v53, %v3226_v2  ;;  %v3159_v26 = vadd.f32 %v3158_v3, %v3157_v40  ;;  %v3245_v11 = vrot.slane %v3244_v56, 4 }
 0x204   :  { %v3143_v10 = vadd.f32 %v3142_v0, %v3141_v6  ;;  %v3229_v52 = vrot.slane %v3228_v28, 2  ;;  %v3160_v9 = vrot.slane %v3159_v26, 2  ;;  %v3246_v47 = vadd.f32 %v3245_v11, %v3244_v56 }
 0x206   :  { %v3144_v24 = vrot.slane %v3143_v10, 1  ;;  %v3230_v1 = vadd.f32 %v3229_v52, %v3228_v28  ;;  %v3161_v39 = vadd.f32 %v3160_v9, %v3159_v26  ;;  %v3247_v49 = vrot.slane %v3246_v47, 2 }
 0x208   :  { %v3231_v12 = vrot.slane %v3230_v1, 1  ;;  %v3162_v35 = vrot.slane %v3161_v39, 1  ;;  %v3248_v29 = vadd.f32 %v3247_v49, %v3246_v47  ;;  %v3145_v60 = vadd.f32 %v3144_v24, %v3143_v10 }
 0x20a   :  { %v3163_v4 = vadd.f32 %v3162_v35, %v3161_v39  ;;  %v3249_v22 = vrot.slane %v3248_v29, 1  ;;  %v3232_v43 = vadd.f32 %v3231_v12, %v3230_v1 }
 0x20c   :  { %v3166_v51 = vcombine.low %v3145_v60, %v3163_v4  ;;  %v3250_v17 = vadd.f32 %v3249_v22, %v3248_v29 }
 0x20e   :  { %v3173_v33 = vrot.slane %v3166_v51, %v3172_v14  ;;  %v3253_v58 = vcombine.low %v3232_v43, %v3250_v17 }
 0x210   :  { %v3180_v30 = vrot.slane %v3173_v33, %v3172_v14  ;;  %v3260_v31 = vrot.slane %v3253_v58, %v3172_v14 }
 0x212   :  { %v3182_v54 = vadd.f32 %v3180_v30, %v3127_v42  ;;  %v3267_v34 = vrot.slane %v3260_v31, %v3172_v14 }
 0x214   :  { %3187 = vst.msk [vmem:[%s5532_s3] sm:$0x3] %vm5331_vm0, %v3182_v54  ;;  %v3269_v57 = vadd.f32 %v3267_v34, %v3188_v15 }
 0x216   :  { %3270 = vst.msk [vmem:[%s5533_s4] sm:$0x3] %vm5331_vm0, %v3269_v57 }

// kernel: discriminator_forward.7
= control target key start
LH: loop header
LB: loop body
LE: loop exit
PB: predicated region body
PF: predicated region fallthrough
CT: control target
= control target key end

     0   :  { %v221_v6 = vlaneseq  ;;  %vm1306_vm0 = vcmask 7168   ;;  %s2715_s0 = inlined_call_operand.vmem [shape: bf16[8,12544], index: 0, kind: input, shape index: {}]   ;;  %s2716_s1 = inlined_call_operand.vmem [shape: bf16[1,12544], index: 1, kind: input, shape index: {}]   ;;  %s2717_s2 = inlined_call_operand.vmem [shape: f32[8,1], index: 2, kind: output, shape index: {}]  }
   0x1   :  { %v1335_v0 = vld [vmem:[%s2715_s0] sm:$0xff]  ;;  %v1340_v1 = vld [vmem:[%s2715_s0 + $0x8] sm:$0xff]  ;;  %v1345_v2 = vld [vmem:[%s2715_s0 + $0x10] sm:$0xff] }
   0x2   :  { %2759 = vst [vmem:[#allocation2_spill] sm:$0xff] %v1345_v2  ;;  %v1350_v3 = vld [vmem:[%s2715_s0 + $0x88] sm:$0xff]  ;;  %v1355_v4 = vld [vmem:[%s2715_s0 + $0x90] sm:$0xff]  ;;  %v1360_v5 = vld [vmem:[%s2715_s0 + $0x98] sm:$0xff]  ;;  %v222_v54 = vshrl.u32 %v221_v6, 7 }
   0x3   :  { %v1365_v7 = vld [vmem:[%s2715_s0 + $0xa0] sm:$0xff]  ;;  %v1370_v8 = vld [vmem:[%s2715_s0 + $0xa8] sm:$0xff]  ;;  %v1379_v13 = vld [vmem:[%s2715_s0 + $0xb0] sm:$0xff] }
   0x4   :  { %v1384_v14 = vld [vmem:[%s2715_s0 + $0xb8] sm:$0xff]  ;;  %v1393_v19 = vld [vmem:[%s2715_s0 + $0xc0] sm:$0xff]  ;;  %v1398_v20 = vld [vmem:[%s2715_s0 + $0xc8] sm:$0xff]  ;;  %v1492_v55 = vsub.s32 0, %v222_v54  ;;  %v1494_v51 = vsub.s32 2, %v222_v54  ;;  %v1498_v50 = vsub.s32 6, %v222_v54 }
   0x5   :  { %v1407_v25 = vld [vmem:[%s2715_s0 + $0xd0] sm:$0xff]  ;;  %v1412_v26 = vld [vmem:[%s2715_s0 + $0xd8] sm:$0xff]  ;;  %v1421_v31 = vld [vmem:[%s2715_s0 + $0xe0] sm:$0xff] }
   0x6   :  { %v1426_v32 = vld [vmem:[%s2715_s0 + $0xe8] sm:$0xff]  ;;  %v164_v42 = vld [vmem:[%s2716_s1 + $0x30] sm:$0xff]  ;;  %v165_v47 = vld [vmem:[%s2716_s1 + $0x38] sm:$0xff]  ;;  %2761 = vst [vmem:[#allocation4_spill] sm:$0xff] %v1494_v51 }
   0x7   :  { %2760 = vst [vmem:[#allocation3_spill] sm:$0xff] %v1426_v32  ;;  %v163_v41 = vld [vmem:[%s2716_s1 + $0x28] sm:$0xff]  ;;  %v166_v48 = vld [vmem:[%s2716_s1 + $0x40] sm:$0xff]  ;;  %v168_v53 = vld [vmem:[%s2716_s1 + $0x50] sm:$0xff]  ;;  %v1466_v58 = vunpack.c.l.bf16 %v164_v42  ;;  %v1476_v61 = vunpack.c.h.bf16 %v164_v42  ;;  %v1478_v62 = vunpack.c.l.bf16 %v165_v47  ;;  %v1480_v63 = vunpack.c.h.bf16 %v165_v47 }
   0x8   :  { %v167_v52 = vld [vmem:[%s2716_s1 + $0x48] sm:$0xff]  ;;  %v1462_v56 = vunpack.c.l.bf16 %v163_v41  ;;  %v1464_v57 = vunpack.c.h.bf16 %v163_v41  ;;  %v169_v59 = vld [vmem:[%s2716_s1 + $0x58] sm:$0xff]  ;;  %v1474_v60 = vld [vmem:[%s2716_s1 + $0x60] sm:$0x3]  ;;  %v1482_v6 = vunpack.c.l.bf16 %v166_v48  ;;  %v1484_v41 = vunpack.c.h.bf16 %v166_v48 }
   0x9   :  { %v1486_v16 = vunpack.c.l.bf16 %v167_v52  ;;  %v1488_v15 = vunpack.c.h.bf16 %v167_v52  ;;  %v1490_v12 = vunpack.c.l.bf16 %v168_v53  ;;  %v1496_v42 = vsub.s32 4, %v222_v54  ;;  %v1598_v18 = vld [vmem:[%s2715_s0 + $0xf0] sm:$0xff]  ;;  %v1611_v21 = vld [vmem:[%s2715_s0 + $0xf8] sm:$0xff]  ;;  %v1616_v17 = vld [vmem:[%s2715_s0 + $0x100] sm:$0xff] }
   0xa   :  { %v1500_v47 = vunpack.c.h.bf16 %v168_v53  ;;  %v1502_v49 = vunpack.c.l.bf16 %v169_v59  ;;  %v1504_v48 = vunpack.c.h.bf16 %v169_v59  ;;  %v195_v46 = vunpack.c.l.bf16 %v1474_v60  ;;  %2762 = vst [vmem:[#allocation5_spill] sm:$0xff] %v1598_v18  ;;  %2763 = vst [vmem:[#allocation6_spill] sm:$0xff] %v1611_v21  ;;  %v1629_v23 = vld [vmem:[%s2715_s0 + $0x108] sm:$0xff]  ;;  %v1634_v24 = vld [vmem:[%s2715_s0 + $0x110] sm:$0xff] }
   0xb   :  { %2764 = vst [vmem:[#allocation7_spill] sm:$0xff] %v1616_v17  ;;  %2765 = vst [vmem:[#allocation8_spill] sm:$0xff] %v1629_v23  ;;  %v162_v10 = vld [vmem:[%s2716_s1 + $0x20] sm:$0xff]  ;;  %v1650_v28 = vld [vmem:[%s2715_s0 + $0x118] sm:$0xff] }
   0xc   :  { %2766 = vst [vmem:[#allocation9_spill] sm:$0xff] %v1634_v24  ;;  %2767 = vst [vmem:[#allocation10_spill] sm:$0xff] %v1650_v28  ;;  %v1657_v9 = vrot.slane %v195_v46, %v1492_v55  ;;  %v1662_v11 = vrot.slane %v195_v46, %v1494_v51  ;;  %v1667_v27 = vld [vmem:[%s2715_s0 + $0x120] sm:$0xff]  ;;  %v1672_v29 = vld [vmem:[%s2715_s0 + $0x128] sm:$0xff]  ;;  %v1684_v37 = vunpack.c.l.bf16 %v162_v10  ;;  %v1694_v34 = vunpack.c.h.bf16 %v162_v10 }
   0xd   :  { %2770 = vst [vmem:[#allocation13_spill] sm:$0xff] %v1667_v27  ;;  %2771 = vst [vmem:[#allocation14_spill] sm:$0xff] %v1672_v29  ;;  %v158_v36 = vld [vmem:[%s2716_s1] sm:$0xff]  ;;  %v1689_v22 = vld [vmem:[%s2715_s0 + $0x130] sm:$0xff] }
   0xe   :  { %2768 = vst [vmem:[#allocation11_spill] sm:$0xff] %v1657_v9  ;;  %2769 = vst [vmem:[#allocation12_spill] sm:$0xff] %v1662_v11  ;;  %v1699_v35 = vld [vmem:[%s2715_s0 + $0x138] sm:$0xff]  ;;  %v1704_v30 = vld [vmem:[%s2715_s0 + $0x140] sm:$0xff]  ;;  %v356_v10 = vrot.slane %v1684_v37, %v1494_v51  ;;  %v1716_v39 = vunpack.c.l.bf16 %v158_v36  ;;  %v360_v40 = vrot.slane %v1684_v37, %v1496_v42  ;;  %v364_v38 = vrot.slane %v1684_v37, %v1498_v50 }
   0xf   :  { %2772 = vst [vmem:[#allocation15_spill] sm:$0xff] %v1684_v37  ;;  %2773 = vst [vmem:[#allocation16_spill] sm:$0xff] %v1689_v22  ;;  %v1714_v46 = vld [vmem:[%s2715_s0 + $0x148] sm:$0xff]  ;;  %v372_v33 = vrot.slane %v1694_v34, %v1494_v51  ;;  %v376_v59 = vrot.slane %v1694_v34, %v1496_v42  ;;  %v380_v53 = vrot.slane %v1694_v34, %v1498_v50  ;;  %v1736_v2 = vunpack.c.h.bf16 %v158_v36  ;;  %v2142_v11 = vld [vmem:[%s2715_s0 + $0x180] sm:$0xff] }
  0x10   :  { %2774 = vst [vmem:[#allocation17_spill] sm:$0xff] %v1699_v35  ;;  %2775 = vst [vmem:[#allocation18_spill] sm:$0xff] %v1704_v30  ;;  %v1739_v43 = vrot.slane %v356_v10, %v1492_v55  ;;  %v1744_v54 = vrot.slane %v360_v40, %v1492_v55  ;;  %v1747_v44 = vrot.slane %v364_v38, %v1492_v55 }
  0x11   :  { %2776 = vst [vmem:[#allocation19_spill] sm:$0xff] %v1714_v46  ;;  %v1750_v52 = vrot.slane %v372_v33, %v1492_v55  ;;  %v1753_v37 = vrot.slane %v376_v59, %v1492_v55  ;;  %v1756_v36 = vrot.slane %v380_v53, %v1492_v55  ;;  %v2778_v10 = vrot.slane %v1462_v56, %v1492_v55 }
  0x12   :  { %2777 = vst [vmem:[#allocation20_spill] sm:$0xff] %v1739_v43  ;;  %v2779_v38 = vrot.slane %v1462_v56, %v1494_v51  ;;  %v2780_v33 = vrot.slane %v1462_v56, %v1496_v42  ;;  %v2781_v53 = vrot.slane %v1462_v56, %v1498_v50  ;;  %v2785_v56 = vrot.slane %v1464_v57, %v1498_v50 }
  0x13   :  { %v1762_v60 = vrot.slane %v2778_v10, %v1492_v55  ;;  %v2782_v10 = vrot.slane %v1464_v57, %v1492_v55  ;;  %v244_v9 = vrot.slane %v1736_v2, %v1494_v51  ;;  %v2877_v46 = vunpack.c.h.bf16 %v1335_v0 }
  0x14   :  { %v1768_v40 = vrot.slane %v2779_v38, %v1492_v55  ;;  %v1774_v59 = vrot.slane %v2780_v33, %v1492_v55  ;;  %v1780_v45 = vrot.slane %v2781_v53, %v1492_v55  ;;  %v2783_v38 = vrot.slane %v1464_v57, %v1494_v51 }
  0x15   :  { %v1786_v29 = vrot.slane %v2782_v10, %v1492_v55  ;;  %v2784_v33 = vrot.slane %v1464_v57, %v1496_v42  ;;  %v1804_v53 = vrot.slane %v2785_v56, %v1492_v55  ;;  %v2786_v10 = vrot.slane %v1466_v58, %v1492_v55 }
  0x16   :  { %v1792_v43 = vrot.slane %v2783_v38, %v1492_v55  ;;  %v2787_v38 = vrot.slane %v1466_v58, %v1494_v51  ;;  %v2789_v57 = vrot.slane %v1466_v58, %v1498_v50 }
  0x17   :  { %v1798_v30 = vrot.slane %v2784_v33, %v1492_v55  ;;  %v1810_v35 = vrot.slane %v2786_v10, %v1492_v55  ;;  %v2788_v33 = vrot.slane %v1466_v58, %v1496_v42  ;;  %v2790_v10 = vrot.slane %v1476_v61, %v1492_v55 }
  0x18   :  { %v1816_v22 = vrot.slane %v2787_v38, %v1492_v55  ;;  %v1828_v56 = vrot.slane %v2789_v57, %v1492_v55  ;;  %v2791_v38 = vrot.slane %v1476_v61, %v1494_v51  ;;  %v2793_v58 = vrot.slane %v1476_v61, %v1498_v50 }
  0x19   :  { %v1822_v27 = vrot.slane %v2788_v33, %v1492_v55  ;;  %v1834_v28 = vrot.slane %v2790_v10, %v1492_v55  ;;  %v2792_v33 = vrot.slane %v1476_v61, %v1496_v42  ;;  %v2794_v10 = vrot.slane %v1478_v62, %v1492_v55 }
  0x1a   :  { %v1840_v24 = vrot.slane %v2791_v38, %v1492_v55  ;;  %v1852_v57 = vrot.slane %v2793_v58, %v1492_v55  ;;  %v2795_v38 = vrot.slane %v1478_v62, %v1494_v51  ;;  %v2799_v61 = vrot.slane %v1478_v62, %v1498_v50 }
  0x1b   :  { %v1846_v23 = vrot.slane %v2792_v33, %v1492_v55  ;;  %v1858_v17 = vrot.slane %v2794_v10, %v1492_v55  ;;  %v2797_v33 = vrot.slane %v1478_v62, %v1496_v42  ;;  %v2800_v10 = vrot.slane %v1480_v63, %v1492_v55 }
  0x1c   :  { %v1864_v21 = vrot.slane %v2795_v38, %v1492_v55  ;;  %v1876_v58 = vrot.slane %v2799_v61, %v1492_v55  ;;  %v2802_v38 = vrot.slane %v1480_v63, %v1494_v51  ;;  %v2806_v62 = vrot.slane %v1480_v63, %v1498_v50 }
  0x1d   :  { %v1870_v18 = vrot.slane %v2797_v33, %v1492_v55  ;;  %v1882_v32 = vrot.slane %v2800_v10, %v1492_v55  ;;  %v2804_v33 = vrot.slane %v1480_v63, %v1496_v42  ;;  %v2807_v10 = vrot.slane %v1482_v6, %v1492_v55 }
  0x1e   :  { %2796 = vst [vmem:[#allocation21_spill] sm:$0xff] %v1864_v21  ;;  %v1888_v21 = vrot.slane %v2802_v38, %v1492_v55  ;;  %v1900_v61 = vrot.slane %v2806_v62, %v1492_v55  ;;  %v2809_v38 = vrot.slane %v1482_v6, %v1494_v51  ;;  %v2813_v63 = vrot.slane %v1482_v6, %v1498_v50 }
  0x1f   :  { %2798 = vst [vmem:[#allocation22_spill] sm:$0xff] %v1870_v18  ;;  %2801 = vst [vmem:[#allocation23_spill] sm:$0xff] %v1882_v32  ;;  %v1894_v18 = vrot.slane %v2804_v33, %v1492_v55  ;;  %v1906_v32 = vrot.slane %v2807_v10, %v1492_v55  ;;  %v2811_v33 = vrot.slane %v1482_v6, %v1496_v42 }
  0x20   :  { %2803 = vst [vmem:[#allocation24_spill] sm:$0xff] %v1888_v21  ;;  %v1912_v21 = vrot.slane %v2809_v38, %v1492_v55  ;;  %v1924_v62 = vrot.slane %v2813_v63, %v1492_v55  ;;  %v2815_v10 = vrot.slane %v1484_v41, %v1492_v55  ;;  %v2817_v38 = vrot.slane %v1484_v41, %v1494_v51 }
  0x21   :  { %2805 = vst [vmem:[#allocation25_spill] sm:$0xff] %v1894_v18  ;;  %2808 = vst [vmem:[#allocation26_spill] sm:$0xff] %v1906_v32  ;;  %v1918_v18 = vrot.slane %v2811_v33, %v1492_v55  ;;  %v2819_v33 = vrot.slane %v1484_v41, %v1496_v42  ;;  %v2821_v6 = vrot.slane %v1484_v41, %v1498_v50 }
  0x22   :  { %2810 = vst [vmem:[#allocation27_spill] sm:$0xff] %v1912_v21  ;;  %2814 = vst [vmem:[#allocation29_spill] sm:$0xff] %v1924_v62  ;;  %v1930_v32 = vrot.slane %v2815_v10, %v1492_v55  ;;  %v1936_v21 = vrot.slane %v2817_v38, %v1492_v55  ;;  %v2823_v10 = vrot.slane %v1486_v16, %v1492_v55 }
  0x23   :  { %2812 = vst [vmem:[#allocation28_spill] sm:$0xff] %v1918_v18  ;;  %v1942_v18 = vrot.slane %v2819_v33, %v1492_v55  ;;  %v1948_v63 = vrot.slane %v2821_v6, %v1492_v55  ;;  %v2825_v38 = vrot.slane %v1486_v16, %v1494_v51  ;;  %v2827_v33 = vrot.slane %v1486_v16, %v1496_v42 }
  0x24   :  { %2816 = vst [vmem:[#allocation30_spill] sm:$0xff] %v1930_v32  ;;  %2818 = vst [vmem:[#allocation31_spill] sm:$0xff] %v1936_v21  ;;  %v1954_v32 = vrot.slane %v2823_v10, %v1492_v55  ;;  %v2829_v41 = vrot.slane %v1486_v16, %v1498_v50  ;;  %v2831_v10 = vrot.slane %v1488_v15, %v1492_v55 }
  0x25   :  { %2820 = vst [vmem:[#allocation32_spill] sm:$0xff] %v1942_v18  ;;  %2822 = vst [vmem:[#allocation33_spill] sm:$0xff] %v1948_v63  ;;  %v1960_v21 = vrot.slane %v2825_v38, %v1492_v55  ;;  %v1966_v18 = vrot.slane %v2827_v33, %v1492_v55  ;;  %v2833_v38 = vrot.slane %v1488_v15, %v1494_v51 }
  0x26   :  { %2824 = vst [vmem:[#allocation34_spill] sm:$0xff] %v1954_v32  ;;  %v1972_v6 = vrot.slane %v2829_v41, %v1492_v55  ;;  %v1978_v32 = vrot.slane %v2831_v10, %v1492_v55  ;;  %v2835_v33 = vrot.slane %v1488_v15, %v1496_v42  ;;  %v2837_v16 = vrot.slane %v1488_v15, %v1498_v50 }
  0x27   :  { %2826 = vst [vmem:[#allocation35_spill] sm:$0xff] %v1960_v21  ;;  %2828 = vst [vmem:[#allocation36_spill] sm:$0xff] %v1966_v18  ;;  %v1984_v21 = vrot.slane %v2833_v38, %v1492_v55  ;;  %v2839_v10 = vrot.slane %v1490_v12, %v1492_v55  ;;  %v2841_v38 = vrot.slane %v1490_v12, %v1494_v51 }
  0x28   :  { %2830 = vst [vmem:[#allocation37_spill] sm:$0xff] %v1972_v6  ;;  %2832 = vst [vmem:[#allocation38_spill] sm:$0xff] %v1978_v32  ;;  %v1990_v18 = vrot.slane %v2835_v33, %v1492_v55  ;;  %v1996_v41 = vrot.slane %v2837_v16, %v1492_v55  ;;  %v2843_v33 = vrot.slane %v1490_v12, %v1496_v42 }
  0x29   :  { %2834 = vst [vmem:[#allocation39_spill] sm:$0xff] %v1984_v21  ;;  %v2002_v32 = vrot.slane %v2839_v10, %v1492_v55  ;;  %v2008_v21 = vrot.slane %v2841_v38, %v1492_v55  ;;  %v2845_v15 = vrot.slane %v1490_v12, %v1498_v50  ;;  %v2847_v10 = vrot.slane %v1500_v47, %v1492_v55 }
  0x2a   :  { %2836 = vst [vmem:[#allocation40_spill] sm:$0xff] %v1990_v18  ;;  %2838 = vst [vmem:[#allocation41_spill] sm:$0xff] %v1996_v41  ;;  %v2014_v18 = vrot.slane %v2843_v33, %v1492_v55  ;;  %v2849_v38 = vrot.slane %v1500_v47, %v1494_v51  ;;  %v2037_v33 = vld [vmem:[%s2715_s0 + $0x150] sm:$0xff]  ;;  %v2852_v12 = vrot.slane %v1500_v47, %v1496_v42 }
  0x2b   :  { %2840 = vst [vmem:[#allocation42_spill] sm:$0xff] %v2002_v32  ;;  %2842 = vst [vmem:[#allocation43_spill] sm:$0xff] %v2008_v21  ;;  %v2020_v16 = vrot.slane %v2845_v15, %v1492_v55  ;;  %v2026_v32 = vrot.slane %v2847_v10, %v1492_v55  ;;  %v2854_v10 = vrot.slane %v1500_v47, %v1498_v50 }
  0x2c   :  { %2844 = vst [vmem:[#allocation44_spill] sm:$0xff] %v2014_v18  ;;  %v2032_v21 = vrot.slane %v2849_v38, %v1492_v55  ;;  %2851 = vst [vmem:[#allocation48_spill] sm:$0xff] %v2037_v33  ;;  %v2043_v15 = vrot.slane %v2852_v12, %v1492_v55  ;;  %v2856_v38 = vrot.slane %v1502_v49, %v1492_v55  ;;  %v2066_v12 = vld [vmem:[%s2715_s0 + $0x158] sm:$0xff] }
  0x2d   :  { %2846 = vst [vmem:[#allocation45_spill] sm:$0xff] %v2020_v16  ;;  %2848 = vst [vmem:[#allocation46_spill] sm:$0xff] %v2026_v32  ;;  %v2049_v32 = vrot.slane %v2854_v10, %v1492_v55  ;;  %v2858_v16 = vrot.slane %v1502_v49, %v1494_v51  ;;  %v2861_v47 = vrot.slane %v1502_v49, %v1496_v42 }
  0x2e   :  { %2850 = vst [vmem:[#allocation47_spill] sm:$0xff] %v2032_v21  ;;  %2853 = vst [vmem:[#allocation49_spill] sm:$0xff] %v2043_v15  ;;  %v2055_v21 = vrot.slane %v2856_v38, %v1492_v55  ;;  %v2863_v38 = vrot.slane %v1502_v49, %v1498_v50  ;;  %v2100_v49 = vld [vmem:[%s2715_s0 + $0x168] sm:$0xff]  ;;  %v368_v41 = vrot.slane %v1694_v34, %v1492_v55 }
  0x2f   :  { %2855 = vst [vmem:[#allocation50_spill] sm:$0xff] %v2049_v32  ;;  %v2061_v18 = vrot.slane %v2858_v16, %v1492_v55  ;;  %2860 = vst [vmem:[#allocation53_spill] sm:$0xff] %v2066_v12  ;;  %v2072_v10 = vrot.slane %v2861_v47, %v1492_v55  ;;  %v2865_v16 = vrot.slane %v1504_v48, %v1492_v55  ;;  %v2095_v47 = vld [vmem:[%s2715_s0 + $0x160] sm:$0xff]  ;;  %v2151_v34 = vld [vmem:[%s2716_s1 + $0x8] sm:$0xff] }
  0x30   :  { %2857 = vst [vmem:[#allocation51_spill] sm:$0xff] %v2055_v21  ;;  %v2078_v21 = vrot.slane %v2863_v38, %v1492_v55  ;;  %v2867_v32 = vrot.slane %v1504_v48, %v1494_v51  ;;  %2869 = vst [vmem:[#allocation58_spill] sm:$0xff] %v2095_v47  ;;  %v2871_v38 = vrot.slane %v1504_v48, %v1496_v42 }
  0x31   :  { %2859 = vst [vmem:[#allocation52_spill] sm:$0xff] %v2061_v18  ;;  %2862 = vst [vmem:[#allocation54_spill] sm:$0xff] %v2072_v10  ;;  %v2084_v18 = vrot.slane %v2865_v16, %v1492_v55  ;;  %v2137_v10 = vld [vmem:[%s2715_s0 + $0x178] sm:$0xff]  ;;  %v240_v12 = vrot.slane %v1736_v2, %v1492_v55  ;;  %v2186_v63 = vrot.slane %v244_v9, %v1492_v55  ;;  %v2880_v9 = vunpack.c.h.bf16 %v1350_v3 }
  0x32   :  { %2864 = vst [vmem:[#allocation55_spill] sm:$0xff] %v2078_v21  ;;  %v2090_v15 = vrot.slane %v2867_v32, %v1492_v55  ;;  %2870 = vst [vmem:[#allocation59_spill] sm:$0xff] %v2100_v49  ;;  %v2106_v16 = vrot.slane %v2871_v38, %v1492_v55  ;;  %v2873_v32 = vrot.slane %v1504_v48, %v1498_v50  ;;  %v2127_v48 = vld [vmem:[%s2715_s0 + $0x170] sm:$0xff] }
  0x33   :  { %2866 = vst [vmem:[#allocation56_spill] sm:$0xff] %v2084_v18  ;;  %v228_v38 = vrot.slane %v1716_v39, %v1494_v51  ;;  %v2875_v18 = vrot.slane %v1716_v39, %v1492_v55  ;;  %v858_v51 = vrot.slane %v368_v41, %v1492_v55  ;;  %v2183_v6 = vrot.slane %v240_v12, %v1492_v55 }
  0x34   :  { %2868 = vst [vmem:[#allocation57_spill] sm:$0xff] %v2090_v15  ;;  %2872 = vst [vmem:[#allocation60_spill] sm:$0xff] %v2106_v16  ;;  %v2112_v15 = vrot.slane %v2873_v32, %v1492_v55  ;;  %v232_v16 = vrot.slane %v1716_v39, %v1496_v42  ;;  %v2876_v41 = vunpack.c.l.bf16 %v1335_v0  ;;  %v2208_v21 = vmul.f32 %v1747_v44, %v2880_v9 }
  0x35   :  { %v714_v32 = vrot.slane %v2875_v18, %v1492_v55  ;;  %v718_v47 = vrot.slane %v228_v38, %v1492_v55  ;;  %v2173_v18 = vunpack.c.l.bf16 %v2151_v34  ;;  %v2882_v0 = vunpack.c.h.bf16 %v1355_v4 }
  0x36   :  { %2874 = vst [vmem:[#allocation61_spill] sm:$0xff] %v2112_v15  ;;  %v236_v15 = vrot.slane %v1716_v39, %v1498_v50  ;;  %v722_v33 = vrot.slane %v232_v16, %v1492_v55  ;;  %v2878_v39 = vunpack.c.l.bf16 %v1340_v1  ;;  %v2885_v44 = vunpack.c.l.bf16 %v1365_v7 }
  0x37   :  { %v2190_v62 = vmul.f32 %v714_v32, %v2876_v41  ;;  %v2194_v49 = vmul.f32 %v718_v47, %v2877_v46  ;;  %v2881_v32 = vunpack.c.l.bf16 %v1355_v4  ;;  %v2217_v46 = vmul.f32 %v1750_v52, %v2882_v0 }
  0x38   :  { %v2180_v16 = vrot.slane %v236_v15, %v1492_v55  ;;  %v2198_v38 = vmul.f32 %v722_v33, %v2878_v39  ;;  %v2879_v15 = vunpack.c.l.bf16 %v1350_v3  ;;  %v2883_v33 = vunpack.c.l.bf16 %v1360_v5 }
  0x39   :  { %v2212_v41 = vmul.f32 %v858_v51, %v2881_v32  ;;  %v2232_v51 = vmul.f32 %v1762_v60, %v2885_v44  ;;  %v2886_v4 = vunpack.c.h.bf16 %v1365_v7  ;;  %v2887_v39 = vunpack.c.l.bf16 %v1370_v8 }
  0x3a   :  { %v2203_v12 = vmul.f32 %v1744_v54, %v2879_v15  ;;  %v2222_v47 = vmul.f32 %v1753_v37, %v2883_v33  ;;  %v2884_v54 = vunpack.c.h.bf16 %v1360_v5  ;;  %v2888_v5 = vunpack.c.h.bf16 %v1370_v8 }
  0x3b   :  { %v2237_v52 = vmul.f32 %v1768_v40, %v2886_v4  ;;  %v2242_v37 = vmul.f32 %v1774_v59, %v2887_v39  ;;  %v2889_v15 = vunpack.c.l.bf16 %v1379_v13  ;;  %v2890_v7 = vunpack.c.h.bf16 %v1379_v13  ;;  %v2903_v4 = vld [vmem:[#allocation21_spill] sm:$0xff]  ;;  %v2904_v39 = vld [vmem:[#allocation3_spill] sm:$0xff] }
  0x3c   :  { %v2227_v3 = vmul.f32 %v1756_v36, %v2884_v54  ;;  %v2247_v36 = vmul.f32 %v1780_v45, %v2888_v5  ;;  %v2891_v9 = vunpack.c.l.bf16 %v1384_v14  ;;  %v2892_v8 = vunpack.c.h.bf16 %v1384_v14 }
  0x3d   :  { %v2252_v60 = vmul.f32 %v1786_v29, %v2889_v15  ;;  %v2257_v40 = vmul.f32 %v1792_v43, %v2890_v7  ;;  %v2893_v32 = vunpack.c.l.bf16 %v1393_v19  ;;  %v2894_v13 = vunpack.c.h.bf16 %v1393_v19  ;;  %v2906_v15 = vld [vmem:[#allocation22_spill] sm:$0xff]  ;;  %v2908_v7 = vld [vmem:[#allocation5_spill] sm:$0xff] }
  0x3e   :  { %v2262_v59 = vmul.f32 %v1798_v30, %v2891_v9  ;;  %v2267_v45 = vmul.f32 %v1804_v53, %v2892_v8  ;;  %v2895_v0 = vunpack.c.l.bf16 %v1398_v20  ;;  %v2896_v14 = vunpack.c.h.bf16 %v1398_v20  ;;  %v2910_v8 = vld [vmem:[#allocation23_spill] sm:$0xff] }
  0x3f   :  { %v2272_v29 = vmul.f32 %v1810_v35, %v2893_v32  ;;  %v2277_v43 = vmul.f32 %v1816_v22, %v2894_v13  ;;  %v2897_v33 = vunpack.c.l.bf16 %v1407_v25  ;;  %v2898_v19 = vunpack.c.h.bf16 %v1407_v25  ;;  %v2912_v32 = vld [vmem:[#allocation24_spill] sm:$0xff] }
  0x40   :  { %v2282_v30 = vmul.f32 %v1822_v27, %v2895_v0  ;;  %v2287_v53 = vmul.f32 %v1828_v56, %v2896_v14  ;;  %v2899_v54 = vunpack.c.l.bf16 %v1412_v26  ;;  %v2900_v20 = vunpack.c.h.bf16 %v1412_v26  ;;  %v2913_v0 = vld [vmem:[#allocation6_spill] sm:$0xff] }
  0x41   :  { %v2292_v35 = vmul.f32 %v1834_v28, %v2897_v33  ;;  %v2297_v22 = vmul.f32 %v1840_v24, %v2898_v19  ;;  %v2901_v44 = vunpack.c.l.bf16 %v1421_v31  ;;  %v2902_v25 = vunpack.c.h.bf16 %v1421_v31  ;;  %v2915_v33 = vld [vmem:[#allocation25_spill] sm:$0xff] }
  0x42   :  { %v2302_v27 = vmul.f32 %v1846_v23, %v2899_v54  ;;  %v2307_v56 = vmul.f32 %v1852_v57, %v2900_v20  ;;  %v2905_v5 = vunpack.c.l.bf16 %v2904_v39  ;;  %v2907_v26 = vunpack.c.h.bf16 %v2904_v39  ;;  %v2917_v20 = vld [vmem:[#allocation7_spill] sm:$0xff] }
  0x43   :  { %v2312_v28 = vmul.f32 %v1858_v17, %v2901_v44  ;;  %v2317_v24 = vmul.f32 %v2903_v4, %v2902_v25  ;;  %v2909_v9 = vunpack.c.l.bf16 %v2908_v7  ;;  %v2911_v31 = vunpack.c.h.bf16 %v2908_v7  ;;  %v2919_v25 = vld [vmem:[#allocation26_spill] sm:$0xff] }
  0x44   :  { %v2322_v23 = vmul.f32 %v2906_v15, %v2905_v5  ;;  %v2327_v57 = vmul.f32 %v1876_v58, %v2907_v26  ;;  %v2914_v14 = vunpack.c.l.bf16 %v2913_v0  ;;  %v2916_v54 = vunpack.c.h.bf16 %v2913_v0  ;;  %v2921_v5 = vld [vmem:[#allocation27_spill] sm:$0xff]  ;;  %v2923_v26 = vld [vmem:[#allocation8_spill] sm:$0xff]  ;;  %v2930_v0 = vld [vmem:[#allocation9_spill] sm:$0xff] }
  0x45   :  { %v2332_v17 = vmul.f32 %v2910_v8, %v2909_v9  ;;  %v2337_v13 = vmul.f32 %v2912_v32, %v2911_v31  ;;  %v2918_v44 = vunpack.c.l.bf16 %v2917_v20  ;;  %v2920_v39 = vunpack.c.h.bf16 %v2917_v20  ;;  %v2925_v9 = vld [vmem:[#allocation28_spill] sm:$0xff]  ;;  %v2928_v32 = vld [vmem:[#allocation29_spill] sm:$0xff] }
  0x46   :  { %v2342_v19 = vmul.f32 %v2915_v33, %v2914_v14  ;;  %v2347_v58 = vmul.f32 %v1900_v61, %v2916_v54  ;;  %v2924_v7 = vunpack.c.l.bf16 %v2923_v26  ;;  %v2927_v31 = vunpack.c.h.bf16 %v2923_v26  ;;  %v2932_v33 = vld [vmem:[#allocation30_spill] sm:$0xff] }
  0x47   :  { %v2352_v4 = vmul.f32 %v2919_v25, %v2918_v44  ;;  %v2357_v15 = vmul.f32 %v2921_v5, %v2920_v39  ;;  %v2931_v14 = vunpack.c.l.bf16 %v2930_v0  ;;  %v2934_v20 = vunpack.c.h.bf16 %v2930_v0  ;;  %v2935_v44 = vld [vmem:[#allocation31_spill] sm:$0xff]  ;;  %v2937_v39 = vld [vmem:[#allocation10_spill] sm:$0xff] }
  0x48   :  { %v2362_v8 = vmul.f32 %v2925_v9, %v2924_v7  ;;  %v2367_v61 = vmul.f32 %v2928_v32, %v2927_v31  ;;  %v2938_v5 = vunpack.c.l.bf16 %v2937_v39  ;;  %v2941_v26 = vunpack.c.h.bf16 %v2937_v39  ;;  %v2942_v9 = vld [vmem:[#allocation33_spill] sm:$0xff] }
  0x49   :  { %2922 = vst [vmem:[#allocation21_spill] sm:$0xff] %v2357_v15  ;;  %v2372_v54 = vmul.f32 %v2932_v33, %v2931_v14  ;;  %v2377_v25 = vmul.f32 %v2935_v44, %v2934_v20  ;;  %v2939_v15 = vld [vmem:[#allocation32_spill] sm:$0xff]  ;;  %v2944_v32 = vld [vmem:[#allocation13_spill] sm:$0xff]  ;;  %v2949_v33 = vld [vmem:[#allocation35_spill] sm:$0xff] }
  0x4a   :  { %2926 = vst [vmem:[#allocation3_spill] sm:$0xff] %v2362_v8  ;;  %2929 = vst [vmem:[#allocation22_spill] sm:$0xff] %v2367_v61  ;;  %v2382_v7 = vmul.f32 %v2939_v15, %v2938_v5  ;;  %v2387_v31 = vmul.f32 %v2942_v9, %v2941_v26  ;;  %v2945_v61 = vunpack.c.l.bf16 %v2944_v32  ;;  %v2946_v8 = vld [vmem:[#allocation34_spill] sm:$0xff]  ;;  %v2948_v0 = vunpack.c.h.bf16 %v2944_v32  ;;  %v2956_v5 = vld [vmem:[#allocation37_spill] sm:$0xff] }
  0x4b   :  { %2933 = vst [vmem:[#allocation5_spill] sm:$0xff] %v2372_v54  ;;  %2936 = vst [vmem:[#allocation23_spill] sm:$0xff] %v2377_v25  ;;  %v2951_v44 = vld [vmem:[#allocation14_spill] sm:$0xff]  ;;  %v2953_v54 = vld [vmem:[#allocation36_spill] sm:$0xff] }
  0x4c   :  { %2940 = vst [vmem:[#allocation24_spill] sm:$0xff] %v2382_v7  ;;  %2943 = vst [vmem:[#allocation6_spill] sm:$0xff] %v2387_v31  ;;  %v2392_v14 = vmul.f32 %v2946_v8, %v2945_v61  ;;  %v2397_v20 = vmul.f32 %v2949_v33, %v2948_v0  ;;  %v2952_v25 = vunpack.c.l.bf16 %v2951_v44  ;;  %v2955_v39 = vunpack.c.h.bf16 %v2951_v44  ;;  %v2958_v9 = vld [vmem:[#allocation16_spill] sm:$0xff]  ;;  %v2960_v7 = vld [vmem:[#allocation38_spill] sm:$0xff] }
  0x4d   :  { %v2959_v31 = vunpack.c.l.bf16 %v2958_v9  ;;  %v2962_v61 = vunpack.c.h.bf16 %v2958_v9  ;;  %v2963_v32 = vld [vmem:[#allocation39_spill] sm:$0xff]  ;;  %v2965_v33 = vld [vmem:[#allocation17_spill] sm:$0xff] }
  0x4e   :  { %2947 = vst [vmem:[#allocation25_spill] sm:$0xff] %v2392_v14  ;;  %2950 = vst [vmem:[#allocation7_spill] sm:$0xff] %v2397_v20  ;;  %v2402_v15 = vmul.f32 %v2953_v54, %v2952_v25  ;;  %v2407_v26 = vmul.f32 %v2956_v5, %v2955_v39  ;;  %v2966_v20 = vunpack.c.l.bf16 %v2965_v33  ;;  %v2967_v14 = vld [vmem:[#allocation40_spill] sm:$0xff]  ;;  %v2969_v25 = vunpack.c.h.bf16 %v2965_v33  ;;  %v2970_v44 = vld [vmem:[#allocation41_spill] sm:$0xff] }
  0x4f   :  { %v2412_v8 = vmul.f32 %v2960_v7, %v2959_v31  ;;  %v2417_v0 = vmul.f32 %v2963_v32, %v2962_v61  ;;  %v2972_v5 = vld [vmem:[#allocation18_spill] sm:$0xff]  ;;  %v2977_v9 = vld [vmem:[#allocation43_spill] sm:$0xff]  ;;  %v2984_v33 = vld [vmem:[#allocation45_spill] sm:$0xff] }
  0x50   :  { %2954 = vst [vmem:[#allocation26_spill] sm:$0xff] %v2402_v15  ;;  %2957 = vst [vmem:[#allocation27_spill] sm:$0xff] %v2407_v26  ;;  %v2422_v54 = vmul.f32 %v2967_v14, %v2966_v20  ;;  %v2427_v39 = vmul.f32 %v2970_v44, %v2969_v25  ;;  %v2973_v26 = vunpack.c.l.bf16 %v2972_v5  ;;  %v2974_v15 = vld [vmem:[#allocation42_spill] sm:$0xff]  ;;  %v2976_v31 = vunpack.c.h.bf16 %v2972_v5  ;;  %v2979_v32 = vld [vmem:[#allocation19_spill] sm:$0xff] }
  0x51   :  { %2961 = vst [vmem:[#allocation8_spill] sm:$0xff] %v2412_v8  ;;  %2964 = vst [vmem:[#allocation28_spill] sm:$0xff] %v2417_v0  ;;  %v2980_v0 = vunpack.c.l.bf16 %v2979_v32  ;;  %v2981_v8 = vld [vmem:[#allocation44_spill] sm:$0xff]  ;;  %v2983_v20 = vunpack.c.h.bf16 %v2979_v32  ;;  %v2991_v5 = vld [vmem:[#allocation47_spill] sm:$0xff] }
  0x52   :  { %2968 = vst [vmem:[#allocation29_spill] sm:$0xff] %v2422_v54  ;;  %2971 = vst [vmem:[#allocation9_spill] sm:$0xff] %v2427_v39  ;;  %v2432_v7 = vmul.f32 %v2974_v15, %v2973_v26  ;;  %v2437_v61 = vmul.f32 %v2977_v9, %v2976_v31  ;;  %v2986_v44 = vld [vmem:[#allocation48_spill] sm:$0xff]  ;;  %v2988_v54 = vld [vmem:[#allocation46_spill] sm:$0xff] }
  0x53   :  { %v2442_v14 = vmul.f32 %v2981_v8, %v2980_v0  ;;  %v2447_v25 = vmul.f32 %v2984_v33, %v2983_v20  ;;  %v2987_v39 = vunpack.c.l.bf16 %v2986_v44  ;;  %v2990_v26 = vunpack.c.h.bf16 %v2986_v44  ;;  %v2993_v9 = vld [vmem:[#allocation53_spill] sm:$0xff]  ;;  %v2998_v32 = vld [vmem:[#allocation50_spill] sm:$0xff]  ;;  %v3002_v44 = vld [vmem:[#allocation51_spill] sm:$0xff] }
  0x54   :  { %2975 = vst [vmem:[#allocation30_spill] sm:$0xff] %v2432_v7  ;;  %2978 = vst [vmem:[#allocation31_spill] sm:$0xff] %v2437_v61  ;;  %v2994_v61 = vunpack.c.l.bf16 %v2993_v9  ;;  %v2995_v7 = vld [vmem:[#allocation49_spill] sm:$0xff]  ;;  %v2997_v0 = vunpack.c.h.bf16 %v2993_v9  ;;  %v3009_v9 = vld [vmem:[#allocation54_spill] sm:$0xff] }
  0x55   :  { %2982 = vst [vmem:[#allocation10_spill] sm:$0xff] %v2442_v14  ;;  %2985 = vst [vmem:[#allocation32_spill] sm:$0xff] %v2447_v25  ;;  %v2452_v15 = vmul.f32 %v2988_v54, %v2987_v39  ;;  %v2457_v31 = vmul.f32 %v2991_v5, %v2990_v26  ;;  %v14_v54 = vld [vmem:[%s2715_s0 + $0x18] sm:$0xff]  ;;  %v3000_v39 = vld [vmem:[#allocation58_spill] sm:$0xff]  ;;  %v3014_v25 = vunpack.c.l.bf16 %v2127_v48 }
  0x56   :  { %v2462_v8 = vmul.f32 %v2995_v7, %v2994_v61  ;;  %v2467_v20 = vmul.f32 %v2998_v32, %v2997_v0  ;;  %v3001_v33 = vunpack.c.l.bf16 %v3000_v39  ;;  %v3004_v26 = vunpack.c.h.bf16 %v3000_v39  ;;  %v3005_v5 = vld [vmem:[#allocation52_spill] sm:$0xff]  ;;  %v3007_v7 = vld [vmem:[#allocation59_spill] sm:$0xff] }
  0x57   :  { %2989 = vst [vmem:[#allocation33_spill] sm:$0xff] %v2452_v15  ;;  %2992 = vst [vmem:[#allocation13_spill] sm:$0xff] %v2457_v31  ;;  %v3008_v61 = vunpack.c.l.bf16 %v3007_v7  ;;  %v3011_v0 = vunpack.c.h.bf16 %v3007_v7  ;;  %v3012_v32 = vld [vmem:[#allocation55_spill] sm:$0xff]  ;;  %v3015_v14 = vld [vmem:[#allocation56_spill] sm:$0xff]  ;;  %v3017_v39 = vunpack.c.h.bf16 %v2127_v48  ;;  %v3023_v7 = vunpack.c.h.bf16 %v2137_v10 }
  0x58   :  { %2996 = vst [vmem:[#allocation34_spill] sm:$0xff] %v2462_v8  ;;  %2999 = vst [vmem:[#allocation35_spill] sm:$0xff] %v2467_v20  ;;  %v2475_v15 = vmul.f32 %v3002_v44, %v3001_v33  ;;  %v2480_v31 = vmul.f32 %v3005_v5, %v3004_v26  ;;  %v2495_v33 = vmul.f32 %v3015_v14, %v3014_v25  ;;  %v3018_v44 = vld [vmem:[#allocation57_spill] sm:$0xff]  ;;  %v3020_v5 = vunpack.c.l.bf16 %v2137_v10  ;;  %v3028_v48 = vld [vmem:[#allocation11_spill] sm:$0xff] }
  0x59   :  { %v2485_v8 = vmul.f32 %v3009_v9, %v3008_v61  ;;  %v2490_v20 = vmul.f32 %v3012_v32, %v3011_v0  ;;  %v2500_v26 = vmul.f32 %v3018_v44, %v3017_v39  ;;  %v3024_v9 = vld [vmem:[#allocation61_spill] sm:$0xff]  ;;  %v3026_v32 = vunpack.c.h.bf16 %v1340_v1 }
  0x5a   :  { %3003 = vst [vmem:[#allocation14_spill] sm:$0xff] %v2475_v15  ;;  %3006 = vst [vmem:[#allocation36_spill] sm:$0xff] %v2480_v31  ;;  %v3021_v31 = vld [vmem:[#allocation60_spill] sm:$0xff]  ;;  %v2510_v0 = vmul.f32 %v3024_v9, %v3023_v7  ;;  %v3027_v25 = vunpack.c.l.bf16 %v2142_v11  ;;  %v3029_v39 = vrot.slane %v3028_v48, %v1492_v55  ;;  %v1201_v7 = vadd.f32 %v2194_v49, %v2190_v62 }
  0x5b   :  { %3010 = vst [vmem:[#allocation37_spill] sm:$0xff] %v2485_v8  ;;  %3013 = vst [vmem:[#allocation16_spill] sm:$0xff] %v2490_v20  ;;  %v2505_v61 = vmul.f32 %v3021_v31, %v3020_v5  ;;  %v1106_v14 = vmul.f32 %v2180_v16, %v3026_v32  ;;  %v3032_v31 = vld [vmem:[#allocation12_spill] sm:$0xff]  ;;  %v66_v1 = vunpack.c.l.bf16 %v14_v54  ;;  %v15_v16 = vld [vmem:[%s2715_s0 + $0x20] sm:$0xff]  ;;  %v256_v9 = vrot.slane %v2173_v18, %v1492_v55 }
  0x5c   :  { %3016 = vst [vmem:[#allocation38_spill] sm:$0xff] %v2495_v33  ;;  %3019 = vst [vmem:[#allocation39_spill] sm:$0xff] %v2500_v26  ;;  %v2520_v44 = vmul.f32 %v3029_v39, %v3027_v25  ;;  %v3031_v26 = vunpack.c.h.bf16 %v2142_v11  ;;  %v3033_v5 = vrot.slane %v3032_v31, %v1492_v55  ;;  %v3035_v11 = vrot.slane %v1736_v2, %v1496_v42  ;;  %v3036_v25 = vld [vmem:[#allocation2_spill] sm:$0xff]  ;;  %v3038_v49 = vld [vmem:[#allocation4_spill] sm:$0xff] }
  0x5d   :  { %3022 = vst [vmem:[#allocation17_spill] sm:$0xff] %v2505_v61  ;;  %3025 = vst [vmem:[#allocation40_spill] sm:$0xff] %v2510_v0  ;;  %v3037_v48 = vunpack.c.l.bf16 %v3036_v25  ;;  %v1202_v39 = vadd.f32 %v1201_v7, %v2198_v38  ;;  %v67_v62 = vunpack.c.h.bf16 %v14_v54  ;;  %v260_v31 = vrot.slane %v2173_v18, %v3038_v49 }
  0x5e   :  { %3030 = vst [vmem:[#allocation41_spill] sm:$0xff] %v2520_v44  ;;  %v2527_v10 = vmul.f32 %v3033_v5, %v3031_v26  ;;  %v738_v32 = vrot.slane %v3035_v11, %v1492_v55  ;;  %v3039_v5 = vrot.slane %v1736_v2, %v1498_v50  ;;  %v3040_v44 = vunpack.c.h.bf16 %v3036_v25 }
  0x5f   :  { %v1107_v26 = vmul.f32 %v2183_v6, %v3037_v48  ;;  %v1203_v11 = vadd.f32 %v1202_v39, %v1106_v14  ;;  %v68_v61 = vunpack.c.l.bf16 %v15_v16  ;;  %v174_v33 = vunpack.c.h.bf16 %v2151_v34  ;;  %v16_v6 = vld [vmem:[%s2715_s0 + $0x28] sm:$0xff]  ;;  %v17_v39 = vld [vmem:[%s2715_s0 + $0x30] sm:$0xff] }
  0x60   :  { %3034 = vst [vmem:[#allocation18_spill] sm:$0xff] %v2527_v10  ;;  %v742_v10 = vrot.slane %v3039_v5, %v1492_v55  ;;  %v1108_v0 = vmul.f32 %v2186_v63, %v3040_v44  ;;  %v264_v38 = vrot.slane %v2173_v18, %v1496_v42  ;;  %v746_v54 = vrot.slane %v256_v9, %v1492_v55  ;;  %v160_v5 = vld [vmem:[%s2716_s1 + $0x10] sm:$0xff] }
  0x61   :  { %v1109_v7 = vmul.f32 %v738_v32, %v66_v1  ;;  %v1204_v2 = vadd.f32 %v1203_v11, %v1107_v26  ;;  %v69_v48 = vunpack.c.h.bf16 %v15_v16  ;;  %v268_v25 = vrot.slane %v2173_v18, %v1498_v50 }
  0x62   :  { %v750_v63 = vrot.slane %v260_v31, %v1492_v55  ;;  %v1110_v14 = vmul.f32 %v742_v10, %v67_v62  ;;  %v70_v34 = vunpack.c.l.bf16 %v16_v6  ;;  %v272_v1 = vrot.slane %v174_v33, %v1492_v55 }
  0x63   :  { %v1205_v44 = vadd.f32 %v1204_v2, %v1108_v0  ;;  %v754_v16 = vrot.slane %v264_v38, %v1492_v55  ;;  %v1111_v9 = vmul.f32 %v746_v54, %v68_v61  ;;  %v71_v18 = vunpack.c.h.bf16 %v16_v6  ;;  %v18_v2 = vld [vmem:[%s2715_s0 + $0x38] sm:$0xff] }
  0x64   :  { %v276_v26 = vrot.slane %v174_v33, %v3038_v49  ;;  %v758_v0 = vrot.slane %v268_v25, %v1492_v55  ;;  %v1112_v10 = vmul.f32 %v750_v63, %v69_v48  ;;  %v72_v31 = vunpack.c.l.bf16 %v17_v39 }
  0x65   :  { %v1206_v32 = vadd.f32 %v1205_v44, %v1109_v7  ;;  %v175_v11 = vunpack.c.l.bf16 %v160_v5  ;;  %v280_v20 = vrot.slane %v174_v33, %v1496_v42  ;;  %v762_v8 = vrot.slane %v272_v1, %v1492_v55 }
  0x66   :  { %v1113_v38 = vmul.f32 %v754_v16, %v70_v34  ;;  %v73_v54 = vunpack.c.h.bf16 %v17_v39  ;;  %v284_v6 = vrot.slane %v174_v33, %v1498_v50  ;;  %v766_v7 = vrot.slane %v276_v26, %v1492_v55 }
  0x67   :  { %v1207_v62 = vadd.f32 %v1206_v32, %v1110_v14  ;;  %v1114_v25 = vmul.f32 %v758_v0, %v71_v18  ;;  %v74_v63 = vunpack.c.l.bf16 %v18_v2  ;;  %v19_v14 = vld [vmem:[%s2715_s0 + $0x40] sm:$0xff]  ;;  %v288_v44 = vrot.slane %v175_v11, %v1492_v55  ;;  %v20_v0 = vld [vmem:[%s2715_s0 + $0x48] sm:$0xff] }
  0x68   :  { %v770_v32 = vrot.slane %v280_v20, %v1492_v55  ;;  %v1115_v15 = vmul.f32 %v762_v8, %v72_v31  ;;  %v75_v34 = vunpack.c.h.bf16 %v18_v2  ;;  %v292_v39 = vrot.slane %v175_v11, %v3038_v49 }
  0x69   :  { %v1208_v61 = vadd.f32 %v1207_v62, %v1111_v9  ;;  %v774_v33 = vrot.slane %v284_v6, %v1492_v55  ;;  %v1116_v16 = vmul.f32 %v766_v7, %v73_v54  ;;  %v76_v18 = vunpack.c.l.bf16 %v19_v14  ;;  %v161_v7 = vld [vmem:[%s2716_s1 + $0x18] sm:$0xff] }
  0x6a   :  { %v176_v26 = vunpack.c.h.bf16 %v160_v5  ;;  %v778_v62 = vrot.slane %v288_v44, %v1492_v55  ;;  %v1117_v20 = vmul.f32 %v770_v32, %v74_v63  ;;  %v77_v31 = vunpack.c.h.bf16 %v19_v14  ;;  %v21_v5 = vld [vmem:[%s2715_s0 + $0x50] sm:$0xff] }
  0x6b   :  { %v1209_v48 = vadd.f32 %v1208_v61, %v1112_v10  ;;  %v296_v10 = vrot.slane %v175_v11, %v1496_v42  ;;  %v300_v2 = vrot.slane %v175_v11, %v1498_v50  ;;  %v1118_v61 = vmul.f32 %v774_v33, %v75_v34  ;;  %v22_v33 = vld [vmem:[%s2715_s0 + $0x58] sm:$0xff] }
  0x6c   :  { %v78_v6 = vunpack.c.l.bf16 %v20_v0  ;;  %v79_v11 = vunpack.c.h.bf16 %v20_v0  ;;  %v308_v14 = vrot.slane %v176_v26, %v3038_v49  ;;  %v80_v34 = vunpack.c.l.bf16 %v21_v5 }
  0x6d   :  { %v1210_v1 = vadd.f32 %v1209_v48, %v1113_v38  ;;  %v782_v38 = vrot.slane %v292_v39, %v1492_v55  ;;  %v1119_v48 = vmul.f32 %v778_v62, %v76_v18  ;;  %v790_v44 = vrot.slane %v300_v2, %v1492_v55 }
  0x6e   :  { %v177_v39 = vunpack.c.l.bf16 %v161_v7  ;;  %v81_v62 = vunpack.c.h.bf16 %v21_v5  ;;  %v316_v0 = vrot.slane %v176_v26, %v1498_v50  ;;  %v82_v2 = vunpack.c.l.bf16 %v22_v33 }
  0x6f   :  { %v1211_v9 = vadd.f32 %v1210_v1, %v1114_v25  ;;  %v304_v25 = vrot.slane %v176_v26, %v1492_v55  ;;  %v1120_v32 = vmul.f32 %v782_v38, %v77_v31  ;;  %v23_v38 = vld [vmem:[%s2715_s0 + $0x60] sm:$0xff] }
  0x70   :  { %v324_v5 = vrot.slane %v177_v39, %v3038_v49 }
  0x71   :  { %v1212_v8 = vadd.f32 %v1211_v9, %v1115_v15  ;;  %v786_v15 = vrot.slane %v296_v10, %v1492_v55  ;;  %v794_v9 = vrot.slane %v304_v25, %v1492_v55 }
  0x73   :  { %v1213_v54 = vadd.f32 %v1212_v8, %v1116_v16  ;;  %v312_v16 = vrot.slane %v176_v26, %v1496_v42  ;;  %v1121_v10 = vmul.f32 %v786_v15, %v78_v6  ;;  %v1122_v8 = vmul.f32 %v790_v44, %v79_v11  ;;  %v24_v44 = vld [vmem:[%s2715_s0 + $0x68] sm:$0xff] }
  0x74   :  { %v83_v6 = vunpack.c.h.bf16 %v22_v33  ;;  %v806_v26 = vrot.slane %v316_v0, %v1492_v55  ;;  %v84_v11 = vunpack.c.l.bf16 %v23_v38  ;;  %v332_v33 = vrot.slane %v177_v39, %v1498_v50 }
  0x75   :  { %v1214_v63 = vadd.f32 %v1213_v54, %v1117_v20  ;;  %v798_v20 = vrot.slane %v308_v14, %v1492_v55  ;;  %v802_v54 = vrot.slane %v312_v16, %v1492_v55  ;;  %v178_v14 = vunpack.c.h.bf16 %v161_v7  ;;  %v25_v7 = vld [vmem:[%s2715_s0 + $0x70] sm:$0xff] }
  0x76   :  { %v86_v0 = vunpack.c.l.bf16 %v24_v44 }
  0x77   :  { %v1215_v1 = vadd.f32 %v1214_v63, %v1118_v61  ;;  %v320_v61 = vrot.slane %v177_v39, %v1492_v55  ;;  %v1123_v63 = vmul.f32 %v794_v9, %v80_v34  ;;  %v1124_v15 = vmul.f32 %v798_v20, %v81_v62 }
  0x78   :  { %v1125_v16 = vmul.f32 %v802_v54, %v82_v2  ;;  %v85_v9 = vunpack.c.h.bf16 %v23_v38  ;;  %v336_v20 = vrot.slane %v178_v14, %v1492_v55  ;;  %v87_v2 = vunpack.c.h.bf16 %v24_v44 }
  0x79   :  { %v1216_v18 = vadd.f32 %v1215_v1, %v1119_v48  ;;  %v810_v1 = vrot.slane %v320_v61, %v1492_v55  ;;  %v340_v38 = vrot.slane %v178_v14, %v3038_v49  ;;  %v348_v44 = vrot.slane %v178_v14, %v1498_v50 }
  0x7b   :  { %v1217_v31 = vadd.f32 %v1216_v18, %v1120_v32  ;;  %v328_v32 = vrot.slane %v177_v39, %v1496_v42  ;;  %v1126_v18 = vmul.f32 %v806_v26, %v83_v6  ;;  %v822_v39 = vrot.slane %v332_v33, %v1492_v55  ;;  %v26_v6 = vld [vmem:[%s2715_s0 + $0x78] sm:$0xff] }
  0x7c   :  { %v826_v26 = vrot.slane %v336_v20, %v1492_v55  ;;  %v830_v49 = vrot.slane %v340_v38, %v1492_v55 }
  0x7d   :  { %v1218_v25 = vadd.f32 %v1217_v31, %v1121_v10  ;;  %v814_v10 = vrot.slane %v324_v5, %v1492_v55  ;;  %v1127_v31 = vmul.f32 %v810_v1, %v84_v11  ;;  %v344_v5 = vrot.slane %v178_v14, %v1496_v42  ;;  %v27_v42 = vld [vmem:[%s2715_s0 + $0x80] sm:$0xff] }
  0x7e   :  { %v89_v11 = vunpack.c.h.bf16 %v25_v7 }
  0x7f   :  { %v1219_v48 = vadd.f32 %v1218_v25, %v1122_v8  ;;  %v818_v8 = vrot.slane %v328_v32, %v1492_v55  ;;  %v1128_v54 = vmul.f32 %v814_v10, %v85_v9  ;;  %v88_v25 = vunpack.c.l.bf16 %v25_v7 }
  0x80   :  { %v1130_v32 = vmul.f32 %v822_v39, %v87_v2  ;;  %v834_v33 = vrot.slane %v344_v5, %v1492_v55  ;;  %v1132_v50 = vmul.f32 %v830_v49, %v89_v11  ;;  %v92_v7 = vunpack.c.l.bf16 %v27_v42 }
  0x81   :  { %v1220_v34 = vadd.f32 %v1219_v48, %v1123_v63  ;;  %v1131_v10 = vmul.f32 %v826_v26, %v88_v25 }
  0x83   :  { %v1221_v62 = vadd.f32 %v1220_v34, %v1124_v15  ;;  %v1129_v15 = vmul.f32 %v818_v8, %v86_v0  ;;  %v3041_v34 = vld [vmem:[#allocation15_spill] sm:$0xff]  ;;  %v838_v0 = vrot.slane %v348_v44, %v1492_v55 }
  0x84   :  { %v352_v9 = vrot.slane %v3041_v34, %v1492_v55 }
  0x85   :  { %v1222_v61 = vadd.f32 %v1221_v62, %v1125_v16  ;;  %v90_v16 = vunpack.c.l.bf16 %v26_v6  ;;  %v91_v62 = vunpack.c.h.bf16 %v26_v6 }
  0x86   :  { %v842_v20 = vrot.slane %v352_v9, %v1492_v55  ;;  %v3043_v9 = vld [vmem:[#allocation21_spill] sm:$0xff] }
  0x87   :  { %v1223_v63 = vadd.f32 %v1222_v61, %v1126_v18  ;;  %v1133_v8 = vmul.f32 %v834_v33, %v90_v16  ;;  %v93_v61 = vunpack.c.h.bf16 %v27_v42  ;;  %v1134_v2 = vmul.f32 %v838_v0, %v91_v62  ;;  %v3044_v33 = vld [vmem:[#allocation3_spill] sm:$0xff]  ;;  %v3048_v62 = vld [vmem:[#allocation24_spill] sm:$0xff]  ;;  %v3049_v0 = vld [vmem:[#allocation6_spill] sm:$0xff] }
  0x88   :  { %v1135_v39 = vmul.f32 %v842_v20, %v92_v7  ;;  %v3047_v42 = vld [vmem:[#allocation23_spill] sm:$0xff]  ;;  %v3052_v7 = vld [vmem:[#allocation26_spill] sm:$0xff] }
  0x89   :  { %v1224_v48 = vadd.f32 %v1223_v63, %v1127_v31  ;;  %v3042_v63 = vld [vmem:[#allocation20_spill] sm:$0xff]  ;;  %v3053_v20 = vld [vmem:[#allocation27_spill] sm:$0xff] }
  0x8a   :  { %v1136_v25 = vmul.f32 %v3042_v63, %v93_v61  ;;  %v3057_v63 = vld [vmem:[#allocation9_spill] sm:$0xff] }
  0x8b   :  { %v1225_v1 = vadd.f32 %v1224_v48, %v1128_v54 }
  0x8d   :  { %v1226_v18 = vadd.f32 %v1225_v1, %v1129_v15 }
  0x8f   :  { %v1227_v14 = vadd.f32 %v1226_v18, %v1130_v32  ;;  %v3046_v18 = vld [vmem:[#allocation5_spill] sm:$0xff] }
  0x91   :  { %v1228_v31 = vadd.f32 %v1227_v14, %v1131_v10  ;;  %v3045_v10 = vld [vmem:[#allocation22_spill] sm:$0xff]  ;;  %v3051_v14 = vld [vmem:[#allocation7_spill] sm:$0xff] }
  0x93   :  { %v1229_v38 = vadd.f32 %v1228_v31, %v1132_v50  ;;  %v3050_v50 = vld [vmem:[#allocation25_spill] sm:$0xff]  ;;  %v3054_v31 = vld [vmem:[#allocation8_spill] sm:$0xff] }
  0x95   :  { %v1230_v54 = vadd.f32 %v1229_v38, %v1133_v8 }
  0x97   :  { %v1231_v5 = vadd.f32 %v1230_v54, %v1134_v2  ;;  %v3055_v2 = vld [vmem:[#allocation28_spill] sm:$0xff] }
  0x99   :  { %v1232_v26 = vadd.f32 %v1231_v5, %v1135_v39  ;;  %v3056_v39 = vld [vmem:[#allocation29_spill] sm:$0xff]  ;;  %v3058_v5 = vld [vmem:[#allocation30_spill] sm:$0xff] }
  0x9b   :  { %v1233_v15 = vadd.f32 %v1232_v26, %v1136_v25 }
  0x9d   :  { %v1234_v6 = vadd.f32 %v1233_v15, %v2203_v12  ;;  %v3059_v15 = vld [vmem:[#allocation31_spill] sm:$0xff] }
  0x9f   :  { %v1235_v48 = vadd.f32 %v1234_v6, %v2208_v21 }
  0xa1   :  { %v1236_v11 = vadd.f32 %v1235_v48, %v2212_v41  ;;  %v3060_v48 = vld [vmem:[#allocation10_spill] sm:$0xff] }
  0xa3   :  { %v1237_v55 = vadd.f32 %v1236_v11, %v2217_v46 }
  0xa5   :  { %v1238_v44 = vadd.f32 %v1237_v55, %v2222_v47  ;;  %v3061_v55 = vld [vmem:[#allocation32_spill] sm:$0xff] }
  0xa7   :  { %v1239_v49 = vadd.f32 %v1238_v44, %v2227_v3 }
  0xa9   :  { %v1240_v32 = vadd.f32 %v1239_v49, %v2232_v51  ;;  %v3062_v49 = vld [vmem:[#allocation33_spill] sm:$0xff] }
  0xab   :  { %v1241_v1 = vadd.f32 %v1240_v32, %v2237_v52 }
  0xad   :  { %v1242_v16 = vadd.f32 %v1241_v1, %v2242_v37  ;;  %v3063_v1 = vld [vmem:[#allocation13_spill] sm:$0xff] }
  0xaf   :  { %v1243_v34 = vadd.f32 %v1242_v16, %v2247_v36 }
  0xb1   :  { %v1244_v12 = vadd.f32 %v1243_v34, %v2252_v60  ;;  %v3064_v34 = vld [vmem:[#allocation34_spill] sm:$0xff] }
  0xb3   :  { %v1245_v21 = vadd.f32 %v1244_v12, %v2257_v40 }
  0xb5   :  { %v1246_v41 = vadd.f32 %v1245_v21, %v2262_v59  ;;  %v3065_v21 = vld [vmem:[#allocation35_spill] sm:$0xff] }
  0xb7   :  { %v1247_v46 = vadd.f32 %v1246_v41, %v2267_v45 }
  0xb9   :  { %v1248_v47 = vadd.f32 %v1247_v46, %v2272_v29  ;;  %v3066_v46 = vld [vmem:[#allocation14_spill] sm:$0xff] }
  0xbb   :  { %v1249_v3 = vadd.f32 %v1248_v47, %v2277_v43 }
  0xbd   :  { %v1250_v51 = vadd.f32 %v1249_v3, %v2282_v30  ;;  %v3067_v3 = vld [vmem:[#allocation36_spill] sm:$0xff] }
  0xbf   :  { %v1251_v52 = vadd.f32 %v1250_v51, %v2287_v53 }
  0xc1   :  { %v1252_v37 = vadd.f32 %v1251_v52, %v2292_v35  ;;  %v3068_v52 = vld [vmem:[#allocation37_spill] sm:$0xff] }
  0xc3   :  { %v1253_v36 = vadd.f32 %v1252_v37, %v2297_v22 }
  0xc5   :  { %v1254_v60 = vadd.f32 %v1253_v36, %v2302_v27  ;;  %v3069_v36 = vld [vmem:[#allocation16_spill] sm:$0xff] }
  0xc7   :  { %v1255_v40 = vadd.f32 %v1254_v60, %v2307_v56 }
  0xc9   :  { %v1256_v59 = vadd.f32 %v1255_v40, %v2312_v28  ;;  %v3070_v40 = vld [vmem:[#allocation38_spill] sm:$0xff] }
  0xcb   :  { %v1257_v45 = vadd.f32 %v1256_v59, %v2317_v24 }
  0xcd   :  { %v1258_v29 = vadd.f32 %v1257_v45, %v2322_v23  ;;  %v3071_v45 = vld [vmem:[#allocation39_spill] sm:$0xff] }
  0xcf   :  { %v1259_v43 = vadd.f32 %v1258_v29, %v2327_v57 }
  0xd1   :  { %v1260_v30 = vadd.f32 %v1259_v43, %v2332_v17  ;;  %v3072_v43 = vld [vmem:[#allocation17_spill] sm:$0xff] }
  0xd3   :  { %v1261_v53 = vadd.f32 %v1260_v30, %v2337_v13 }
  0xd5   :  { %v1262_v35 = vadd.f32 %v1261_v53, %v2342_v19  ;;  %v3073_v53 = vld [vmem:[#allocation40_spill] sm:$0xff] }
  0xd7   :  { %v1263_v22 = vadd.f32 %v1262_v35, %v2347_v58 }
  0xd9   :  { %v1264_v27 = vadd.f32 %v1263_v22, %v2352_v4  ;;  %v3074_v22 = vld [vmem:[#allocation41_spill] sm:$0xff] }
  0xdb   :  { %v1265_v56 = vadd.f32 %v1264_v27, %v3043_v9  ;;  %v3075_v9 = vld [vmem:[#allocation18_spill] sm:$0xff] }
  0xdd   :  { %v1266_v28 = vadd.f32 %v1265_v56, %v3044_v33 }
  0xdf   :  { %v1267_v24 = vadd.f32 %v1266_v28, %v3045_v10 }
  0xe1   :  { %v1268_v23 = vadd.f32 %v1267_v24, %v3046_v18 }
  0xe3   :  { %v1269_v57 = vadd.f32 %v1268_v23, %v3047_v42 }
  0xe5   :  { %v1270_v17 = vadd.f32 %v1269_v57, %v3048_v62 }
  0xe7   :  { %v1271_v13 = vadd.f32 %v1270_v17, %v3049_v0 }
  0xe9   :  { %v1272_v19 = vadd.f32 %v1271_v13, %v3050_v50 }
  0xeb   :  { %v1273_v58 = vadd.f32 %v1272_v19, %v3051_v14 }
  0xed   :  { %v1274_v4 = vadd.f32 %v1273_v58, %v3052_v7 }
  0xef   :  { %v1275_v8 = vadd.f32 %v1274_v4, %v3053_v20 }
  0xf1   :  { %v1276_v61 = vadd.f32 %v1275_v8, %v3054_v31 }
  0xf3   :  { %v1277_v38 = vadd.f32 %v1276_v61, %v3055_v2 }
  0xf5   :  { %v1278_v54 = vadd.f32 %v1277_v38, %v3056_v39 }
  0xf7   :  { %v1279_v25 = vadd.f32 %v1278_v54, %v3057_v63 }
  0xf9   :  { %v1280_v26 = vadd.f32 %v1279_v25, %v3058_v5 }
  0xfb   :  { %v1281_v6 = vadd.f32 %v1280_v26, %v3059_v15 }
  0xfd   :  { %v1282_v11 = vadd.f32 %v1281_v6, %v3060_v48 }
  0xff   :  { %v1283_v44 = vadd.f32 %v1282_v11, %v3061_v55 }
 0x101   :  { %v1284_v32 = vadd.f32 %v1283_v44, %v3062_v49 }
 0x103   :  { %v1285_v16 = vadd.f32 %v1284_v32, %v3063_v1 }
 0x105   :  { %v1286_v12 = vadd.f32 %v1285_v16, %v3064_v34 }
 0x107   :  { %v1287_v41 = vadd.f32 %v1286_v12, %v3065_v21 }
 0x109   :  { %v1288_v47 = vadd.f32 %v1287_v41, %v3066_v46 }
 0x10b   :  { %v1289_v51 = vadd.f32 %v1288_v47, %v3067_v3 }
 0x10d   :  { %v1290_v37 = vadd.f32 %v1289_v51, %v3068_v52 }
 0x10f   :  { %v1291_v60 = vadd.f32 %v1290_v37, %v3069_v36 }
 0x111   :  { %v1292_v59 = vadd.f32 %v1291_v60, %v3070_v40 }
 0x113   :  { %v1293_v29 = vadd.f32 %v1292_v59, %v3071_v45 }
 0x115   :  { %v1294_v30 = vadd.f32 %v1293_v29, %v3072_v43 }
 0x117   :  { %v1295_v35 = vadd.f32 %v1294_v30, %v3073_v53 }
 0x119   :  { %v1296_v27 = vadd.f32 %v1295_v35, %v3074_v22 }
 0x11b   :  { %v1297_v56 = vadd.f32 %v1296_v27, %v3075_v9 }
 0x11d   :  { %1298 = vadd.xlane.f32.xlu0 %v1297_v56 }
 0x1a6   :  { %v1299_v33 = vpop.xlane.xlu0 %1298 }
 0x1a7   :  { %v1312_v28 = vmul.f32 -1.442695, %v1299_v33 }
 0x1a9   :  { %1313 = vpow2.f32 %v1312_v28 }
 0x1b6   :  { %v1314_v10 = vpop.eup %1313 }
 0x1b7   :  { %v1303_v24 = vadd.f32 1.0, %v1314_v10 }
 0x1b9   :  { %1315 = vrcp.f32 %v1303_v24 }
 0x1c6   :  { %v1316_v18 = vpop.eup %1315 }
 0x1c7   :  { %1307 = vst.msk [vmem:[%s2717_s2] sm:$0xff] %vm1306_vm0, %v1316_v18 }

</bundles_post_ra>
